<compile_context>
chip_gen: v7x
topology: tpu7x:2x2x1
jax: 0.10.0
libtpu: 0.0.40
codegen_flags: <defaults>
</compile_context>

<pallas_src>
import functools

import jax
import jax.numpy as jnp
from jax.experimental import pallas as pl
from jax.experimental.pallas import tpu as pltpu

# Logical (PyTorch) layer sizes of DNN_2 and their lane-padded versions.
DIMS = [3 * 32 * 32, 512, 1000, 500, 200, 100, 10]
PAD_DIMS = [3072, 512, 1024, 512, 256, 128, 128]
N_LAYERS = 6


def _round_up(x, m):
    return (x + m - 1) // m * m


def _mlp_kernel(x_ref,
                w1_ref, b1_ref,
                w2_ref, b2_ref,
                w3_ref, b3_ref,
                w4_ref, b4_ref,
                w5_ref, b5_ref,
                w6_ref, b6_ref,
                o_ref):
    """Fused forward for one batch tile: 6 Linear layers, ReLU between them.

    x and weights are bf16 (weights VMEM-resident across grid steps), accumulation is f32
    via preferred_element_type, biases are f32.  Hidden activations are re-cast to bf16
    only right before each MXU dot.
    """

    def linear(h_bf16, w_ref, b_ref, relu):
        y = jnp.dot(h_bf16, w_ref[...],
                    preferred_element_type=jnp.float32) + b_ref[...]
        if relu:
            y = jnp.maximum(y, 0.0)
        return y

    # Layer 1: x_ref is already bf16 -- feed it straight to the MXU.
    h = linear(x_ref[...], w1_ref, b1_ref, relu=True)
    h = linear(h.astype(jnp.bfloat16), w2_ref, b2_ref, relu=True)
    h = linear(h.astype(jnp.bfloat16), w3_ref, b3_ref, relu=True)
    h = linear(h.astype(jnp.bfloat16), w4_ref, b4_ref, relu=True)
    h = linear(h.astype(jnp.bfloat16), w5_ref, b5_ref, relu=True)
    h = linear(h.astype(jnp.bfloat16), w6_ref, b6_ref, relu=False)

    o_ref[...] = h  # already f32


def init_params(key):
    """f32 master params mirroring nn.Linear default init (uniform +-1/sqrt(fan_in)).

    Weights stored as [fan_in, fan_out] so the kernel does x @ W
    (equivalent to PyTorch's x @ W.T with W of shape [fan_out, fan_in]).
    """
    params = []
    for i in range(N_LAYERS):
        fan_in, fan_out = DIMS[i], DIMS[i + 1]
        key, kw, kb = jax.random.split(key, 3)
        bound = 1.0 / jnp.sqrt(jnp.float32(fan_in))
        w = jax.random.uniform(kw, (fan_in, fan_out), jnp.float32, -bound, bound)
        b = jax.random.uniform(kb, (1, fan_out), jnp.float32, -bound, bound)
        params.append((w, b))
    return params


def pad_and_cast_params(params):
    """Zero-pad every layer to the lane-aligned PAD_DIMS and cast weights to bf16.

    Padded rows/cols and padded biases are zero, so (with ReLU(0)=0) the padded activation
    columns stay exactly zero and never perturb the real outputs.
    """
    padded = []
    for i, (w, b) in enumerate(params):
        pin, pout = PAD_DIMS[i], PAD_DIMS[i + 1]
        fin, fout = w.shape
        w_p = jnp.zeros((pin, pout), jnp.float32).at[:fin, :fout].set(w)
        b_p = jnp.zeros((1, pout), jnp.float32).at[:, :fout].set(b)
        padded.append((w_p.astype(jnp.bfloat16), b_p))
    return padded


@functools.partial(jax.jit, static_argnames=("tm",))
def dnn_2_forward(x_nchw, padded_params, *, tm=512):
    """x_nchw: [B, 3, 32, 32] -> logits [B, 10]."""
    B = x_nchw.shape[0]
    # Flatten exactly like torch.flatten(x, 1) on an NCHW tensor; ship as bf16 so the
    # dominant HBM stream (the input tile) is half the size.
    x = x_nchw.reshape(B, -1).astype(jnp.bfloat16)  # [B, 3072]

    # Tile selection:
    #   * at most `tm` rows per grid step (VMEM),
    #   * >= 2 grid steps whenever B >= 16 so the "parallel" axis spans both v7x TCs,
    #   * tail-aware: tile sized to the actual work so batch padding is < 8 rows.
    n_steps = max(pl.cdiv(B, tm), 2 if B >= 16 else 1)
    tm_eff = _round_up(pl.cdiv(B, n_steps), 8)
    n_steps = pl.cdiv(B, tm_eff)
    b_pad = n_steps * tm_eff
    if b_pad != B:
        x = jnp.pad(x, ((0, b_pad - B), (0, 0)))

    grid = (n_steps,)

    flat_args = [x]
    in_specs = [pl.BlockSpec((tm_eff, PAD_DIMS[0]), lambda i: (i, 0))]
    for w, b in padded_params:
        flat_args.extend([w, b])
        # Constant index_map -> weights/biases are DMA'd once and stay VMEM-resident.
        in_specs.append(pl.BlockSpec(w.shape, lambda i: (0, 0)))
        in_specs.append(pl.BlockSpec(b.shape, lambda i: (0, 0)))

    out_cols = PAD_DIMS[-1]  # 128 (lane-dense padded logits)

    weight_bytes = sum(int(w.size) * w.dtype.itemsize + int(b.size) * b.dtype.itemsize
                       for w, b in padded_params)
    flops = 2 * b_pad * sum(PAD_DIMS[i] * PAD_DIMS[i + 1] for i in range(N_LAYERS))
    bytes_accessed = (weight_bytes                 # weights fetched once (constant index_map)
                      + b_pad * PAD_DIMS[0] * 2    # bf16 input tiles
                      + b_pad * out_cols * 4)      # f32 output tiles

    out = pl.pallas_call(
        _mlp_kernel,
        out_shape=jax.ShapeDtypeStruct((b_pad, out_cols), jnp.float32),
        grid_spec=pltpu.PrefetchScalarGridSpec(
            num_scalar_prefetch=0,
            grid=grid,
            in_specs=in_specs,
            out_specs=pl.BlockSpec((tm_eff, out_cols), lambda i: (i, 0)),
        ),
        compiler_params=pltpu.CompilerParams(
            dimension_semantics=("parallel",),
            vmem_limit_bytes=48 << 20,
        ),
        cost_estimate=pl.CostEstimate(
            flops=flops, transcendentals=0, bytes_accessed=bytes_accessed),
    )(*flat_args)

    # Strip batch padding and the lane padding of the last layer.
    return out[:B, :DIMS[-1]]


def _reference_forward(x_nchw, padded_params):
    """Pure-JAX reference applying the exact same bf16 / f32-accumulate math as the kernel."""
    h = x_nchw.reshape(x_nchw.shape[0], -1).astype(jnp.bfloat16)
    for i, (w, b) in enumerate(padded_params):
        h = jnp.dot(h, w, preferred_element_type=jnp.float32) + b
        if i < len(padded_params) - 1:
            h = jnp.maximum(h, 0.0).astype(jnp.bfloat16)
    return h[:, :DIMS[-1]]


if __name__ == "__main__":
    key = jax.random.PRNGKey(0)
    key, kx = jax.random.split(key)

    B = 8
    x = jax.random.normal(kx, (B, 3, 32, 32), jnp.float32)

    params = init_params(key)                    # f32 master params (PyTorch-equivalent)
    padded_params = pad_and_cast_params(params)  # bf16 weights / f32 biases, lane-padded

    out = dnn_2_forward(x, padded_params)
    out = jax.block_until_ready(out)

    ref = _reference_forward(x, padded_params)
    assert out.shape == (B, 10), out.shape
    # bf16 quantization of x/weights is applied identically in kernel and reference; the
    # remaining difference is accumulation ordering only.
    assert jnp.allclose(out, ref, atol=1e-2, rtol=1e-2), "mismatch vs reference"

    print("KERNEL_OK")
</pallas_src>

<mosaic_0001>
module attributes {stable_mosaic.version = 11 : i64} {
  func.func @_mlp_kernel(%arg0: i32, %arg1: memref<8x3072xbf16, #tpu.memory_space<vmem>>, %arg2: memref<3072x512xbf16, #tpu.memory_space<vmem>>, %arg3: memref<1x512xf32, #tpu.memory_space<vmem>>, %arg4: memref<512x1024xbf16, #tpu.memory_space<vmem>>, %arg5: memref<1x1024xf32, #tpu.memory_space<vmem>>, %arg6: memref<1024x512xbf16, #tpu.memory_space<vmem>>, %arg7: memref<1x512xf32, #tpu.memory_space<vmem>>, %arg8: memref<512x256xbf16, #tpu.memory_space<vmem>>, %arg9: memref<1x256xf32, #tpu.memory_space<vmem>>, %arg10: memref<256x128xbf16, #tpu.memory_space<vmem>>, %arg11: memref<1x128xf32, #tpu.memory_space<vmem>>, %arg12: memref<128x128xbf16, #tpu.memory_space<vmem>>, %arg13: memref<1x128xf32, #tpu.memory_space<vmem>>, %arg14: memref<8x128xf32, #tpu.memory_space<vmem>>) attributes {dimension_semantics = [#tpu.dimension_semantics<parallel>], iteration_bounds = array<i64: 1>, scalar_prefetch = 0 : i64, scratch_operands = 0 : i64, tpu.core_type = #tpu.core_type<tc>, window_params = [{transform_indices = @transform_0, window_bounds = array<i64: 8, 3072>}, {pipeline_mode = #tpu.pipeline_mode<synchronous>, transform_indices = @transform_1, window_bounds = array<i64: 3072, 512>}, {pipeline_mode = #tpu.pipeline_mode<synchronous>, transform_indices = @transform_2, window_bounds = array<i64: 1, 512>}, {pipeline_mode = #tpu.pipeline_mode<synchronous>, transform_indices = @transform_3, window_bounds = array<i64: 512, 1024>}, {pipeline_mode = #tpu.pipeline_mode<synchronous>, transform_indices = @transform_4, window_bounds = array<i64: 1, 1024>}, {pipeline_mode = #tpu.pipeline_mode<synchronous>, transform_indices = @transform_5, window_bounds = array<i64: 1024, 512>}, {pipeline_mode = #tpu.pipeline_mode<synchronous>, transform_indices = @transform_6, window_bounds = array<i64: 1, 512>}, {pipeline_mode = #tpu.pipeline_mode<synchronous>, transform_indices = @transform_7, window_bounds = array<i64: 512, 256>}, {pipeline_mode = #tpu.pipeline_mode<synchronous>, transform_indices = @transform_8, window_bounds = array<i64: 1, 256>}, {pipeline_mode = #tpu.pipeline_mode<synchronous>, transform_indices = @transform_9, window_bounds = array<i64: 256, 128>}, {pipeline_mode = #tpu.pipeline_mode<synchronous>, transform_indices = @transform_10, window_bounds = array<i64: 1, 128>}, {pipeline_mode = #tpu.pipeline_mode<synchronous>, transform_indices = @transform_11, window_bounds = array<i64: 128, 128>}, {pipeline_mode = #tpu.pipeline_mode<synchronous>, transform_indices = @transform_12, window_bounds = array<i64: 1, 128>}, {transform_indices = @transform_13, window_bounds = array<i64: 8, 128>}]} {
    %c0 = arith.constant 0 : index
    %c0_0 = arith.constant 0 : index
    %0 = vector.load %arg1[%c0, %c0_0] : memref<8x3072xbf16, #tpu.memory_space<vmem>>, vector<8x3072xbf16>
    %c0_1 = arith.constant 0 : index
    %c0_2 = arith.constant 0 : index
    %1 = vector.load %arg2[%c0_1, %c0_2] : memref<3072x512xbf16, #tpu.memory_space<vmem>>, vector<3072x512xbf16>
    %cst = arith.constant dense<0.000000e+00> : vector<8x512xf32>
    %2 = tpu.matmul %0, %1, %cst {dimension_numbers = #tpu.dot_dimension_numbers<[1], [0], [0], [1], [0, 0, 1, 1], [], []>} : vector<8x3072xbf16>, vector<3072x512xbf16>, vector<8x512xf32> -> vector<8x512xf32>
    %c0_3 = arith.constant 0 : index
    %c0_4 = arith.constant 0 : index
    %3 = vector.load %arg3[%c0_3, %c0_4] : memref<1x512xf32, #tpu.memory_space<vmem>>, vector<1x512xf32>
    %4 = vector.broadcast %3 : vector<1x512xf32> to vector<8x512xf32>
    %5 = arith.addf %2, %4 : vector<8x512xf32>
    %cst_5 = arith.constant 0.000000e+00 : f32
    %6 = vector.broadcast %cst_5 : f32 to vector<8x512xf32>
    %7 = arith.maximumf %5, %6 : vector<8x512xf32>
    %8 = arith.truncf %7 : vector<8x512xf32> to vector<8x512xbf16>
    %c0_6 = arith.constant 0 : index
    %c0_7 = arith.constant 0 : index
    %9 = vector.load %arg4[%c0_6, %c0_7] : memref<512x1024xbf16, #tpu.memory_space<vmem>>, vector<512x1024xbf16>
    %cst_8 = arith.constant dense<0.000000e+00> : vector<8x1024xf32>
    %10 = tpu.matmul %8, %9, %cst_8 {dimension_numbers = #tpu.dot_dimension_numbers<[1], [0], [0], [1], [0, 0, 1, 1], [], []>} : vector<8x512xbf16>, vector<512x1024xbf16>, vector<8x1024xf32> -> vector<8x1024xf32>
    %c0_9 = arith.constant 0 : index
    %c0_10 = arith.constant 0 : index
    %11 = vector.load %arg5[%c0_9, %c0_10] : memref<1x1024xf32, #tpu.memory_space<vmem>>, vector<1x1024xf32>
    %12 = vector.broadcast %11 : vector<1x1024xf32> to vector<8x1024xf32>
    %13 = arith.addf %10, %12 : vector<8x1024xf32>
    %cst_11 = arith.constant 0.000000e+00 : f32
    %14 = vector.broadcast %cst_11 : f32 to vector<8x1024xf32>
    %15 = arith.maximumf %13, %14 : vector<8x1024xf32>
    %16 = arith.truncf %15 : vector<8x1024xf32> to vector<8x1024xbf16>
    %c0_12 = arith.constant 0 : index
    %c0_13 = arith.constant 0 : index
    %17 = vector.load %arg6[%c0_12, %c0_13] : memref<1024x512xbf16, #tpu.memory_space<vmem>>, vector<1024x512xbf16>
    %cst_14 = arith.constant dense<0.000000e+00> : vector<8x512xf32>
    %18 = tpu.matmul %16, %17, %cst_14 {dimension_numbers = #tpu.dot_dimension_numbers<[1], [0], [0], [1], [0, 0, 1, 1], [], []>} : vector<8x1024xbf16>, vector<1024x512xbf16>, vector<8x512xf32> -> vector<8x512xf32>
    %c0_15 = arith.constant 0 : index
    %c0_16 = arith.constant 0 : index
    %19 = vector.load %arg7[%c0_15, %c0_16] : memref<1x512xf32, #tpu.memory_space<vmem>>, vector<1x512xf32>
    %20 = vector.broadcast %19 : vector<1x512xf32> to vector<8x512xf32>
    %21 = arith.addf %18, %20 : vector<8x512xf32>
    %cst_17 = arith.constant 0.000000e+00 : f32
    %22 = vector.broadcast %cst_17 : f32 to vector<8x512xf32>
    %23 = arith.maximumf %21, %22 : vector<8x512xf32>
    %24 = arith.truncf %23 : vector<8x512xf32> to vector<8x512xbf16>
    %c0_18 = arith.constant 0 : index
    %c0_19 = arith.constant 0 : index
    %25 = vector.load %arg8[%c0_18, %c0_19] : memref<512x256xbf16, #tpu.memory_space<vmem>>, vector<512x256xbf16>
    %cst_20 = arith.constant dense<0.000000e+00> : vector<8x256xf32>
    %26 = tpu.matmul %24, %25, %cst_20 {dimension_numbers = #tpu.dot_dimension_numbers<[1], [0], [0], [1], [0, 0, 1, 1], [], []>} : vector<8x512xbf16>, vector<512x256xbf16>, vector<8x256xf32> -> vector<8x256xf32>
    %c0_21 = arith.constant 0 : index
    %c0_22 = arith.constant 0 : index
    %27 = vector.load %arg9[%c0_21, %c0_22] : memref<1x256xf32, #tpu.memory_space<vmem>>, vector<1x256xf32>
    %28 = vector.broadcast %27 : vector<1x256xf32> to vector<8x256xf32>
    %29 = arith.addf %26, %28 : vector<8x256xf32>
    %cst_23 = arith.constant 0.000000e+00 : f32
    %30 = vector.broadcast %cst_23 : f32 to vector<8x256xf32>
    %31 = arith.maximumf %29, %30 : vector<8x256xf32>
    %32 = arith.truncf %31 : vector<8x256xf32> to vector<8x256xbf16>
    %c0_24 = arith.constant 0 : index
    %c0_25 = arith.constant 0 : index
    %33 = vector.load %arg10[%c0_24, %c0_25] : memref<256x128xbf16, #tpu.memory_space<vmem>>, vector<256x128xbf16>
    %cst_26 = arith.constant dense<0.000000e+00> : vector<8x128xf32>
    %34 = tpu.matmul %32, %33, %cst_26 {dimension_numbers = #tpu.dot_dimension_numbers<[1], [0], [0], [1], [0, 0, 1, 1], [], []>} : vector<8x256xbf16>, vector<256x128xbf16>, vector<8x128xf32> -> vector<8x128xf32>
    %c0_27 = arith.constant 0 : index
    %c0_28 = arith.constant 0 : index
    %35 = vector.load %arg11[%c0_27, %c0_28] : memref<1x128xf32, #tpu.memory_space<vmem>>, vector<1x128xf32>
    %36 = vector.broadcast %35 : vector<1x128xf32> to vector<8x128xf32>
    %37 = arith.addf %34, %36 : vector<8x128xf32>
    %cst_29 = arith.constant 0.000000e+00 : f32
    %38 = vector.broadcast %cst_29 : f32 to vector<8x128xf32>
    %39 = arith.maximumf %37, %38 : vector<8x128xf32>
    %40 = arith.truncf %39 : vector<8x128xf32> to vector<8x128xbf16>
    %c0_30 = arith.constant 0 : index
    %c0_31 = arith.constant 0 : index
    %41 = vector.load %arg12[%c0_30, %c0_31] : memref<128x128xbf16, #tpu.memory_space<vmem>>, vector<128x128xbf16>
    %cst_32 = arith.constant dense<0.000000e+00> : vector<8x128xf32>
    %42 = tpu.matmul %40, %41, %cst_32 {dimension_numbers = #tpu.dot_dimension_numbers<[1], [0], [0], [1], [0, 0, 1, 1], [], []>} : vector<8x128xbf16>, vector<128x128xbf16>, vector<8x128xf32> -> vector<8x128xf32>
    %c0_33 = arith.constant 0 : index
    %c0_34 = arith.constant 0 : index
    %43 = vector.load %arg13[%c0_33, %c0_34] : memref<1x128xf32, #tpu.memory_space<vmem>>, vector<1x128xf32>
    %44 = vector.broadcast %43 : vector<1x128xf32> to vector<8x128xf32>
    %45 = arith.addf %42, %44 : vector<8x128xf32>
    %c0_35 = arith.constant 0 : index
    %c0_36 = arith.constant 0 : index
    %46 = vector.load %arg14[%c0_35, %c0_36] : memref<8x128xf32, #tpu.memory_space<vmem>>, vector<8x128xf32>
    tpu.vector_store %arg14[%c0_35, %c0_36], %45 {strides = array<i32>} : memref<8x128xf32, #tpu.memory_space<vmem>>, vector<8x128xf32>,
    return
  }
  func.func @transform_0(%arg0: i32) -> (i32, i32) {
    %c0_i32 = arith.constant 0 : i32
    %c0_i32_0 = arith.constant 0 : i32
    return %arg0, %c0_i32 : i32, i32
  }
  func.func @transform_1(%arg0: i32) -> (i32, i32) {
    %c0_i32 = arith.constant 0 : i32
    %c0_i32_0 = arith.constant 0 : i32
    %c0_i32_1 = arith.constant 0 : i32
    return %c0_i32, %c0_i32_0 : i32, i32
  }
  func.func @transform_2(%arg0: i32) -> (i32, i32) {
    %c0_i32 = arith.constant 0 : i32
    %c0_i32_0 = arith.constant 0 : i32
    %c0_i32_1 = arith.constant 0 : i32
    return %c0_i32, %c0_i32_0 : i32, i32
  }
  func.func @transform_3(%arg0: i32) -> (i32, i32) {
    %c0_i32 = arith.constant 0 : i32
    %c0_i32_0 = arith.constant 0 : i32
    %c0_i32_1 = arith.constant 0 : i32
    return %c0_i32, %c0_i32_0 : i32, i32
  }
  func.func @transform_4(%arg0: i32) -> (i32, i32) {
    %c0_i32 = arith.constant 0 : i32
    %c0_i32_0 = arith.constant 0 : i32
    %c0_i32_1 = arith.constant 0 : i32
    return %c0_i32, %c0_i32_0 : i32, i32
  }
  func.func @transform_5(%arg0: i32) -> (i32, i32) {
    %c0_i32 = arith.constant 0 : i32
    %c0_i32_0 = arith.constant 0 : i32
    %c0_i32_1 = arith.constant 0 : i32
    return %c0_i32, %c0_i32_0 : i32, i32
  }
  func.func @transform_6(%arg0: i32) -> (i32, i32) {
    %c0_i32 = arith.constant 0 : i32
    %c0_i32_0 = arith.constant 0 : i32
    %c0_i32_1 = arith.constant 0 : i32
    return %c0_i32, %c0_i32_0 : i32, i32
  }
  func.func @transform_7(%arg0: i32) -> (i32, i32) {
    %c0_i32 = arith.constant 0 : i32
    %c0_i32_0 = arith.constant 0 : i32
    %c0_i32_1 = arith.constant 0 : i32
    return %c0_i32, %c0_i32_0 : i32, i32
  }
  func.func @transform_8(%arg0: i32) -> (i32, i32) {
    %c0_i32 = arith.constant 0 : i32
    %c0_i32_0 = arith.constant 0 : i32
    %c0_i32_1 = arith.constant 0 : i32
    return %c0_i32, %c0_i32_0 : i32, i32
  }
  func.func @transform_9(%arg0: i32) -> (i32, i32) {
    %c0_i32 = arith.constant 0 : i32
    %c0_i32_0 = arith.constant 0 : i32
    %c0_i32_1 = arith.constant 0 : i32
    return %c0_i32, %c0_i32_0 : i32, i32
  }
  func.func @transform_10(%arg0: i32) -> (i32, i32) {
    %c0_i32 = arith.constant 0 : i32
    %c0_i32_0 = arith.constant 0 : i32
    %c0_i32_1 = arith.constant 0 : i32
    return %c0_i32, %c0_i32_0 : i32, i32
  }
  func.func @transform_11(%arg0: i32) -> (i32, i32) {
    %c0_i32 = arith.constant 0 : i32
    %c0_i32_0 = arith.constant 0 : i32
    %c0_i32_1 = arith.constant 0 : i32
    return %c0_i32, %c0_i32_0 : i32, i32
  }
  func.func @transform_12(%arg0: i32) -> (i32, i32) {
    %c0_i32 = arith.constant 0 : i32
    %c0_i32_0 = arith.constant 0 : i32
    %c0_i32_1 = arith.constant 0 : i32
    return %c0_i32, %c0_i32_0 : i32, i32
  }
  func.func @transform_13(%arg0: i32) -> (i32, i32) {
    %c0_i32 = arith.constant 0 : i32
    %c0_i32_0 = arith.constant 0 : i32
    return %arg0, %c0_i32 : i32, i32
  }
}

</mosaic_0001>

<bundles_post_ra>
// kernel: dnn_2_forward.1
= control target key start
LH: loop header
LB: loop body
LE: loop exit
PB: predicated region body
PF: predicated region fallthrough
CT: control target
= control target key end

     0   :  { %18 = vsyncpa [#allocation3], 0  ;;  %s14577_s0 = inlined_call_operand.vmem [shape: bf16[8,3072], index: 0, kind: input, shape index: {}]   ;;  %s14578_s1 = inlined_call_operand.hbm [shape: bf16[3072,512], index: 1, kind: input, shape index: {}]   ;;  %s14579_s2 = inlined_call_operand.hbm [shape: f32[1,512], index: 2, kind: input, shape index: {}]   ;;  %s14580_s3 = inlined_call_operand.hbm [shape: bf16[512,1024], index: 3, kind: input, shape index: {}]   ;;  %s14581_s4 = inlined_call_operand.hbm [shape: f32[1,1024], index: 4, kind: input, shape index: {}]   ;;  %s14582_s5 = inlined_call_operand.hbm [shape: bf16[1024,512], index: 5, kind: input, shape index: {}]   ;;  %s14583_s6 = inlined_call_operand.hbm [shape: f32[1,512], index: 6, kind: input, shape index: {}]   ;;  %s14584_s7 = inlined_call_operand.hbm [shape: bf16[512,256], index: 7, kind: input, shape index: {}]   ;;  %s14585_s8 = inlined_call_operand.hbm [shape: f32[1,256], index: 8, kind: input, shape index: {}]   ;;  %s14586_s9 = inlined_call_operand.hbm [shape: bf16[256,128], index: 9, kind: input, shape index: {}]   ;;  %s14587_s10 = inlined_call_operand.hbm [shape: f32[1,128], index: 10, kind: input, shape index: {}]   ;;  %s14588_s11 = inlined_call_operand.hbm [shape: bf16[128,128], index: 11, kind: input, shape index: {}]   ;;  %s14589_s12 = inlined_call_operand.hbm [shape: f32[1,128], index: 12, kind: input, shape index: {}]   ;;  %s14590_s13 = inlined_call_operand.hbm [shape: f32[8,128], index: 13, kind: output, shape index: {}]  }
   0x1   :  { %19 = vsyncpa [#allocation6], 0 }
   0x2   :  { %20 = vsyncpa [#allocation9], 0 }
   0x3   :  { %21 = vsyncpa [#allocation12], 0 }
   0x4   :  { %22 = vsyncpa [#allocation15], 0 }
   0x5   :  { %23 = vsyncpa [#allocation18], 0 }
   0x6   :  { %24 = vsyncpa [#allocation21], 0 }
   0x7   :  { %25 = vsyncpa [#allocation4], 0  ;;  %s14123_s25 = smov [#allocation5]   ;;  %s14124_s27 = smov [#allocation8]  }
   0x8   :  { %s46_s26 = sshll.u32 %s14123_s25, 4  ;;  %s68_s28 = sshll.u32 %s14124_s27, 4  ;;  %s47_s26 = int_to_ptr.vmem [resolvable:$true] %s46_s26  ;;  %s69_s28 = int_to_ptr.vmem [resolvable:$true] %s68_s28 }
   0x9   :  { %s13821_s14 = scalar_lea.hbm %s14579_s2, 64 }
   0xa   :  { %p13822_p0 = scmp.ne.s32.totalorder %s14579_s2, %s13821_s14  ;;  %p13825_p1 = scmp.lt.u32.totalorder %s13821_s14, %s14579_s2 }
   0xc   :  { %p13827_p2 = pnand %p13825_p1, %p13822_p0 }
   0xe   :  { %13830 = shalt.err (!%p13827_p2)
}
   0xf   :  { %s13831_s19 = scalar_lea.vmem %s47_s26, 64  ;;  %p13836_p4 = scmp.lt.s32.totalorder %s47_s26, %s47_s26 }
  0x10   :  { %p13832_p3 = scmp.ne.s32.totalorder %s47_s26, %s13831_s19  ;;  %p13837_p5 = scmp.lt.s32.totalorder %s13831_s19, %s13831_s19 }
  0x12   :  { %p13838_p6 = por %p13837_p5, %p13836_p4 }
  0x14   :  { %p13839_p7 = pnand %p13838_p6, %p13832_p3 }
  0x16   :  { %13842 = shalt.err (!%p13839_p7)
}
  0x17   :  { %49 = dma.hbm_to_vmem [thread:$0]  %s14579_s2, 64, %s47_s26, [#allocation6]  }
  0x18   :  { %s13843_s24 = scalar_lea.hbm %s14581_s4, 128 }
  0x19   :  { %p13844_p8 = scmp.ne.s32.totalorder %s14581_s4, %s13843_s24  ;;  %p13847_p9 = scmp.lt.u32.totalorder %s13843_s24, %s14581_s4 }
  0x1b   :  { %p13849_p10 = pnand %p13847_p9, %p13844_p8 }
  0x1d   :  { %13852 = shalt.err (!%p13849_p10)
}
  0x1e   :  { %s13853_s14 = scalar_lea.vmem %s69_s28, 128  ;;  %p13858_p12 = scmp.lt.s32.totalorder %s69_s28, %s69_s28 }
  0x1f   :  { %p13854_p11 = scmp.ne.s32.totalorder %s69_s28, %s13853_s14  ;;  %p13859_p13 = scmp.lt.s32.totalorder %s13853_s14, %s13853_s14 }
  0x21   :  { %p13860_p0 = por %p13859_p13, %p13858_p12 }
  0x23   :  { %p13861_p1 = pnand %p13860_p0, %p13854_p11 }
  0x25   :  { %13864 = shalt.err (!%p13861_p1)
}
  0x26   :  { %71 = dma.hbm_to_vmem [thread:$0]  %s14581_s4, 128, %s69_s28, [#allocation9]  }
  0x27   :  { %s14125_s15 = smov [#allocation11]   ;;  %s14126_s17 = smov [#allocation14]  }
  0x28   :  { %s90_s16 = sshll.u32 %s14125_s15, 4  ;;  %s112_s18 = sshll.u32 %s14126_s17, 4  ;;  %s91_s16 = int_to_ptr.vmem [resolvable:$true] %s90_s16  ;;  %s113_s18 = int_to_ptr.vmem [resolvable:$true] %s112_s18 }
  0x29   :  { %s13865_s21 = scalar_lea.hbm %s14583_s6, 64 }
  0x2a   :  { %p13866_p2 = scmp.ne.s32.totalorder %s14583_s6, %s13865_s21  ;;  %p13869_p3 = scmp.lt.u32.totalorder %s13865_s21, %s14583_s6 }
  0x2c   :  { %p13871_p4 = pnand %p13869_p3, %p13866_p2 }
  0x2e   :  { %13874 = shalt.err (!%p13871_p4)
}
  0x2f   :  { %s13875_s4 = scalar_lea.vmem %s91_s16, 64  ;;  %p13880_p6 = scmp.lt.s32.totalorder %s91_s16, %s91_s16 }
  0x30   :  { %p13876_p5 = scmp.ne.s32.totalorder %s91_s16, %s13875_s4  ;;  %p13881_p7 = scmp.lt.s32.totalorder %s13875_s4, %s13875_s4 }
  0x32   :  { %p13882_p8 = por %p13881_p7, %p13880_p6 }
  0x34   :  { %p13883_p9 = pnand %p13882_p8, %p13876_p5 }
  0x36   :  { %13886 = shalt.err (!%p13883_p9)
}
  0x37   :  { %93 = dma.hbm_to_vmem [thread:$0]  %s14583_s6, 64, %s91_s16, [#allocation12]  }
  0x38   :  { %s13887_s14 = scalar_lea.hbm %s14585_s8, 32 }
  0x39   :  { %p13888_p10 = scmp.ne.s32.totalorder %s14585_s8, %s13887_s14  ;;  %p13891_p11 = scmp.lt.u32.totalorder %s13887_s14, %s14585_s8 }
  0x3b   :  { %p13893_p12 = pnand %p13891_p11, %p13888_p10 }
  0x3d   :  { %13896 = shalt.err (!%p13893_p12)
}
  0x3e   :  { %s13897_s19 = scalar_lea.vmem %s113_s18, 32  ;;  %p13902_p0 = scmp.lt.s32.totalorder %s113_s18, %s113_s18 }
  0x3f   :  { %p13898_p13 = scmp.ne.s32.totalorder %s113_s18, %s13897_s19  ;;  %p13903_p1 = scmp.lt.s32.totalorder %s13897_s19, %s13897_s19 }
  0x41   :  { %p13904_p2 = por %p13903_p1, %p13902_p0 }
  0x43   :  { %p13905_p3 = pnand %p13904_p2, %p13898_p13 }
  0x45   :  { %13908 = shalt.err (!%p13905_p3)
}
  0x46   :  { %115 = dma.hbm_to_vmem [thread:$0]  %s14585_s8, 32, %s113_s18, [#allocation15]  }
  0x47   :  { %s14127_s20 = smov [#allocation17]   ;;  %s14128_s22 = smov [#allocation2]  }
  0x48   :  { %s134_s21 = sshll.u32 %s14127_s20, 4  ;;  %s33_s23 = sshll.u32 %s14128_s22, 4  ;;  %s135_s21 = int_to_ptr.vmem [resolvable:$true] %s134_s21  ;;  %s14264_s23 = int_to_ptr.vmem [resolvable:$true] %s33_s23 }
  0x49   :  { %s13909_s4 = scalar_lea.hbm %s14587_s10, 16 }
  0x4a   :  { %p13910_p4 = scmp.ne.s32.totalorder %s14587_s10, %s13909_s4  ;;  %p13913_p5 = scmp.lt.u32.totalorder %s13909_s4, %s14587_s10 }
  0x4c   :  { %p13915_p6 = pnand %p13913_p5, %p13910_p4 }
  0x4e   :  { %13918 = shalt.err (!%p13915_p6)
}
  0x4f   :  { %s13919_s8 = scalar_lea.vmem %s135_s21, 16  ;;  %s13923_s18 = scalar_lea.vmem %s135_s21, 32 }
  0x50   :  { %p13920_p7 = scmp.ne.s32.totalorder %s135_s21, %s13919_s8  ;;  %p13924_p8 = scmp.lt.s32.totalorder %s135_s21, %s135_s21 }
  0x51   :  { %p13925_p9 = scmp.lt.s32.totalorder %s13923_s18, %s13919_s8 }
  0x53   :  { %p13926_p10 = por %p13925_p9, %p13924_p8 }
  0x55   :  { %p13927_p11 = pnand %p13926_p10, %p13920_p7 }
  0x57   :  { %13930 = shalt.err (!%p13927_p11)
}
  0x58   :  { %137 = dma.hbm_to_vmem [thread:$0]  %s14587_s10, 16, %s135_s21, [#allocation18]  }
  0x59   :  { %s13931_s17 = scalar_lea.hbm %s14578_s1, 98304 }
  0x5a   :  { %p13932_p12 = scmp.ne.s32.totalorder %s14578_s1, %s13931_s17  ;;  %p13935_p13 = scmp.lt.u32.totalorder %s13931_s17, %s14578_s1 }
  0x5c   :  { %p13937_p0 = pnand %p13935_p13, %p13932_p12 }
  0x5e   :  { %13940 = shalt.err (!%p13937_p0)
}
  0x5f   :  { %s13941_s22 = scalar_lea.vmem %s14264_s23, 98304  ;;  %p13946_p2 = scmp.lt.s32.totalorder %s14264_s23, %s14264_s23 }
  0x60   :  { %p13942_p1 = scmp.ne.s32.totalorder %s14264_s23, %s13941_s22  ;;  %p13947_p3 = scmp.lt.s32.totalorder %s13941_s22, %s13941_s22 }
  0x62   :  { %p13948_p4 = por %p13947_p3, %p13946_p2 }
  0x64   :  { %p13949_p5 = pnand %p13948_p4, %p13942_p1 }
  0x66   :  { %13952 = shalt.err (!%p13949_p5)
}
  0x67   :  { %s14129_s10 = smov 256   ;;  %s14130_s21 = smov 16  }
  0x68   :  { %39 = dma.hbm_to_vmem [thread:$0]  %s14578_s1, 98304, %s14264_s23, [#allocation3], %s14129_s10, %s14129_s10, %s14130_s21  }
  0x69   :  { %s14131_s4 = smov [#allocation7]   ;;  %s13953_s30 = scalar_lea.hbm %s14580_s3, 32768 }
  0x6a   :  { %s55_s28 = sshll.u32 %s14131_s4, 4  ;;  %p13954_p6 = scmp.ne.s32.totalorder %s14580_s3, %s13953_s30  ;;  %s56_s28 = int_to_ptr.vmem [resolvable:$true] %s55_s28 }
  0x6b   :  { %p13957_p7 = scmp.lt.u32.totalorder %s13953_s30, %s14580_s3 }
  0x6d   :  { %p13959_p8 = pnand %p13957_p7, %p13954_p6 }
  0x6f   :  { %13962 = shalt.err (!%p13959_p8)
}
  0x70   :  { %s13963_s26 = scalar_lea.vmem %s56_s28, 32768  ;;  %p13968_p10 = scmp.lt.s32.totalorder %s56_s28, %s56_s28 }
  0x71   :  { %p13964_p9 = scmp.ne.s32.totalorder %s56_s28, %s13963_s26  ;;  %p13969_p11 = scmp.lt.s32.totalorder %s13963_s26, %s13963_s26 }
  0x73   :  { %p13970_p12 = por %p13969_p11, %p13968_p10 }
  0x75   :  { %p13971_p13 = pnand %p13970_p12, %p13964_p9 }
  0x77   :  { %13974 = shalt.err (!%p13971_p13)
}
  0x78   :  { %s14132_s1 = smov 512   ;;  %s14133_s23 = smov 32  }
  0x79   :  { %61 = dma.hbm_to_vmem [thread:$0]  %s14580_s3, 32768, %s56_s28, [#allocation6], %s14132_s1, %s14132_s1, %s14133_s23  }
  0x7a   :  { %s14134_s19 = smov [#allocation10]   ;;  %s14135_s16 = smov [#allocation13]  }
  0x7b   :  { %s77_s6 = sshll.u32 %s14134_s19, 4  ;;  %s99_s20 = sshll.u32 %s14135_s16, 4  ;;  %s78_s6 = int_to_ptr.vmem [resolvable:$true] %s77_s6  ;;  %s100_s20 = int_to_ptr.vmem [resolvable:$true] %s99_s20 }
  0x7c   :  { %s13975_s25 = scalar_lea.hbm %s14582_s5, 32768 }
  0x7d   :  { %p13976_p0 = scmp.ne.s32.totalorder %s14582_s5, %s13975_s25  ;;  %p13979_p1 = scmp.lt.u32.totalorder %s13975_s25, %s14582_s5 }
  0x7f   :  { %p13981_p2 = pnand %p13979_p1, %p13976_p0 }
  0x81   :  { %13984 = shalt.err (!%p13981_p2)
}
  0x82   :  { %s13985_s3 = scalar_lea.vmem %s78_s6, 32768  ;;  %p13990_p4 = scmp.lt.s32.totalorder %s78_s6, %s78_s6 }
  0x83   :  { %p13986_p3 = scmp.ne.s32.totalorder %s78_s6, %s13985_s3  ;;  %p13991_p5 = scmp.lt.s32.totalorder %s13985_s3, %s13985_s3 }
  0x85   :  { %p13992_p6 = por %p13991_p5, %p13990_p4 }
  0x87   :  { %p13993_p7 = pnand %p13992_p6, %p13986_p3 }
  0x89   :  { %13996 = shalt.err (!%p13993_p7)
}
  0x8a   :  { %83 = dma.hbm_to_vmem [thread:$0]  %s14582_s5, 32768, %s78_s6, [#allocation9], %s14129_s10, %s14129_s10, %s14130_s21  }
  0x8b   :  { %s13997_s2 = scalar_lea.hbm %s14584_s7, 8192 }
  0x8c   :  { %p13998_p8 = scmp.ne.s32.totalorder %s14584_s7, %s13997_s2  ;;  %p14001_p9 = scmp.lt.u32.totalorder %s13997_s2, %s14584_s7 }
  0x8e   :  { %p14003_p10 = pnand %p14001_p9, %p13998_p8 }
  0x90   :  { %14006 = shalt.err (!%p14003_p10)
}
  0x91   :  { %s14007_s17 = scalar_lea.vmem %s100_s20, 8192  ;;  %p14012_p12 = scmp.lt.s32.totalorder %s100_s20, %s100_s20 }
  0x92   :  { %p14008_p11 = scmp.ne.s32.totalorder %s100_s20, %s14007_s17  ;;  %p14013_p13 = scmp.lt.s32.totalorder %s14007_s17, %s14007_s17 }
  0x94   :  { %p14014_p0 = por %p14013_p13, %p14012_p12 }
  0x96   :  { %p14015_p1 = pnand %p14014_p0, %p14008_p11 }
  0x98   :  { %14018 = shalt.err (!%p14015_p1)
}
  0x99   :  { %s14136_s5 = smov 128   ;;  %s14137_s10 = smov 8  }
  0x9a   :  { %105 = dma.hbm_to_vmem [thread:$0]  %s14584_s7, 8192, %s100_s20, [#allocation12], %s14136_s5, %s14136_s5, %s14137_s10  }
  0x9b   :  { %s14138_s6 = smov [#allocation16]   ;;  %s14019_s25 = scalar_lea.hbm %s14586_s9, 2048 }
  0x9c   :  { %s121_s16 = sshll.u32 %s14138_s6, 4  ;;  %p14020_p2 = scmp.ne.s32.totalorder %s14586_s9, %s14019_s25  ;;  %s122_s16 = int_to_ptr.vmem [resolvable:$true] %s121_s16 }
  0x9d   :  { %p14023_p3 = scmp.lt.u32.totalorder %s14019_s25, %s14586_s9 }
  0x9f   :  { %p14025_p4 = pnand %p14023_p3, %p14020_p2 }
  0xa1   :  { %14028 = shalt.err (!%p14025_p4)
}
  0xa2   :  { %s14029_s3 = scalar_lea.vmem %s122_s16, 2048  ;;  %p14034_p6 = scmp.lt.s32.totalorder %s122_s16, %s122_s16 }
  0xa3   :  { %p14030_p5 = scmp.ne.s32.totalorder %s122_s16, %s14029_s3  ;;  %p14035_p7 = scmp.lt.s32.totalorder %s14029_s3, %s14029_s3 }
  0xa5   :  { %p14036_p8 = por %p14035_p7, %p14034_p6 }
  0xa7   :  { %p14037_p9 = pnand %p14036_p8, %p14030_p5 }
  0xa9   :  { %14040 = shalt.err (!%p14037_p9)
}
  0xaa   :  { %s14139_s7 = smov 64   ;;  %s14140_s20 = smov 4  }
  0xab   :  { %127 = dma.hbm_to_vmem [thread:$0]  %s14586_s9, 2048, %s122_s16, [#allocation15], %s14139_s7, %s14139_s7, %s14140_s20  }
  0xac   :  { %s14141_s18 = smov [#allocation19]   ;;  %s14142_s2 = smov [#allocation20]  }
  0xad   :  { %s143_s14 = sshll.u32 %s14141_s18, 4  ;;  %s156_s26 = sshll.u32 %s14142_s2, 4  ;;  %s144_s14 = int_to_ptr.vmem [resolvable:$true] %s143_s14  ;;  %s157_s26 = int_to_ptr.vmem [resolvable:$true] %s156_s26 }
  0xae   :  { %s14041_s15 = scalar_lea.hbm %s14588_s11, 1024 }
  0xaf   :  { %p14042_p10 = scmp.ne.s32.totalorder %s14588_s11, %s14041_s15  ;;  %p14045_p11 = scmp.lt.u32.totalorder %s14041_s15, %s14588_s11 }
  0xb1   :  { %p14047_p12 = pnand %p14045_p11, %p14042_p10 }
  0xb3   :  { %14050 = shalt.err (!%p14047_p12)
}
  0xb4   :  { %s14051_s9 = scalar_lea.vmem %s144_s14, 1024  ;;  %p14056_p0 = scmp.lt.s32.totalorder %s144_s14, %s144_s14 }
  0xb5   :  { %p14052_p13 = scmp.ne.s32.totalorder %s144_s14, %s14051_s9  ;;  %p14057_p1 = scmp.lt.s32.totalorder %s14051_s9, %s14051_s9 }
  0xb7   :  { %p14058_p2 = por %p14057_p1, %p14056_p0 }
  0xb9   :  { %p14059_p3 = pnand %p14058_p2, %p14052_p13 }
  0xbb   :  { %14062 = shalt.err (!%p14059_p3)
}
  0xbc   :  { %149 = dma.hbm_to_vmem [thread:$0]  %s14588_s11, 1024, %s144_s14, [#allocation18], %s14139_s7, %s14139_s7, %s14140_s20  }
  0xbd   :  { %s14063_s24 = scalar_lea.hbm %s14589_s12, 16 }
  0xbe   :  { %p14064_p4 = scmp.ne.s32.totalorder %s14589_s12, %s14063_s24  ;;  %p14067_p5 = scmp.lt.u32.totalorder %s14063_s24, %s14589_s12 }
  0xc0   :  { %p14069_p6 = pnand %p14067_p5, %p14064_p4 }
  0xc2   :  { %14072 = shalt.err (!%p14069_p6)
}
  0xc3   :  { %s14073_s30 = scalar_lea.vmem %s157_s26, 16  ;;  %s14077_s3 = scalar_lea.vmem %s157_s26, 32 }
  0xc4   :  { %p14074_p7 = scmp.ne.s32.totalorder %s157_s26, %s14073_s30  ;;  %p14078_p8 = scmp.lt.s32.totalorder %s157_s26, %s157_s26 }
  0xc5   :  { %p14079_p9 = scmp.lt.s32.totalorder %s14077_s3, %s14073_s30 }
  0xc7   :  { %p14080_p10 = por %p14079_p9, %p14078_p8 }
  0xc9   :  { %p14081_p11 = pnand %p14080_p10, %p14074_p7 }
  0xcb   :  { %14084 = shalt.err (!%p14081_p11)
}
  0xcc   :  { %159 = dma.hbm_to_vmem [thread:$0]  %s14589_s12, 16, %s157_s26, [#allocation21]  }
  0xcd   :  { %14107 = dma.done.wait [#allocation3], 98304  }
  0xce   :  { %14108 = vsyncadd [#allocation3], 4294868992 }
  0xcf   :  { %14109 = dma.done.wait [#allocation6], 32832  }
  0xd0   :  { %14110 = vsyncadd [#allocation6], 4294934464 }
  0xd1   :  { %14111 = dma.done.wait [#allocation9], 32896  }
  0xd2   :  { %14112 = vsyncadd [#allocation9], 4294934400 }
  0xd3   :  { %14113 = dma.done.wait [#allocation12], 8256  }
  0xd4   :  { %14114 = vsyncadd [#allocation12], 4294959040 }
  0xd5   :  { %14115 = dma.done.wait [#allocation15], 2080  }
  0xd6   :  { %14116 = vsyncadd [#allocation15], 4294965216 }
  0xd7   :  { %14117 = dma.done.wait [#allocation18], 1040  }
  0xd8   :  { %14118 = vsyncadd [#allocation18], 4294966256 }
  0xd9   :  { %14119 = dma.done.wait [#allocation21], 16  }
  0xda   :  { %14120 = vsyncadd [#allocation21], 4294967280  ;;  %v12141_v0 = vld [vmem:[#allocation2 + $0x4] ss:$16 sps:$4 sm:$0xff]   ;;  %v12143_v1 = vld [vmem:[#allocation2 + $0xc] ss:$16 sps:$4 sm:$0xff]  }
  0xdb   :  { %4923 = vmatprep.subr.bf16.mxu0 %v12141_v0  ;;  %v12145_v2 = vld [vmem:[#allocation2] ss:$16 sps:$4 sm:$0xff]   ;;  %v12146_v3 = vld [vmem:[#allocation2 + $0x8] ss:$16 sps:$4 sm:$0xff]   ;;  %5415 = vmatprep.subr.bf16.mxu1 %v12143_v1  ;;  %v12147_v4 = vld [vmem:[#allocation2 + $0x24] ss:$16 sps:$4 sm:$0xff]  }
  0xdc   :  { %4924 = vmatpush1.bf16.msra.mxu0 %v12145_v2  ;;  %5416 = vmatpush1.bf16.msra.mxu1 %v12146_v3  ;;  %v12149_v5 = vld [vmem:[#allocation2 + $0x2c] ss:$16 sps:$4 sm:$0xff]   ;;  %v12151_v6 = vld [vmem:[#allocation2 + $0x20] ss:$16 sps:$4 sm:$0xff]   ;;  %v12152_v7 = vld [vmem:[#allocation2 + $0x28] ss:$16 sps:$4 sm:$0xff]  }
  0xdd   :  { %4925 = vmatprep.subr.bf16.mxu0 %v12147_v4  ;;  %5417 = vmatprep.subr.bf16.mxu1 %v12149_v5  ;;  %v12153_v8 = vld [vmem:[#allocation2 + $0x44] ss:$16 sps:$4 sm:$0xff]   ;;  %v12155_v9 = vld [vmem:[#allocation2 + $0x4c] ss:$16 sps:$4 sm:$0xff]   ;;  %v12157_v10 = vld [vmem:[#allocation2 + $0x40] ss:$16 sps:$4 sm:$0xff]  }
  0xde   :  { %v12158_v11 = vld [vmem:[#allocation2 + $0x48] ss:$16 sps:$4 sm:$0xff]   ;;  %v12159_v12 = vld [vmem:[#allocation2 + $0x64] ss:$16 sps:$4 sm:$0xff]   ;;  %v12161_v13 = vld [vmem:[#allocation2 + $0x6c] ss:$16 sps:$4 sm:$0xff]  }
  0xdf   :  { %v12163_v14 = vld [vmem:[#allocation2 + $0x60] ss:$16 sps:$4 sm:$0xff]   ;;  %v12164_v15 = vld [vmem:[#allocation2 + $0x68] ss:$16 sps:$4 sm:$0xff]   ;;  %v12165_v16 = vld [vmem:[#allocation2 + $0x84] ss:$16 sps:$4 sm:$0xff]  }
  0xe0   :  { %4926 = vmatpush1.bf16.msra.mxu0 %v12151_v6  ;;  %5418 = vmatpush1.bf16.msra.mxu1 %v12152_v7  ;;  %v12167_v17 = vld [vmem:[#allocation2 + $0x8c] ss:$16 sps:$4 sm:$0xff]   ;;  %v12169_v18 = vld [vmem:[#allocation2 + $0x80] ss:$16 sps:$4 sm:$0xff]   ;;  %v12170_v19 = vld [vmem:[#allocation2 + $0x88] ss:$16 sps:$4 sm:$0xff]  }
  0xe1   :  { %4927 = vmatprep.subr.bf16.mxu0 %v12153_v8  ;;  %5419 = vmatprep.subr.bf16.mxu1 %v12155_v9  ;;  %v12171_v20 = vld [vmem:[#allocation2 + $0xa4] ss:$16 sps:$4 sm:$0xff]   ;;  %v12173_v21 = vld [vmem:[#allocation2 + $0xac] ss:$16 sps:$4 sm:$0xff]   ;;  %v12175_v22 = vld [vmem:[#allocation2 + $0xa0] ss:$16 sps:$4 sm:$0xff]  }
  0xe2   :  { %v12176_v23 = vld [vmem:[#allocation2 + $0xa8] ss:$16 sps:$4 sm:$0xff]   ;;  %v12177_v24 = vld [vmem:[#allocation2 + $0xc4] ss:$16 sps:$4 sm:$0xff]   ;;  %v12179_v25 = vld [vmem:[#allocation2 + $0xcc] ss:$16 sps:$4 sm:$0xff]  }
  0xe3   :  { %v12181_v26 = vld [vmem:[#allocation2 + $0xc0] ss:$16 sps:$4 sm:$0xff]   ;;  %v12182_v27 = vld [vmem:[#allocation2 + $0xc8] ss:$16 sps:$4 sm:$0xff]   ;;  %v12183_v28 = vld [vmem:[#allocation2 + $0xe4] ss:$16 sps:$4 sm:$0xff]  }
  0xe4   :  { %4928 = vmatpush1.bf16.msra.mxu0 %v12157_v10  ;;  %5420 = vmatpush1.bf16.msra.mxu1 %v12158_v11  ;;  %v12185_v29 = vld [vmem:[#allocation2 + $0xec] ss:$16 sps:$4 sm:$0xff]   ;;  %v12187_v30 = vld [vmem:[#allocation2 + $0xe0] ss:$16 sps:$4 sm:$0xff]   ;;  %v12188_v31 = vld [vmem:[#allocation2 + $0xe8] ss:$16 sps:$4 sm:$0xff]  }
  0xe5   :  { %4929 = vmatprep.subr.bf16.mxu0 %v12159_v12  ;;  %5421 = vmatprep.subr.bf16.mxu1 %v12161_v13  ;;  %v12189_v32 = vld [vmem:[#allocation2 + $0x104] ss:$16 sps:$4 sm:$0xff]   ;;  %v12191_v33 = vld [vmem:[#allocation2 + $0x10c] ss:$16 sps:$4 sm:$0xff]   ;;  %v12193_v34 = vld [vmem:[#allocation2 + $0x100] ss:$16 sps:$4 sm:$0xff]  }
  0xe6   :  { %v12194_v35 = vld [vmem:[#allocation2 + $0x108] ss:$16 sps:$4 sm:$0xff]   ;;  %v12195_v36 = vld [vmem:[#allocation2 + $0x124] ss:$16 sps:$4 sm:$0xff]   ;;  %v12197_v37 = vld [vmem:[#allocation2 + $0x12c] ss:$16 sps:$4 sm:$0xff]  }
  0xe7   :  { %v12199_v38 = vld [vmem:[#allocation2 + $0x120] ss:$16 sps:$4 sm:$0xff]   ;;  %v12200_v39 = vld [vmem:[#allocation2 + $0x128] ss:$16 sps:$4 sm:$0xff]   ;;  %v12201_v40 = vld [vmem:[#allocation2 + $0x144] ss:$16 sps:$4 sm:$0xff]  }
  0xe8   :  { %4930 = vmatpush1.bf16.msra.mxu0 %v12163_v14  ;;  %5422 = vmatpush1.bf16.msra.mxu1 %v12164_v15  ;;  %v12203_v41 = vld [vmem:[#allocation2 + $0x14c] ss:$16 sps:$4 sm:$0xff]   ;;  %v12205_v42 = vld [vmem:[#allocation2 + $0x140] ss:$16 sps:$4 sm:$0xff]   ;;  %v12206_v43 = vld [vmem:[#allocation2 + $0x148] ss:$16 sps:$4 sm:$0xff]  }
  0xe9   :  { %4931 = vmatprep.subr.bf16.mxu0 %v12165_v16  ;;  %5423 = vmatprep.subr.bf16.mxu1 %v12167_v17  ;;  %v12207_v44 = vld [vmem:[#allocation2 + $0x164] ss:$16 sps:$4 sm:$0xff]   ;;  %v12209_v45 = vld [vmem:[#allocation2 + $0x16c] ss:$16 sps:$4 sm:$0xff]   ;;  %v12211_v47 = vld [vmem:[#allocation2 + $0x160] ss:$16 sps:$4 sm:$0xff]  }
  0xea   :  { %v197_v46 = vld [vmem:[%s14577_s0] sm:$0xff]  ;;  %v12212_v49 = vld [vmem:[#allocation2 + $0x168] ss:$16 sps:$4 sm:$0xff]   ;;  %v12215_v51 = vld [vmem:[#allocation2 + $0x18c] ss:$16 sps:$4 sm:$0xff]   ;;  %vm14144_vm0 = vmmov 0  }
  0xeb   :  { %v10524_v48 = vcombine.high %v197_v46, %v197_v46  ;;  %v12213_v50 = vld [vmem:[#allocation2 + $0x184] ss:$16 sps:$4 sm:$0xff]   ;;  %v12217_v52 = vld [vmem:[#allocation2 + $0x180] ss:$16 sps:$4 sm:$0xff]   ;;  %v12218_v53 = vld [vmem:[#allocation2 + $0x188] ss:$16 sps:$4 sm:$0xff]   ;;  %v10523_v4 = vcombine.low %v197_v46, %v197_v46 }
  0xec   :  { %4932 = vmatpush1.bf16.msra.mxu0 %v12169_v18  ;;  %5424 = vmatpush1.bf16.msra.mxu1 %v12170_v19  ;;  %v12219_v54 = vld [vmem:[#allocation2 + $0x1a4] ss:$16 sps:$4 sm:$0xff]   ;;  %v12221_v55 = vld [vmem:[#allocation2 + $0x1ac] ss:$16 sps:$4 sm:$0xff]   ;;  %v12223_v56 = vld [vmem:[#allocation2 + $0x1a0] ss:$16 sps:$4 sm:$0xff]  }
  0xed   :  { %4933 = vmatprep.subr.bf16.mxu0 %v12171_v20  ;;  %5425 = vmatprep.subr.bf16.mxu1 %v12173_v21  ;;  %v12224_v57 = vld [vmem:[#allocation2 + $0x1a8] ss:$16 sps:$4 sm:$0xff]   ;;  %v12225_v58 = vld [vmem:[#allocation2 + $0x1c4] ss:$16 sps:$4 sm:$0xff]   ;;  %v12227_v59 = vld [vmem:[#allocation2 + $0x1cc] ss:$16 sps:$4 sm:$0xff]  }
  0xee   :  { %4955 = vmatprep.mubr.bf16.mxu0 %v10524_v48  ;;  %5447 = vmatprep.mubr.bf16.mxu1 %v10524_v48  ;;  %v12229_v60 = vld [vmem:[#allocation2 + $0x1c0] ss:$16 sps:$4 sm:$0xff]   ;;  %v12230_v61 = vld [vmem:[#allocation2 + $0x1c8] ss:$16 sps:$4 sm:$0xff]   ;;  %v12231_v62 = vld [vmem:[#allocation2 + $0x1e4] ss:$16 sps:$4 sm:$0xff]  }
  0xef   :  { %v12233_v63 = vld [vmem:[#allocation2 + $0x1ec] ss:$16 sps:$4 sm:$0xff]   ;;  %v12235_v0 = vld [vmem:[#allocation2 + $0x1e0] ss:$16 sps:$4 sm:$0xff]   ;;  %v12236_v1 = vld [vmem:[#allocation2 + $0x1e8] ss:$16 sps:$4 sm:$0xff]  }
  0xf0   :  { %4934 = vmatpush1.bf16.msra.mxu0 %v12175_v22  ;;  %5426 = vmatpush1.bf16.msra.mxu1 %v12176_v23  ;;  %v12241_v2 = vld [vmem:[#allocation2 + $0x204] ss:$16 sps:$4 sm:$0xff]   ;;  %v12244_v3 = vld [vmem:[#allocation2 + $0x20c] ss:$16 sps:$4 sm:$0xff]   ;;  %v12239_v5 = vld [vmem:[#allocation2 + $0x200] ss:$16 sps:$4 sm:$0xff]  }
  0xf1   :  { %4935 = vmatprep.subr.bf16.mxu0 %v12177_v24  ;;  %5427 = vmatprep.subr.bf16.mxu1 %v12179_v25  ;;  %v12242_v6 = vld [vmem:[#allocation2 + $0x208] ss:$16 sps:$4 sm:$0xff]   ;;  %v12247_v7 = vld [vmem:[#allocation2 + $0x224] ss:$16 sps:$4 sm:$0xff]   ;;  %v12250_v8 = vld [vmem:[#allocation2 + $0x22c] ss:$16 sps:$4 sm:$0xff]  }
  0xf2   :  { %v12245_v9 = vld [vmem:[#allocation2 + $0x220] ss:$16 sps:$4 sm:$0xff]   ;;  %v12248_v10 = vld [vmem:[#allocation2 + $0x228] ss:$16 sps:$4 sm:$0xff]   ;;  %v12253_v11 = vld [vmem:[#allocation2 + $0x244] ss:$16 sps:$4 sm:$0xff]  }
  0xf3   :  { %v12256_v12 = vld [vmem:[#allocation2 + $0x24c] ss:$16 sps:$4 sm:$0xff]   ;;  %v12251_v13 = vld [vmem:[#allocation2 + $0x240] ss:$16 sps:$4 sm:$0xff]   ;;  %v12254_v14 = vld [vmem:[#allocation2 + $0x248] ss:$16 sps:$4 sm:$0xff]  }
  0xf4   :  { %4936 = vmatpush1.bf16.msra.mxu0 %v12181_v26  ;;  %5428 = vmatpush1.bf16.msra.mxu1 %v12182_v27  ;;  %v12259_v15 = vld [vmem:[#allocation2 + $0x264] ss:$16 sps:$4 sm:$0xff]   ;;  %v12262_v16 = vld [vmem:[#allocation2 + $0x26c] ss:$16 sps:$4 sm:$0xff]   ;;  %v12257_v17 = vld [vmem:[#allocation2 + $0x260] ss:$16 sps:$4 sm:$0xff]  }
  0xf5   :  { %4937 = vmatprep.subr.bf16.mxu0 %v12183_v28  ;;  %5429 = vmatprep.subr.bf16.mxu1 %v12185_v29  ;;  %v12260_v18 = vld [vmem:[#allocation2 + $0x268] ss:$16 sps:$4 sm:$0xff]   ;;  %v12265_v19 = vld [vmem:[#allocation2 + $0x284] ss:$16 sps:$4 sm:$0xff]   ;;  %v12268_v20 = vld [vmem:[#allocation2 + $0x28c] ss:$16 sps:$4 sm:$0xff]  }
  0xf6   :  { %v12263_v21 = vld [vmem:[#allocation2 + $0x280] ss:$16 sps:$4 sm:$0xff]   ;;  %v12266_v22 = vld [vmem:[#allocation2 + $0x288] ss:$16 sps:$4 sm:$0xff]   ;;  %v12271_v23 = vld [vmem:[#allocation2 + $0x2a4] ss:$16 sps:$4 sm:$0xff]  }
  0xf7   :  { %v12274_v24 = vld [vmem:[#allocation2 + $0x2ac] ss:$16 sps:$4 sm:$0xff]   ;;  %v12269_v25 = vld [vmem:[#allocation2 + $0x2a0] ss:$16 sps:$4 sm:$0xff]   ;;  %v12272_v26 = vld [vmem:[#allocation2 + $0x2a8] ss:$16 sps:$4 sm:$0xff]  }
  0xf8   :  { %4938 = vmatpush1.bf16.msra.mxu0 %v12187_v30  ;;  %5430 = vmatpush1.bf16.msra.mxu1 %v12188_v31  ;;  %v12277_v27 = vld [vmem:[#allocation2 + $0x2c4] ss:$16 sps:$4 sm:$0xff]   ;;  %v12280_v28 = vld [vmem:[#allocation2 + $0x2cc] ss:$16 sps:$4 sm:$0xff]   ;;  %v12275_v31 = vld [vmem:[#allocation2 + $0x2c0] ss:$16 sps:$4 sm:$0xff]  }
  0xf9   :  { %4939 = vmatprep.subr.bf16.mxu0 %v12189_v32  ;;  %5431 = vmatprep.subr.bf16.mxu1 %v12191_v33  ;;  %v14379_v29 = vld [vmem:[%s14577_s0 + $0x8] sm:$0xff]  ;;  %v12283_v33 = vld [vmem:[#allocation2 + $0x2e4] ss:$16 sps:$4 sm:$0xff]  }
  0xfa   :  { %v10526_v30 = vcombine.high %v14379_v29, %v14379_v29  ;;  %v12278_v32 = vld [vmem:[#allocation2 + $0x2c8] ss:$16 sps:$4 sm:$0xff]   ;;  %v12304_v46 = vld [vmem:[#allocation2 + $0x34c] ss:$16 sps:$4 sm:$0xff]  }
  0xfb   :  { %v12302_v48 = vld [vmem:[#allocation2 + $0x348] ss:$16 sps:$4 sm:$0xff]  }
  0xfc   :  { %4940 = vmatpush1.bf16.msra.mxu0 %v12193_v34  ;;  %5432 = vmatpush1.bf16.msra.mxu1 %v12194_v35  ;;  %v12286_v34 = vld [vmem:[#allocation2 + $0x2ec] ss:$16 sps:$4 sm:$0xff]   ;;  %v12281_v35 = vld [vmem:[#allocation2 + $0x2e0] ss:$16 sps:$4 sm:$0xff]  }
  0xfd   :  { %4941 = vmatprep.subr.bf16.mxu0 %v12195_v36  ;;  %5433 = vmatprep.subr.bf16.mxu1 %v12197_v37  ;;  %v12284_v36 = vld [vmem:[#allocation2 + $0x2e8] ss:$16 sps:$4 sm:$0xff]   ;;  %v12289_v37 = vld [vmem:[#allocation2 + $0x304] ss:$16 sps:$4 sm:$0xff]  }
 0x100   :  { %4942 = vmatpush1.bf16.msra.mxu0 %v12199_v38  ;;  %5434 = vmatpush1.bf16.msra.mxu1 %v12200_v39  ;;  %v12292_v38 = vld [vmem:[#allocation2 + $0x30c] ss:$16 sps:$4 sm:$0xff]   ;;  %v12287_v39 = vld [vmem:[#allocation2 + $0x300] ss:$16 sps:$4 sm:$0xff]  }
 0x101   :  { %4943 = vmatprep.subr.bf16.mxu0 %v12201_v40  ;;  %5435 = vmatprep.subr.bf16.mxu1 %v12203_v41  ;;  %v12290_v40 = vld [vmem:[#allocation2 + $0x308] ss:$16 sps:$4 sm:$0xff]   ;;  %v12295_v41 = vld [vmem:[#allocation2 + $0x324] ss:$16 sps:$4 sm:$0xff]  }
 0x104   :  { %4944 = vmatpush1.bf16.msra.mxu0 %v12205_v42  ;;  %5436 = vmatpush1.bf16.msra.mxu1 %v12206_v43  ;;  %v12298_v42 = vld [vmem:[#allocation2 + $0x32c] ss:$16 sps:$4 sm:$0xff]   ;;  %v12293_v43 = vld [vmem:[#allocation2 + $0x320] ss:$16 sps:$4 sm:$0xff]  }
 0x105   :  { %4945 = vmatprep.subr.bf16.mxu0 %v12207_v44  ;;  %5437 = vmatprep.subr.bf16.mxu1 %v12209_v45  ;;  %v12296_v44 = vld [vmem:[#allocation2 + $0x328] ss:$16 sps:$4 sm:$0xff]   ;;  %v12301_v45 = vld [vmem:[#allocation2 + $0x344] ss:$16 sps:$4 sm:$0xff]  }
 0x108   :  { %4946 = vmatpush1.bf16.msra.mxu0 %v12211_v47  ;;  %5438 = vmatpush1.bf16.msra.mxu1 %v12212_v49  ;;  %v12299_v47 = vld [vmem:[#allocation2 + $0x340] ss:$16 sps:$4 sm:$0xff]   ;;  %v12307_v49 = vld [vmem:[#allocation2 + $0x364] ss:$16 sps:$4 sm:$0xff]  }
 0x109   :  { %4947 = vmatprep.subr.bf16.mxu0 %v12213_v50  ;;  %5439 = vmatprep.subr.bf16.mxu1 %v12215_v51  ;;  %v12310_v50 = vld [vmem:[#allocation2 + $0x36c] ss:$16 sps:$4 sm:$0xff]   ;;  %v12305_v51 = vld [vmem:[#allocation2 + $0x360] ss:$16 sps:$4 sm:$0xff]  }
 0x10c   :  { %4948 = vmatpush1.bf16.msra.mxu0 %v12217_v52  ;;  %5440 = vmatpush1.bf16.msra.mxu1 %v12218_v53  ;;  %v12308_v52 = vld [vmem:[#allocation2 + $0x368] ss:$16 sps:$4 sm:$0xff]   ;;  %v12313_v53 = vld [vmem:[#allocation2 + $0x384] ss:$16 sps:$4 sm:$0xff]  }
 0x10d   :  { %4949 = vmatprep.subr.bf16.mxu0 %v12219_v54  ;;  %5441 = vmatprep.subr.bf16.mxu1 %v12221_v55  ;;  %v12316_v54 = vld [vmem:[#allocation2 + $0x38c] ss:$16 sps:$4 sm:$0xff]   ;;  %v12311_v55 = vld [vmem:[#allocation2 + $0x380] ss:$16 sps:$4 sm:$0xff]  }
 0x110   :  { %4950 = vmatpush1.bf16.msra.mxu0 %v12223_v56  ;;  %5442 = vmatpush1.bf16.msra.mxu1 %v12224_v57  ;;  %v12314_v56 = vld [vmem:[#allocation2 + $0x388] ss:$16 sps:$4 sm:$0xff]   ;;  %v12319_v57 = vld [vmem:[#allocation2 + $0x3a4] ss:$16 sps:$4 sm:$0xff]  }
 0x111   :  { %4951 = vmatprep.subr.bf16.mxu0 %v12225_v58  ;;  %5443 = vmatprep.subr.bf16.mxu1 %v12227_v59  ;;  %v12322_v58 = vld [vmem:[#allocation2 + $0x3ac] ss:$16 sps:$4 sm:$0xff]   ;;  %v12317_v59 = vld [vmem:[#allocation2 + $0x3a0] ss:$16 sps:$4 sm:$0xff]  }
 0x114   :  { %4952 = vmatpush1.bf16.msra.mxu0 %v12229_v60  ;;  %5444 = vmatpush1.bf16.msra.mxu1 %v12230_v61  ;;  %v12320_v60 = vld [vmem:[#allocation2 + $0x3a8] ss:$16 sps:$4 sm:$0xff]   ;;  %v12325_v61 = vld [vmem:[#allocation2 + $0x3c4] ss:$16 sps:$4 sm:$0xff]  }
 0x115   :  { %4953 = vmatprep.subr.bf16.mxu0 %v12231_v62  ;;  %5445 = vmatprep.subr.bf16.mxu1 %v12233_v63  ;;  %v12328_v62 = vld [vmem:[#allocation2 + $0x3cc] ss:$16 sps:$4 sm:$0xff]   ;;  %v12323_v63 = vld [vmem:[#allocation2 + $0x3c0] ss:$16 sps:$4 sm:$0xff]  }
 0x118   :  { %4954 = vmatpush1.bf16.msra.mxu0 %v12235_v0  ;;  %5446 = vmatpush1.bf16.msra.mxu1 %v12236_v1  ;;  %v12326_v0 = vld [vmem:[#allocation2 + $0x3c8] ss:$16 sps:$4 sm:$0xff]   ;;  %v12331_v1 = vld [vmem:[#allocation2 + $0x3e4] ss:$16 sps:$4 sm:$0xff]  }
 0x119   :  { %4964 = vmatprep.subr.bf16.mxu0 %v12241_v2  ;;  %5456 = vmatprep.subr.bf16.mxu1 %v12244_v3  ;;  %v12334_v2 = vld [vmem:[#allocation2 + $0x3ec] ss:$16 sps:$4 sm:$0xff]   ;;  %v12329_v3 = vld [vmem:[#allocation2 + $0x3e0] ss:$16 sps:$4 sm:$0xff]  }
 0x11b   :  { %4956 = vmatmul.mubr.bf16.vlgmr.msra.gmra.mrb[0].mxu0 %v10523_v4  ;;  %5448 = vmatmul.mubr.bf16.vlgmr.msra.gmra.mrb[0].mxu1 %v10523_v4  ;;  %v12332_v4 = vld [vmem:[#allocation2 + $0x3e8] ss:$16 sps:$4 sm:$0xff]  }
 0x11c   :  { %4965 = vmatpush1.bf16.msra.mxu0 %v12239_v5  ;;  %5457 = vmatpush1.bf16.msra.mxu1 %v12242_v6  ;;  %v12339_v5 = vld [vmem:[#allocation2 + $0x404] ss:$16 sps:$4 sm:$0xff]   ;;  %v12342_v6 = vld [vmem:[#allocation2 + $0x40c] ss:$16 sps:$4 sm:$0xff]  }
 0x11d   :  { %4966 = vmatprep.subr.bf16.mxu0 %v12247_v7  ;;  %5458 = vmatprep.subr.bf16.mxu1 %v12250_v8  ;;  %v10525_v7 = vcombine.low %v14379_v29, %v14379_v29  ;;  %v12337_v8 = vld [vmem:[#allocation2 + $0x400] ss:$16 sps:$4 sm:$0xff]   ;;  %v12372_v29 = vld [vmem:[#allocation2 + $0x4ac] ss:$16 sps:$4 sm:$0xff]  }
 0x11e   :  { %4996 = vmatprep.mubr.bf16.mxu0 %v10526_v30  ;;  %5488 = vmatprep.mubr.bf16.mxu1 %v10526_v30  ;;  %v12367_v30 = vld [vmem:[#allocation2 + $0x4a0] ss:$16 sps:$4 sm:$0xff]  }
 0x120   :  { %4967 = vmatpush1.bf16.msra.mxu0 %v12245_v9  ;;  %5459 = vmatpush1.bf16.msra.mxu1 %v12248_v10  ;;  %v12340_v9 = vld [vmem:[#allocation2 + $0x408] ss:$16 sps:$4 sm:$0xff]   ;;  %v12345_v10 = vld [vmem:[#allocation2 + $0x424] ss:$16 sps:$4 sm:$0xff]  }
 0x121   :  { %4968 = vmatprep.subr.bf16.mxu0 %v12253_v11  ;;  %5460 = vmatprep.subr.bf16.mxu1 %v12256_v12  ;;  %v14388_v11 = vld [vmem:[%s14577_s0 + $0x10] sm:$0xff]  ;;  %v12348_v12 = vld [vmem:[#allocation2 + $0x42c] ss:$16 sps:$4 sm:$0xff]  }
 0x124   :  { %4969 = vmatpush1.bf16.msra.mxu0 %v12251_v13  ;;  %5461 = vmatpush1.bf16.msra.mxu1 %v12254_v14  ;;  %v10528_v13 = vcombine.high %v14388_v11, %v14388_v11  ;;  %v12343_v14 = vld [vmem:[#allocation2 + $0x420] ss:$16 sps:$4 sm:$0xff]  }
 0x125   :  { %4970 = vmatprep.subr.bf16.mxu0 %v12259_v15  ;;  %5462 = vmatprep.subr.bf16.mxu1 %v12262_v16  ;;  %v12346_v15 = vld [vmem:[#allocation2 + $0x428] ss:$16 sps:$4 sm:$0xff]   ;;  %v12351_v16 = vld [vmem:[#allocation2 + $0x444] ss:$16 sps:$4 sm:$0xff]  }
 0x128   :  { %4971 = vmatpush1.bf16.msra.mxu0 %v12257_v17  ;;  %5463 = vmatpush1.bf16.msra.mxu1 %v12260_v18  ;;  %v12354_v17 = vld [vmem:[#allocation2 + $0x44c] ss:$16 sps:$4 sm:$0xff]   ;;  %v12349_v18 = vld [vmem:[#allocation2 + $0x440] ss:$16 sps:$4 sm:$0xff]  }
 0x129   :  { %4972 = vmatprep.subr.bf16.mxu0 %v12265_v19  ;;  %5464 = vmatprep.subr.bf16.mxu1 %v12268_v20  ;;  %v12352_v19 = vld [vmem:[#allocation2 + $0x448] ss:$16 sps:$4 sm:$0xff]   ;;  %v12357_v20 = vld [vmem:[#allocation2 + $0x464] ss:$16 sps:$4 sm:$0xff]  }
 0x12c   :  { %4973 = vmatpush1.bf16.msra.mxu0 %v12263_v21  ;;  %5465 = vmatpush1.bf16.msra.mxu1 %v12266_v22  ;;  %v12360_v21 = vld [vmem:[#allocation2 + $0x46c] ss:$16 sps:$4 sm:$0xff]   ;;  %v12355_v22 = vld [vmem:[#allocation2 + $0x460] ss:$16 sps:$4 sm:$0xff]  }
 0x12d   :  { %4974 = vmatprep.subr.bf16.mxu0 %v12271_v23  ;;  %5466 = vmatprep.subr.bf16.mxu1 %v12274_v24  ;;  %v12358_v23 = vld [vmem:[#allocation2 + $0x468] ss:$16 sps:$4 sm:$0xff]   ;;  %v12363_v24 = vld [vmem:[#allocation2 + $0x484] ss:$16 sps:$4 sm:$0xff]  }
 0x130   :  { %4975 = vmatpush1.bf16.msra.mxu0 %v12269_v25  ;;  %5467 = vmatpush1.bf16.msra.mxu1 %v12272_v26  ;;  %v12366_v25 = vld [vmem:[#allocation2 + $0x48c] ss:$16 sps:$4 sm:$0xff]   ;;  %v12361_v26 = vld [vmem:[#allocation2 + $0x480] ss:$16 sps:$4 sm:$0xff]  }
 0x131   :  { %4976 = vmatprep.subr.bf16.mxu0 %v12277_v27  ;;  %5468 = vmatprep.subr.bf16.mxu1 %v12280_v28  ;;  %v12364_v27 = vld [vmem:[#allocation2 + $0x488] ss:$16 sps:$4 sm:$0xff]   ;;  %v12369_v28 = vld [vmem:[#allocation2 + $0x4a4] ss:$16 sps:$4 sm:$0xff]  }
 0x134   :  { %4977 = vmatpush1.bf16.msra.mxu0 %v12275_v31  ;;  %5469 = vmatpush1.bf16.msra.mxu1 %v12278_v32  ;;  %v12370_v31 = vld [vmem:[#allocation2 + $0x4a8] ss:$16 sps:$4 sm:$0xff]   ;;  %v12375_v32 = vld [vmem:[#allocation2 + $0x4c4] ss:$16 sps:$4 sm:$0xff]  }
 0x135   :  { %4978 = vmatprep.subr.bf16.mxu0 %v12283_v33  ;;  %5470 = vmatprep.subr.bf16.mxu1 %v12286_v34  ;;  %v12378_v33 = vld [vmem:[#allocation2 + $0x4cc] ss:$16 sps:$4 sm:$0xff]   ;;  %v12373_v34 = vld [vmem:[#allocation2 + $0x4c0] ss:$16 sps:$4 sm:$0xff]  }
 0x138   :  { %4979 = vmatpush1.bf16.msra.mxu0 %v12281_v35  ;;  %5471 = vmatpush1.bf16.msra.mxu1 %v12284_v36  ;;  %v12376_v35 = vld [vmem:[#allocation2 + $0x4c8] ss:$16 sps:$4 sm:$0xff]   ;;  %v12381_v36 = vld [vmem:[#allocation2 + $0x4e4] ss:$16 sps:$4 sm:$0xff]  }
 0x139   :  { %4980 = vmatprep.subr.bf16.mxu0 %v12289_v37  ;;  %5472 = vmatprep.subr.bf16.mxu1 %v12292_v38  ;;  %v12384_v37 = vld [vmem:[#allocation2 + $0x4ec] ss:$16 sps:$4 sm:$0xff]   ;;  %v12379_v38 = vld [vmem:[#allocation2 + $0x4e0] ss:$16 sps:$4 sm:$0xff]  }
 0x13c   :  { %4981 = vmatpush1.bf16.msra.mxu0 %v12287_v39  ;;  %5473 = vmatpush1.bf16.msra.mxu1 %v12290_v40  ;;  %v12382_v39 = vld [vmem:[#allocation2 + $0x4e8] ss:$16 sps:$4 sm:$0xff]   ;;  %v12387_v40 = vld [vmem:[#allocation2 + $0x504] ss:$16 sps:$4 sm:$0xff]  }
 0x13d   :  { %4982 = vmatprep.subr.bf16.mxu0 %v12295_v41  ;;  %5474 = vmatprep.subr.bf16.mxu1 %v12298_v42  ;;  %v12390_v41 = vld [vmem:[#allocation2 + $0x50c] ss:$16 sps:$4 sm:$0xff]   ;;  %v12385_v42 = vld [vmem:[#allocation2 + $0x500] ss:$16 sps:$4 sm:$0xff]  }
 0x140   :  { %4983 = vmatpush1.bf16.msra.mxu0 %v12293_v43  ;;  %5475 = vmatpush1.bf16.msra.mxu1 %v12296_v44  ;;  %v12388_v43 = vld [vmem:[#allocation2 + $0x508] ss:$16 sps:$4 sm:$0xff]   ;;  %v12393_v44 = vld [vmem:[#allocation2 + $0x524] ss:$16 sps:$4 sm:$0xff]  }
 0x141   :  { %4984 = vmatprep.subr.bf16.mxu0 %v12301_v45  ;;  %5476 = vmatprep.subr.bf16.mxu1 %v12304_v46  ;;  %v12396_v45 = vld [vmem:[#allocation2 + $0x52c] ss:$16 sps:$4 sm:$0xff]   ;;  %v12391_v46 = vld [vmem:[#allocation2 + $0x520] ss:$16 sps:$4 sm:$0xff]  }
 0x144   :  { %4985 = vmatpush1.bf16.msra.mxu0 %v12299_v47  ;;  %5477 = vmatpush1.bf16.msra.mxu1 %v12302_v48  ;;  %v12394_v47 = vld [vmem:[#allocation2 + $0x528] ss:$16 sps:$4 sm:$0xff]   ;;  %v12399_v48 = vld [vmem:[#allocation2 + $0x544] ss:$16 sps:$4 sm:$0xff]  }
 0x145   :  { %4986 = vmatprep.subr.bf16.mxu0 %v12307_v49  ;;  %5478 = vmatprep.subr.bf16.mxu1 %v12310_v50  ;;  %v12402_v49 = vld [vmem:[#allocation2 + $0x54c] ss:$16 sps:$4 sm:$0xff]   ;;  %v12397_v50 = vld [vmem:[#allocation2 + $0x540] ss:$16 sps:$4 sm:$0xff]  }
 0x148   :  { %4987 = vmatpush1.bf16.msra.mxu0 %v12305_v51  ;;  %5479 = vmatpush1.bf16.msra.mxu1 %v12308_v52  ;;  %v12400_v51 = vld [vmem:[#allocation2 + $0x548] ss:$16 sps:$4 sm:$0xff]   ;;  %v12405_v52 = vld [vmem:[#allocation2 + $0x564] ss:$16 sps:$4 sm:$0xff]  }
 0x149   :  { %4988 = vmatprep.subr.bf16.mxu0 %v12313_v53  ;;  %5480 = vmatprep.subr.bf16.mxu1 %v12316_v54  ;;  %v12408_v53 = vld [vmem:[#allocation2 + $0x56c] ss:$16 sps:$4 sm:$0xff]   ;;  %v12403_v54 = vld [vmem:[#allocation2 + $0x560] ss:$16 sps:$4 sm:$0xff]  }
 0x14c   :  { %4989 = vmatpush1.bf16.msra.mxu0 %v12311_v55  ;;  %5481 = vmatpush1.bf16.msra.mxu1 %v12314_v56  ;;  %v12406_v55 = vld [vmem:[#allocation2 + $0x568] ss:$16 sps:$4 sm:$0xff]   ;;  %v12411_v56 = vld [vmem:[#allocation2 + $0x584] ss:$16 sps:$4 sm:$0xff]  }
 0x14d   :  { %4990 = vmatprep.subr.bf16.mxu0 %v12319_v57  ;;  %5482 = vmatprep.subr.bf16.mxu1 %v12322_v58  ;;  %v12414_v57 = vld [vmem:[#allocation2 + $0x58c] ss:$16 sps:$4 sm:$0xff]   ;;  %v12409_v58 = vld [vmem:[#allocation2 + $0x580] ss:$16 sps:$4 sm:$0xff]  }
 0x150   :  { %4991 = vmatpush1.bf16.msra.mxu0 %v12317_v59  ;;  %5483 = vmatpush1.bf16.msra.mxu1 %v12320_v60  ;;  %v12412_v59 = vld [vmem:[#allocation2 + $0x588] ss:$16 sps:$4 sm:$0xff]   ;;  %v12417_v60 = vld [vmem:[#allocation2 + $0x5a4] ss:$16 sps:$4 sm:$0xff]  }
 0x151   :  { %4992 = vmatprep.subr.bf16.mxu0 %v12325_v61  ;;  %5484 = vmatprep.subr.bf16.mxu1 %v12328_v62  ;;  %v12420_v61 = vld [vmem:[#allocation2 + $0x5ac] ss:$16 sps:$4 sm:$0xff]   ;;  %v12415_v62 = vld [vmem:[#allocation2 + $0x5a0] ss:$16 sps:$4 sm:$0xff]  }
 0x154   :  { %4993 = vmatpush1.bf16.msra.mxu0 %v12323_v63  ;;  %5485 = vmatpush1.bf16.msra.mxu1 %v12326_v0  ;;  %v12418_v63 = vld [vmem:[#allocation2 + $0x5a8] ss:$16 sps:$4 sm:$0xff]   ;;  %v12423_v0 = vld [vmem:[#allocation2 + $0x5c4] ss:$16 sps:$4 sm:$0xff]  }
 0x155   :  { %4994 = vmatprep.subr.bf16.mxu0 %v12331_v1  ;;  %5486 = vmatprep.subr.bf16.mxu1 %v12334_v2  ;;  %v12426_v1 = vld [vmem:[#allocation2 + $0x5cc] ss:$16 sps:$4 sm:$0xff]   ;;  %v12421_v2 = vld [vmem:[#allocation2 + $0x5c0] ss:$16 sps:$4 sm:$0xff]  }
 0x158   :  { %4995 = vmatpush1.bf16.msra.mxu0 %v12329_v3  ;;  %5487 = vmatpush1.bf16.msra.mxu1 %v12332_v4  ;;  %v12424_v3 = vld [vmem:[#allocation2 + $0x5c8] ss:$16 sps:$4 sm:$0xff]   ;;  %v12429_v4 = vld [vmem:[#allocation2 + $0x5e4] ss:$16 sps:$4 sm:$0xff]  }
 0x159   :  { %5005 = vmatprep.subr.bf16.mxu0 %v12339_v5  ;;  %5497 = vmatprep.subr.bf16.mxu1 %v12342_v6  ;;  %v12432_v5 = vld [vmem:[#allocation2 + $0x5ec] ss:$16 sps:$4 sm:$0xff]   ;;  %v12427_v6 = vld [vmem:[#allocation2 + $0x5e0] ss:$16 sps:$4 sm:$0xff]  }
 0x15b   :  { %4997 = vmatmul.mubr.bf16.vlgmr.msra.gmra.mrb[0].mxu0 %v10525_v7  ;;  %5489 = vmatmul.mubr.bf16.vlgmr.msra.gmra.mrb[0].mxu1 %v10525_v7  ;;  %v12430_v7 = vld [vmem:[#allocation2 + $0x5e8] ss:$16 sps:$4 sm:$0xff]  }
 0x15c   :  { %5006 = vmatpush1.bf16.msra.mxu0 %v12337_v8  ;;  %5498 = vmatpush1.bf16.msra.mxu1 %v12340_v9  ;;  %v12437_v8 = vld [vmem:[#allocation2 + $0x604] ss:$16 sps:$4 sm:$0xff]   ;;  %v12440_v9 = vld [vmem:[#allocation2 + $0x60c] ss:$16 sps:$4 sm:$0xff]  }
 0x15d   :  { %5007 = vmatprep.subr.bf16.mxu0 %v12345_v10  ;;  %5499 = vmatprep.subr.bf16.mxu1 %v12348_v12  ;;  %v12435_v10 = vld [vmem:[#allocation2 + $0x600] ss:$16 sps:$4 sm:$0xff]   ;;  %v10527_v12 = vcombine.low %v14388_v11, %v14388_v11  ;;  %v12449_v11 = vld [vmem:[#allocation2 + $0x644] ss:$16 sps:$4 sm:$0xff]  }
 0x15e   :  { %5037 = vmatprep.mubr.bf16.mxu0 %v10528_v13  ;;  %5529 = vmatprep.mubr.bf16.mxu1 %v10528_v13  ;;  %v12438_v13 = vld [vmem:[#allocation2 + $0x608] ss:$16 sps:$4 sm:$0xff]  }
 0x160   :  { %5008 = vmatpush1.bf16.msra.mxu0 %v12343_v14  ;;  %5500 = vmatpush1.bf16.msra.mxu1 %v12346_v15  ;;  %v14397_v14 = vld [vmem:[%s14577_s0 + $0x18] sm:$0xff]  ;;  %v12443_v15 = vld [vmem:[#allocation2 + $0x624] ss:$16 sps:$4 sm:$0xff]  }
 0x161   :  { %5009 = vmatprep.subr.bf16.mxu0 %v12351_v16  ;;  %5501 = vmatprep.subr.bf16.mxu1 %v12354_v17  ;;  %v12446_v16 = vld [vmem:[#allocation2 + $0x62c] ss:$16 sps:$4 sm:$0xff]   ;;  %v10530_v17 = vcombine.high %v14397_v14, %v14397_v14 }
 0x164   :  { %5010 = vmatpush1.bf16.msra.mxu0 %v12349_v18  ;;  %5502 = vmatpush1.bf16.msra.mxu1 %v12352_v19  ;;  %v12441_v18 = vld [vmem:[#allocation2 + $0x620] ss:$16 sps:$4 sm:$0xff]   ;;  %v12444_v19 = vld [vmem:[#allocation2 + $0x628] ss:$16 sps:$4 sm:$0xff]  }
 0x165   :  { %5011 = vmatprep.subr.bf16.mxu0 %v12357_v20  ;;  %5503 = vmatprep.subr.bf16.mxu1 %v12360_v21  ;;  %v12452_v20 = vld [vmem:[#allocation2 + $0x64c] ss:$16 sps:$4 sm:$0xff]   ;;  %v12447_v21 = vld [vmem:[#allocation2 + $0x640] ss:$16 sps:$4 sm:$0xff]  }
 0x168   :  { %5012 = vmatpush1.bf16.msra.mxu0 %v12355_v22  ;;  %5504 = vmatpush1.bf16.msra.mxu1 %v12358_v23  ;;  %v12450_v22 = vld [vmem:[#allocation2 + $0x648] ss:$16 sps:$4 sm:$0xff]   ;;  %v12455_v23 = vld [vmem:[#allocation2 + $0x664] ss:$16 sps:$4 sm:$0xff]  }
 0x169   :  { %5013 = vmatprep.subr.bf16.mxu0 %v12363_v24  ;;  %5505 = vmatprep.subr.bf16.mxu1 %v12366_v25  ;;  %v12458_v24 = vld [vmem:[#allocation2 + $0x66c] ss:$16 sps:$4 sm:$0xff]   ;;  %v12453_v25 = vld [vmem:[#allocation2 + $0x660] ss:$16 sps:$4 sm:$0xff]  }
 0x16c   :  { %5014 = vmatpush1.bf16.msra.mxu0 %v12361_v26  ;;  %5506 = vmatpush1.bf16.msra.mxu1 %v12364_v27  ;;  %v12456_v26 = vld [vmem:[#allocation2 + $0x668] ss:$16 sps:$4 sm:$0xff]   ;;  %v12461_v27 = vld [vmem:[#allocation2 + $0x684] ss:$16 sps:$4 sm:$0xff]  }
 0x16d   :  { %5015 = vmatprep.subr.bf16.mxu0 %v12369_v28  ;;  %5507 = vmatprep.subr.bf16.mxu1 %v12372_v29  ;;  %v12464_v28 = vld [vmem:[#allocation2 + $0x68c] ss:$16 sps:$4 sm:$0xff]   ;;  %v12459_v29 = vld [vmem:[#allocation2 + $0x680] ss:$16 sps:$4 sm:$0xff]  }
 0x170   :  { %5016 = vmatpush1.bf16.msra.mxu0 %v12367_v30  ;;  %5508 = vmatpush1.bf16.msra.mxu1 %v12370_v31  ;;  %v12462_v30 = vld [vmem:[#allocation2 + $0x688] ss:$16 sps:$4 sm:$0xff]   ;;  %v12467_v31 = vld [vmem:[#allocation2 + $0x6a4] ss:$16 sps:$4 sm:$0xff]  }
 0x171   :  { %5017 = vmatprep.subr.bf16.mxu0 %v12375_v32  ;;  %5509 = vmatprep.subr.bf16.mxu1 %v12378_v33  ;;  %v12470_v32 = vld [vmem:[#allocation2 + $0x6ac] ss:$16 sps:$4 sm:$0xff]   ;;  %v12465_v33 = vld [vmem:[#allocation2 + $0x6a0] ss:$16 sps:$4 sm:$0xff]  }
 0x174   :  { %5018 = vmatpush1.bf16.msra.mxu0 %v12373_v34  ;;  %5510 = vmatpush1.bf16.msra.mxu1 %v12376_v35  ;;  %v12468_v34 = vld [vmem:[#allocation2 + $0x6a8] ss:$16 sps:$4 sm:$0xff]   ;;  %v12473_v35 = vld [vmem:[#allocation2 + $0x6c4] ss:$16 sps:$4 sm:$0xff]  }
 0x175   :  { %5019 = vmatprep.subr.bf16.mxu0 %v12381_v36  ;;  %5511 = vmatprep.subr.bf16.mxu1 %v12384_v37  ;;  %v12476_v36 = vld [vmem:[#allocation2 + $0x6cc] ss:$16 sps:$4 sm:$0xff]   ;;  %v12471_v37 = vld [vmem:[#allocation2 + $0x6c0] ss:$16 sps:$4 sm:$0xff]  }
 0x178   :  { %5020 = vmatpush1.bf16.msra.mxu0 %v12379_v38  ;;  %5512 = vmatpush1.bf16.msra.mxu1 %v12382_v39  ;;  %v12474_v38 = vld [vmem:[#allocation2 + $0x6c8] ss:$16 sps:$4 sm:$0xff]   ;;  %v12479_v39 = vld [vmem:[#allocation2 + $0x6e4] ss:$16 sps:$4 sm:$0xff]  }
 0x179   :  { %5021 = vmatprep.subr.bf16.mxu0 %v12387_v40  ;;  %5513 = vmatprep.subr.bf16.mxu1 %v12390_v41  ;;  %v12482_v40 = vld [vmem:[#allocation2 + $0x6ec] ss:$16 sps:$4 sm:$0xff]   ;;  %v12477_v41 = vld [vmem:[#allocation2 + $0x6e0] ss:$16 sps:$4 sm:$0xff]  }
 0x17c   :  { %5022 = vmatpush1.bf16.msra.mxu0 %v12385_v42  ;;  %5514 = vmatpush1.bf16.msra.mxu1 %v12388_v43  ;;  %v12480_v42 = vld [vmem:[#allocation2 + $0x6e8] ss:$16 sps:$4 sm:$0xff]   ;;  %v12485_v43 = vld [vmem:[#allocation2 + $0x704] ss:$16 sps:$4 sm:$0xff]  }
 0x17d   :  { %5023 = vmatprep.subr.bf16.mxu0 %v12393_v44  ;;  %5515 = vmatprep.subr.bf16.mxu1 %v12396_v45  ;;  %v12488_v44 = vld [vmem:[#allocation2 + $0x70c] ss:$16 sps:$4 sm:$0xff]   ;;  %v12483_v45 = vld [vmem:[#allocation2 + $0x700] ss:$16 sps:$4 sm:$0xff]  }
 0x180   :  { %5024 = vmatpush1.bf16.msra.mxu0 %v12391_v46  ;;  %5516 = vmatpush1.bf16.msra.mxu1 %v12394_v47  ;;  %v12486_v46 = vld [vmem:[#allocation2 + $0x708] ss:$16 sps:$4 sm:$0xff]   ;;  %v12491_v47 = vld [vmem:[#allocation2 + $0x724] ss:$16 sps:$4 sm:$0xff]  }
 0x181   :  { %5025 = vmatprep.subr.bf16.mxu0 %v12399_v48  ;;  %5517 = vmatprep.subr.bf16.mxu1 %v12402_v49  ;;  %v12494_v48 = vld [vmem:[#allocation2 + $0x72c] ss:$16 sps:$4 sm:$0xff]   ;;  %v12489_v49 = vld [vmem:[#allocation2 + $0x720] ss:$16 sps:$4 sm:$0xff]  }
 0x184   :  { %5026 = vmatpush1.bf16.msra.mxu0 %v12397_v50  ;;  %5518 = vmatpush1.bf16.msra.mxu1 %v12400_v51  ;;  %v12492_v50 = vld [vmem:[#allocation2 + $0x728] ss:$16 sps:$4 sm:$0xff]   ;;  %v12497_v51 = vld [vmem:[#allocation2 + $0x744] ss:$16 sps:$4 sm:$0xff]  }
 0x185   :  { %5027 = vmatprep.subr.bf16.mxu0 %v12405_v52  ;;  %5519 = vmatprep.subr.bf16.mxu1 %v12408_v53  ;;  %v12500_v52 = vld [vmem:[#allocation2 + $0x74c] ss:$16 sps:$4 sm:$0xff]   ;;  %v12495_v53 = vld [vmem:[#allocation2 + $0x740] ss:$16 sps:$4 sm:$0xff]  }
 0x188   :  { %5028 = vmatpush1.bf16.msra.mxu0 %v12403_v54  ;;  %5520 = vmatpush1.bf16.msra.mxu1 %v12406_v55  ;;  %v12498_v54 = vld [vmem:[#allocation2 + $0x748] ss:$16 sps:$4 sm:$0xff]   ;;  %v12503_v55 = vld [vmem:[#allocation2 + $0x764] ss:$16 sps:$4 sm:$0xff]  }
 0x189   :  { %5029 = vmatprep.subr.bf16.mxu0 %v12411_v56  ;;  %5521 = vmatprep.subr.bf16.mxu1 %v12414_v57  ;;  %v12506_v56 = vld [vmem:[#allocation2 + $0x76c] ss:$16 sps:$4 sm:$0xff]   ;;  %v12501_v57 = vld [vmem:[#allocation2 + $0x760] ss:$16 sps:$4 sm:$0xff]  }
 0x18c   :  { %5030 = vmatpush1.bf16.msra.mxu0 %v12409_v58  ;;  %5522 = vmatpush1.bf16.msra.mxu1 %v12412_v59  ;;  %v12504_v58 = vld [vmem:[#allocation2 + $0x768] ss:$16 sps:$4 sm:$0xff]   ;;  %v12509_v59 = vld [vmem:[#allocation2 + $0x784] ss:$16 sps:$4 sm:$0xff]  }
 0x18d   :  { %5031 = vmatprep.subr.bf16.mxu0 %v12417_v60  ;;  %5523 = vmatprep.subr.bf16.mxu1 %v12420_v61  ;;  %v12512_v60 = vld [vmem:[#allocation2 + $0x78c] ss:$16 sps:$4 sm:$0xff]   ;;  %v12507_v61 = vld [vmem:[#allocation2 + $0x780] ss:$16 sps:$4 sm:$0xff]  }
 0x190   :  { %5032 = vmatpush1.bf16.msra.mxu0 %v12415_v62  ;;  %5524 = vmatpush1.bf16.msra.mxu1 %v12418_v63  ;;  %v12510_v62 = vld [vmem:[#allocation2 + $0x788] ss:$16 sps:$4 sm:$0xff]   ;;  %v12515_v63 = vld [vmem:[#allocation2 + $0x7a4] ss:$16 sps:$4 sm:$0xff]  }
 0x191   :  { %5033 = vmatprep.subr.bf16.mxu0 %v12423_v0  ;;  %5525 = vmatprep.subr.bf16.mxu1 %v12426_v1  ;;  %v12518_v0 = vld [vmem:[#allocation2 + $0x7ac] ss:$16 sps:$4 sm:$0xff]   ;;  %v12513_v1 = vld [vmem:[#allocation2 + $0x7a0] ss:$16 sps:$4 sm:$0xff]  }
 0x194   :  { %5034 = vmatpush1.bf16.msra.mxu0 %v12421_v2  ;;  %5526 = vmatpush1.bf16.msra.mxu1 %v12424_v3  ;;  %v12516_v2 = vld [vmem:[#allocation2 + $0x7a8] ss:$16 sps:$4 sm:$0xff]   ;;  %v12521_v3 = vld [vmem:[#allocation2 + $0x7c4] ss:$16 sps:$4 sm:$0xff]  }
 0x195   :  { %5035 = vmatprep.subr.bf16.mxu0 %v12429_v4  ;;  %5527 = vmatprep.subr.bf16.mxu1 %v12432_v5  ;;  %v12524_v4 = vld [vmem:[#allocation2 + $0x7cc] ss:$16 sps:$4 sm:$0xff]   ;;  %v12519_v5 = vld [vmem:[#allocation2 + $0x7c0] ss:$16 sps:$4 sm:$0xff]  }
 0x198   :  { %5036 = vmatpush1.bf16.msra.mxu0 %v12427_v6  ;;  %5528 = vmatpush1.bf16.msra.mxu1 %v12430_v7  ;;  %v12522_v6 = vld [vmem:[#allocation2 + $0x7c8] ss:$16 sps:$4 sm:$0xff]   ;;  %v12527_v7 = vld [vmem:[#allocation2 + $0x7e4] ss:$16 sps:$4 sm:$0xff]  }
 0x199   :  { %5046 = vmatprep.subr.bf16.mxu0 %v12437_v8  ;;  %5538 = vmatprep.subr.bf16.mxu1 %v12440_v9  ;;  %v12530_v8 = vld [vmem:[#allocation2 + $0x7ec] ss:$16 sps:$4 sm:$0xff]   ;;  %v12525_v9 = vld [vmem:[#allocation2 + $0x7e0] ss:$16 sps:$4 sm:$0xff]  }
 0x19b   :  { %5038 = vmatmul.mubr.bf16.vlgmr.msra.gmra.mrb[0].mxu0 %v10527_v12  ;;  %5530 = vmatmul.mubr.bf16.vlgmr.msra.gmra.mrb[0].mxu1 %v10527_v12  ;;  %v12535_v12 = vld [vmem:[#allocation2 + $0x804] ss:$16 sps:$4 sm:$0xff]  }
 0x19c   :  { %5047 = vmatpush1.bf16.msra.mxu0 %v12435_v10  ;;  %5539 = vmatpush1.bf16.msra.mxu1 %v12438_v13  ;;  %v12528_v10 = vld [vmem:[#allocation2 + $0x7e8] ss:$16 sps:$4 sm:$0xff]   ;;  %v12538_v13 = vld [vmem:[#allocation2 + $0x80c] ss:$16 sps:$4 sm:$0xff]  }
 0x19d   :  { %5048 = vmatprep.subr.bf16.mxu0 %v12443_v15  ;;  %5540 = vmatprep.subr.bf16.mxu1 %v12446_v16  ;;  %v12533_v15 = vld [vmem:[#allocation2 + $0x800] ss:$16 sps:$4 sm:$0xff]   ;;  %v10529_v16 = vcombine.low %v14397_v14, %v14397_v14 }
 0x19e   :  { %5078 = vmatprep.mubr.bf16.mxu0 %v10530_v17  ;;  %5570 = vmatprep.mubr.bf16.mxu1 %v10530_v17  ;;  %v14406_v17 = vld [vmem:[%s14577_s0 + $0x20] sm:$0xff] }
 0x19f   :  { %v12539_v14 = vld [vmem:[#allocation2 + $0x820] ss:$16 sps:$4 sm:$0xff]  }
 0x1a0   :  { %5049 = vmatpush1.bf16.msra.mxu0 %v12441_v18  ;;  %5541 = vmatpush1.bf16.msra.mxu1 %v12444_v19  ;;  %v12536_v18 = vld [vmem:[#allocation2 + $0x808] ss:$16 sps:$4 sm:$0xff]   ;;  %v12541_v19 = vld [vmem:[#allocation2 + $0x824] ss:$16 sps:$4 sm:$0xff]  }
 0x1a1   :  { %5050 = vmatprep.subr.bf16.mxu0 %v12449_v11  ;;  %5542 = vmatprep.subr.bf16.mxu1 %v12452_v20  ;;  %v12544_v11 = vld [vmem:[#allocation2 + $0x82c] ss:$16 sps:$4 sm:$0xff]   ;;  %v10532_v20 = vcombine.high %v14406_v17, %v14406_v17 }
 0x1a4   :  { %5051 = vmatpush1.bf16.msra.mxu0 %v12447_v21  ;;  %5543 = vmatpush1.bf16.msra.mxu1 %v12450_v22  ;;  %v12542_v21 = vld [vmem:[#allocation2 + $0x828] ss:$16 sps:$4 sm:$0xff]   ;;  %v12547_v22 = vld [vmem:[#allocation2 + $0x844] ss:$16 sps:$4 sm:$0xff]  }
 0x1a5   :  { %5052 = vmatprep.subr.bf16.mxu0 %v12455_v23  ;;  %5544 = vmatprep.subr.bf16.mxu1 %v12458_v24  ;;  %v12550_v23 = vld [vmem:[#allocation2 + $0x84c] ss:$16 sps:$4 sm:$0xff]   ;;  %v12545_v24 = vld [vmem:[#allocation2 + $0x840] ss:$16 sps:$4 sm:$0xff]  }
 0x1a8   :  { %5053 = vmatpush1.bf16.msra.mxu0 %v12453_v25  ;;  %5545 = vmatpush1.bf16.msra.mxu1 %v12456_v26  ;;  %v12548_v25 = vld [vmem:[#allocation2 + $0x848] ss:$16 sps:$4 sm:$0xff]   ;;  %v12553_v26 = vld [vmem:[#allocation2 + $0x864] ss:$16 sps:$4 sm:$0xff]  }
 0x1a9   :  { %5054 = vmatprep.subr.bf16.mxu0 %v12461_v27  ;;  %5546 = vmatprep.subr.bf16.mxu1 %v12464_v28  ;;  %v12556_v27 = vld [vmem:[#allocation2 + $0x86c] ss:$16 sps:$4 sm:$0xff]   ;;  %v12551_v28 = vld [vmem:[#allocation2 + $0x860] ss:$16 sps:$4 sm:$0xff]  }
 0x1ac   :  { %5055 = vmatpush1.bf16.msra.mxu0 %v12459_v29  ;;  %5547 = vmatpush1.bf16.msra.mxu1 %v12462_v30  ;;  %v12554_v29 = vld [vmem:[#allocation2 + $0x868] ss:$16 sps:$4 sm:$0xff]   ;;  %v12559_v30 = vld [vmem:[#allocation2 + $0x884] ss:$16 sps:$4 sm:$0xff]  }
 0x1ad   :  { %5056 = vmatprep.subr.bf16.mxu0 %v12467_v31  ;;  %5548 = vmatprep.subr.bf16.mxu1 %v12470_v32  ;;  %v12562_v31 = vld [vmem:[#allocation2 + $0x88c] ss:$16 sps:$4 sm:$0xff]   ;;  %v12557_v32 = vld [vmem:[#allocation2 + $0x880] ss:$16 sps:$4 sm:$0xff]  }
 0x1b0   :  { %5057 = vmatpush1.bf16.msra.mxu0 %v12465_v33  ;;  %5549 = vmatpush1.bf16.msra.mxu1 %v12468_v34  ;;  %v12560_v33 = vld [vmem:[#allocation2 + $0x888] ss:$16 sps:$4 sm:$0xff]   ;;  %v12565_v34 = vld [vmem:[#allocation2 + $0x8a4] ss:$16 sps:$4 sm:$0xff]  }
 0x1b1   :  { %5058 = vmatprep.subr.bf16.mxu0 %v12473_v35  ;;  %5550 = vmatprep.subr.bf16.mxu1 %v12476_v36  ;;  %v12568_v35 = vld [vmem:[#allocation2 + $0x8ac] ss:$16 sps:$4 sm:$0xff]   ;;  %v12563_v36 = vld [vmem:[#allocation2 + $0x8a0] ss:$16 sps:$4 sm:$0xff]  }
 0x1b4   :  { %5059 = vmatpush1.bf16.msra.mxu0 %v12471_v37  ;;  %5551 = vmatpush1.bf16.msra.mxu1 %v12474_v38  ;;  %v12566_v37 = vld [vmem:[#allocation2 + $0x8a8] ss:$16 sps:$4 sm:$0xff]   ;;  %v12571_v38 = vld [vmem:[#allocation2 + $0x8c4] ss:$16 sps:$4 sm:$0xff]  }
 0x1b5   :  { %5060 = vmatprep.subr.bf16.mxu0 %v12479_v39  ;;  %5552 = vmatprep.subr.bf16.mxu1 %v12482_v40  ;;  %v12574_v39 = vld [vmem:[#allocation2 + $0x8cc] ss:$16 sps:$4 sm:$0xff]   ;;  %v12569_v40 = vld [vmem:[#allocation2 + $0x8c0] ss:$16 sps:$4 sm:$0xff]  }
 0x1b8   :  { %5061 = vmatpush1.bf16.msra.mxu0 %v12477_v41  ;;  %5553 = vmatpush1.bf16.msra.mxu1 %v12480_v42  ;;  %v12572_v41 = vld [vmem:[#allocation2 + $0x8c8] ss:$16 sps:$4 sm:$0xff]   ;;  %v12577_v42 = vld [vmem:[#allocation2 + $0x8e4] ss:$16 sps:$4 sm:$0xff]  }
 0x1b9   :  { %5062 = vmatprep.subr.bf16.mxu0 %v12485_v43  ;;  %5554 = vmatprep.subr.bf16.mxu1 %v12488_v44  ;;  %v12580_v43 = vld [vmem:[#allocation2 + $0x8ec] ss:$16 sps:$4 sm:$0xff]   ;;  %v12575_v44 = vld [vmem:[#allocation2 + $0x8e0] ss:$16 sps:$4 sm:$0xff]  }
 0x1bc   :  { %5063 = vmatpush1.bf16.msra.mxu0 %v12483_v45  ;;  %5555 = vmatpush1.bf16.msra.mxu1 %v12486_v46  ;;  %v12578_v45 = vld [vmem:[#allocation2 + $0x8e8] ss:$16 sps:$4 sm:$0xff]   ;;  %v12583_v46 = vld [vmem:[#allocation2 + $0x904] ss:$16 sps:$4 sm:$0xff]  }
 0x1bd   :  { %5064 = vmatprep.subr.bf16.mxu0 %v12491_v47  ;;  %5556 = vmatprep.subr.bf16.mxu1 %v12494_v48  ;;  %v12586_v47 = vld [vmem:[#allocation2 + $0x90c] ss:$16 sps:$4 sm:$0xff]   ;;  %v12581_v48 = vld [vmem:[#allocation2 + $0x900] ss:$16 sps:$4 sm:$0xff]  }
 0x1c0   :  { %5065 = vmatpush1.bf16.msra.mxu0 %v12489_v49  ;;  %5557 = vmatpush1.bf16.msra.mxu1 %v12492_v50  ;;  %v12584_v49 = vld [vmem:[#allocation2 + $0x908] ss:$16 sps:$4 sm:$0xff]   ;;  %v12589_v50 = vld [vmem:[#allocation2 + $0x924] ss:$16 sps:$4 sm:$0xff]  }
 0x1c1   :  { %5066 = vmatprep.subr.bf16.mxu0 %v12497_v51  ;;  %5558 = vmatprep.subr.bf16.mxu1 %v12500_v52  ;;  %v12592_v51 = vld [vmem:[#allocation2 + $0x92c] ss:$16 sps:$4 sm:$0xff]   ;;  %v12587_v52 = vld [vmem:[#allocation2 + $0x920] ss:$16 sps:$4 sm:$0xff]  }
 0x1c4   :  { %5067 = vmatpush1.bf16.msra.mxu0 %v12495_v53  ;;  %5559 = vmatpush1.bf16.msra.mxu1 %v12498_v54  ;;  %v12590_v53 = vld [vmem:[#allocation2 + $0x928] ss:$16 sps:$4 sm:$0xff]   ;;  %v12595_v54 = vld [vmem:[#allocation2 + $0x944] ss:$16 sps:$4 sm:$0xff]  }
 0x1c5   :  { %5068 = vmatprep.subr.bf16.mxu0 %v12503_v55  ;;  %5560 = vmatprep.subr.bf16.mxu1 %v12506_v56  ;;  %v12598_v55 = vld [vmem:[#allocation2 + $0x94c] ss:$16 sps:$4 sm:$0xff]   ;;  %v12593_v56 = vld [vmem:[#allocation2 + $0x940] ss:$16 sps:$4 sm:$0xff]  }
 0x1c8   :  { %5069 = vmatpush1.bf16.msra.mxu0 %v12501_v57  ;;  %5561 = vmatpush1.bf16.msra.mxu1 %v12504_v58  ;;  %v12596_v57 = vld [vmem:[#allocation2 + $0x948] ss:$16 sps:$4 sm:$0xff]   ;;  %v12601_v58 = vld [vmem:[#allocation2 + $0x964] ss:$16 sps:$4 sm:$0xff]  }
 0x1c9   :  { %5070 = vmatprep.subr.bf16.mxu0 %v12509_v59  ;;  %5562 = vmatprep.subr.bf16.mxu1 %v12512_v60  ;;  %v12604_v59 = vld [vmem:[#allocation2 + $0x96c] ss:$16 sps:$4 sm:$0xff]   ;;  %v12599_v60 = vld [vmem:[#allocation2 + $0x960] ss:$16 sps:$4 sm:$0xff]  }
 0x1cc   :  { %5071 = vmatpush1.bf16.msra.mxu0 %v12507_v61  ;;  %5563 = vmatpush1.bf16.msra.mxu1 %v12510_v62  ;;  %v12602_v61 = vld [vmem:[#allocation2 + $0x968] ss:$16 sps:$4 sm:$0xff]   ;;  %v12607_v62 = vld [vmem:[#allocation2 + $0x984] ss:$16 sps:$4 sm:$0xff]  }
 0x1cd   :  { %5072 = vmatprep.subr.bf16.mxu0 %v12515_v63  ;;  %5564 = vmatprep.subr.bf16.mxu1 %v12518_v0  ;;  %v12610_v63 = vld [vmem:[#allocation2 + $0x98c] ss:$16 sps:$4 sm:$0xff]   ;;  %v12605_v0 = vld [vmem:[#allocation2 + $0x980] ss:$16 sps:$4 sm:$0xff]  }
 0x1d0   :  { %5073 = vmatpush1.bf16.msra.mxu0 %v12513_v1  ;;  %5565 = vmatpush1.bf16.msra.mxu1 %v12516_v2  ;;  %v12608_v1 = vld [vmem:[#allocation2 + $0x988] ss:$16 sps:$4 sm:$0xff]   ;;  %v12613_v2 = vld [vmem:[#allocation2 + $0x9a4] ss:$16 sps:$4 sm:$0xff]  }
 0x1d1   :  { %5074 = vmatprep.subr.bf16.mxu0 %v12521_v3  ;;  %5566 = vmatprep.subr.bf16.mxu1 %v12524_v4  ;;  %v12616_v3 = vld [vmem:[#allocation2 + $0x9ac] ss:$16 sps:$4 sm:$0xff]   ;;  %v12611_v4 = vld [vmem:[#allocation2 + $0x9a0] ss:$16 sps:$4 sm:$0xff]  }
 0x1d4   :  { %5075 = vmatpush1.bf16.msra.mxu0 %v12519_v5  ;;  %5567 = vmatpush1.bf16.msra.mxu1 %v12522_v6  ;;  %v12614_v5 = vld [vmem:[#allocation2 + $0x9a8] ss:$16 sps:$4 sm:$0xff]   ;;  %v12619_v6 = vld [vmem:[#allocation2 + $0x9c4] ss:$16 sps:$4 sm:$0xff]  }
 0x1d5   :  { %5076 = vmatprep.subr.bf16.mxu0 %v12527_v7  ;;  %5568 = vmatprep.subr.bf16.mxu1 %v12530_v8  ;;  %v12622_v7 = vld [vmem:[#allocation2 + $0x9cc] ss:$16 sps:$4 sm:$0xff]   ;;  %v12617_v8 = vld [vmem:[#allocation2 + $0x9c0] ss:$16 sps:$4 sm:$0xff]  }
 0x1d8   :  { %5077 = vmatpush1.bf16.msra.mxu0 %v12525_v9  ;;  %5569 = vmatpush1.bf16.msra.mxu1 %v12528_v10  ;;  %v12620_v9 = vld [vmem:[#allocation2 + $0x9c8] ss:$16 sps:$4 sm:$0xff]   ;;  %v12625_v10 = vld [vmem:[#allocation2 + $0x9e4] ss:$16 sps:$4 sm:$0xff]  }
 0x1d9   :  { %5087 = vmatprep.subr.bf16.mxu0 %v12535_v12  ;;  %5579 = vmatprep.subr.bf16.mxu1 %v12538_v13  ;;  %v12628_v12 = vld [vmem:[#allocation2 + $0x9ec] ss:$16 sps:$4 sm:$0xff]   ;;  %v12623_v13 = vld [vmem:[#allocation2 + $0x9e0] ss:$16 sps:$4 sm:$0xff]  }
 0x1db   :  { %5079 = vmatmul.mubr.bf16.vlgmr.msra.gmra.mrb[0].mxu0 %v10529_v16  ;;  %5571 = vmatmul.mubr.bf16.vlgmr.msra.gmra.mrb[0].mxu1 %v10529_v16  ;;  %v12633_v16 = vld [vmem:[#allocation2 + $0xa04] ss:$16 sps:$4 sm:$0xff]  }
 0x1dc   :  { %5088 = vmatpush1.bf16.msra.mxu0 %v12533_v15  ;;  %5580 = vmatpush1.bf16.msra.mxu1 %v12536_v18  ;;  %v12626_v15 = vld [vmem:[#allocation2 + $0x9e8] ss:$16 sps:$4 sm:$0xff]   ;;  %v12636_v18 = vld [vmem:[#allocation2 + $0xa0c] ss:$16 sps:$4 sm:$0xff]  }
 0x1dd   :  { %5089 = vmatprep.subr.bf16.mxu0 %v12541_v19  ;;  %5581 = vmatprep.subr.bf16.mxu1 %v12544_v11  ;;  %v14413_v19 = vld [vmem:[%s14577_s0 + $0x28] sm:$0xff]  ;;  %v10531_v11 = vcombine.low %v14406_v17, %v14406_v17  ;;  %v12645_v17 = vld [vmem:[#allocation2 + $0xa44] ss:$16 sps:$4 sm:$0xff]  }
 0x1de   :  { %5119 = vmatprep.mubr.bf16.mxu0 %v10532_v20  ;;  %5611 = vmatprep.mubr.bf16.mxu1 %v10532_v20  ;;  %v12631_v20 = vld [vmem:[#allocation2 + $0xa00] ss:$16 sps:$4 sm:$0xff]  }
 0x1e0   :  { %5090 = vmatpush1.bf16.msra.mxu0 %v12539_v14  ;;  %5582 = vmatpush1.bf16.msra.mxu1 %v12542_v21  ;;  %v12634_v14 = vld [vmem:[#allocation2 + $0xa08] ss:$16 sps:$4 sm:$0xff]   ;;  %v12639_v21 = vld [vmem:[#allocation2 + $0xa24] ss:$16 sps:$4 sm:$0xff]  }
 0x1e1   :  { %5091 = vmatprep.subr.bf16.mxu0 %v12547_v22  ;;  %5583 = vmatprep.subr.bf16.mxu1 %v12550_v23  ;;  %v12642_v22 = vld [vmem:[#allocation2 + $0xa2c] ss:$16 sps:$4 sm:$0xff]   ;;  %v10534_v23 = vcombine.high %v14413_v19, %v14413_v19 }
 0x1e4   :  { %5092 = vmatpush1.bf16.msra.mxu0 %v12545_v24  ;;  %5584 = vmatpush1.bf16.msra.mxu1 %v12548_v25  ;;  %v12637_v24 = vld [vmem:[#allocation2 + $0xa20] ss:$16 sps:$4 sm:$0xff]   ;;  %v12640_v25 = vld [vmem:[#allocation2 + $0xa28] ss:$16 sps:$4 sm:$0xff]  }
 0x1e5   :  { %5093 = vmatprep.subr.bf16.mxu0 %v12553_v26  ;;  %5585 = vmatprep.subr.bf16.mxu1 %v12556_v27  ;;  %v12648_v26 = vld [vmem:[#allocation2 + $0xa4c] ss:$16 sps:$4 sm:$0xff]   ;;  %v12643_v27 = vld [vmem:[#allocation2 + $0xa40] ss:$16 sps:$4 sm:$0xff]  }
 0x1e8   :  { %5094 = vmatpush1.bf16.msra.mxu0 %v12551_v28  ;;  %5586 = vmatpush1.bf16.msra.mxu1 %v12554_v29  ;;  %v12646_v28 = vld [vmem:[#allocation2 + $0xa48] ss:$16 sps:$4 sm:$0xff]   ;;  %v12651_v29 = vld [vmem:[#allocation2 + $0xa64] ss:$16 sps:$4 sm:$0xff]  }
 0x1e9   :  { %5095 = vmatprep.subr.bf16.mxu0 %v12559_v30  ;;  %5587 = vmatprep.subr.bf16.mxu1 %v12562_v31  ;;  %v12654_v30 = vld [vmem:[#allocation2 + $0xa6c] ss:$16 sps:$4 sm:$0xff]   ;;  %v12649_v31 = vld [vmem:[#allocation2 + $0xa60] ss:$16 sps:$4 sm:$0xff]  }
 0x1ec   :  { %5096 = vmatpush1.bf16.msra.mxu0 %v12557_v32  ;;  %5588 = vmatpush1.bf16.msra.mxu1 %v12560_v33  ;;  %v12652_v32 = vld [vmem:[#allocation2 + $0xa68] ss:$16 sps:$4 sm:$0xff]   ;;  %v12657_v33 = vld [vmem:[#allocation2 + $0xa84] ss:$16 sps:$4 sm:$0xff]  }
 0x1ed   :  { %5097 = vmatprep.subr.bf16.mxu0 %v12565_v34  ;;  %5589 = vmatprep.subr.bf16.mxu1 %v12568_v35  ;;  %v12660_v34 = vld [vmem:[#allocation2 + $0xa8c] ss:$16 sps:$4 sm:$0xff]   ;;  %v12655_v35 = vld [vmem:[#allocation2 + $0xa80] ss:$16 sps:$4 sm:$0xff]  }
 0x1f0   :  { %5098 = vmatpush1.bf16.msra.mxu0 %v12563_v36  ;;  %5590 = vmatpush1.bf16.msra.mxu1 %v12566_v37  ;;  %v12658_v36 = vld [vmem:[#allocation2 + $0xa88] ss:$16 sps:$4 sm:$0xff]   ;;  %v12663_v37 = vld [vmem:[#allocation2 + $0xaa4] ss:$16 sps:$4 sm:$0xff]  }
 0x1f1   :  { %5099 = vmatprep.subr.bf16.mxu0 %v12571_v38  ;;  %5591 = vmatprep.subr.bf16.mxu1 %v12574_v39  ;;  %v12666_v38 = vld [vmem:[#allocation2 + $0xaac] ss:$16 sps:$4 sm:$0xff]   ;;  %v12661_v39 = vld [vmem:[#allocation2 + $0xaa0] ss:$16 sps:$4 sm:$0xff]  }
 0x1f4   :  { %5100 = vmatpush1.bf16.msra.mxu0 %v12569_v40  ;;  %5592 = vmatpush1.bf16.msra.mxu1 %v12572_v41  ;;  %v12664_v40 = vld [vmem:[#allocation2 + $0xaa8] ss:$16 sps:$4 sm:$0xff]   ;;  %v12669_v41 = vld [vmem:[#allocation2 + $0xac4] ss:$16 sps:$4 sm:$0xff]  }
 0x1f5   :  { %5101 = vmatprep.subr.bf16.mxu0 %v12577_v42  ;;  %5593 = vmatprep.subr.bf16.mxu1 %v12580_v43  ;;  %v12672_v42 = vld [vmem:[#allocation2 + $0xacc] ss:$16 sps:$4 sm:$0xff]   ;;  %v12667_v43 = vld [vmem:[#allocation2 + $0xac0] ss:$16 sps:$4 sm:$0xff]  }
 0x1f8   :  { %5102 = vmatpush1.bf16.msra.mxu0 %v12575_v44  ;;  %5594 = vmatpush1.bf16.msra.mxu1 %v12578_v45  ;;  %v12670_v44 = vld [vmem:[#allocation2 + $0xac8] ss:$16 sps:$4 sm:$0xff]   ;;  %v12675_v45 = vld [vmem:[#allocation2 + $0xae4] ss:$16 sps:$4 sm:$0xff]  }
 0x1f9   :  { %5103 = vmatprep.subr.bf16.mxu0 %v12583_v46  ;;  %5595 = vmatprep.subr.bf16.mxu1 %v12586_v47  ;;  %v12678_v46 = vld [vmem:[#allocation2 + $0xaec] ss:$16 sps:$4 sm:$0xff]   ;;  %v12673_v47 = vld [vmem:[#allocation2 + $0xae0] ss:$16 sps:$4 sm:$0xff]  }
 0x1fc   :  { %5104 = vmatpush1.bf16.msra.mxu0 %v12581_v48  ;;  %5596 = vmatpush1.bf16.msra.mxu1 %v12584_v49  ;;  %v12676_v48 = vld [vmem:[#allocation2 + $0xae8] ss:$16 sps:$4 sm:$0xff]   ;;  %v12681_v49 = vld [vmem:[#allocation2 + $0xb04] ss:$16 sps:$4 sm:$0xff]  }
 0x1fd   :  { %5105 = vmatprep.subr.bf16.mxu0 %v12589_v50  ;;  %5597 = vmatprep.subr.bf16.mxu1 %v12592_v51  ;;  %v12684_v50 = vld [vmem:[#allocation2 + $0xb0c] ss:$16 sps:$4 sm:$0xff]   ;;  %v12679_v51 = vld [vmem:[#allocation2 + $0xb00] ss:$16 sps:$4 sm:$0xff]  }
 0x200   :  { %5106 = vmatpush1.bf16.msra.mxu0 %v12587_v52  ;;  %5598 = vmatpush1.bf16.msra.mxu1 %v12590_v53  ;;  %v12682_v52 = vld [vmem:[#allocation2 + $0xb08] ss:$16 sps:$4 sm:$0xff]   ;;  %v12687_v53 = vld [vmem:[#allocation2 + $0xb24] ss:$16 sps:$4 sm:$0xff]  }
 0x201   :  { %5107 = vmatprep.subr.bf16.mxu0 %v12595_v54  ;;  %5599 = vmatprep.subr.bf16.mxu1 %v12598_v55  ;;  %v12690_v54 = vld [vmem:[#allocation2 + $0xb2c] ss:$16 sps:$4 sm:$0xff]   ;;  %v12685_v55 = vld [vmem:[#allocation2 + $0xb20] ss:$16 sps:$4 sm:$0xff]  }
 0x204   :  { %5108 = vmatpush1.bf16.msra.mxu0 %v12593_v56  ;;  %5600 = vmatpush1.bf16.msra.mxu1 %v12596_v57  ;;  %v12688_v56 = vld [vmem:[#allocation2 + $0xb28] ss:$16 sps:$4 sm:$0xff]   ;;  %v12693_v57 = vld [vmem:[#allocation2 + $0xb44] ss:$16 sps:$4 sm:$0xff]  }
 0x205   :  { %5109 = vmatprep.subr.bf16.mxu0 %v12601_v58  ;;  %5601 = vmatprep.subr.bf16.mxu1 %v12604_v59  ;;  %v12696_v58 = vld [vmem:[#allocation2 + $0xb4c] ss:$16 sps:$4 sm:$0xff]   ;;  %v12691_v59 = vld [vmem:[#allocation2 + $0xb40] ss:$16 sps:$4 sm:$0xff]  }
 0x208   :  { %5110 = vmatpush1.bf16.msra.mxu0 %v12599_v60  ;;  %5602 = vmatpush1.bf16.msra.mxu1 %v12602_v61  ;;  %v12694_v60 = vld [vmem:[#allocation2 + $0xb48] ss:$16 sps:$4 sm:$0xff]   ;;  %v12699_v61 = vld [vmem:[#allocation2 + $0xb64] ss:$16 sps:$4 sm:$0xff]  }
 0x209   :  { %5111 = vmatprep.subr.bf16.mxu0 %v12607_v62  ;;  %5603 = vmatprep.subr.bf16.mxu1 %v12610_v63  ;;  %v12702_v62 = vld [vmem:[#allocation2 + $0xb6c] ss:$16 sps:$4 sm:$0xff]   ;;  %v12697_v63 = vld [vmem:[#allocation2 + $0xb60] ss:$16 sps:$4 sm:$0xff]  }
 0x20c   :  { %5112 = vmatpush1.bf16.msra.mxu0 %v12605_v0  ;;  %5604 = vmatpush1.bf16.msra.mxu1 %v12608_v1  ;;  %v12700_v0 = vld [vmem:[#allocation2 + $0xb68] ss:$16 sps:$4 sm:$0xff]   ;;  %v12705_v1 = vld [vmem:[#allocation2 + $0xb84] ss:$16 sps:$4 sm:$0xff]  }
 0x20d   :  { %5113 = vmatprep.subr.bf16.mxu0 %v12613_v2  ;;  %5605 = vmatprep.subr.bf16.mxu1 %v12616_v3  ;;  %v12708_v2 = vld [vmem:[#allocation2 + $0xb8c] ss:$16 sps:$4 sm:$0xff]   ;;  %v12703_v3 = vld [vmem:[#allocation2 + $0xb80] ss:$16 sps:$4 sm:$0xff]  }
 0x210   :  { %5114 = vmatpush1.bf16.msra.mxu0 %v12611_v4  ;;  %5606 = vmatpush1.bf16.msra.mxu1 %v12614_v5  ;;  %v12706_v4 = vld [vmem:[#allocation2 + $0xb88] ss:$16 sps:$4 sm:$0xff]   ;;  %v12711_v5 = vld [vmem:[#allocation2 + $0xba4] ss:$16 sps:$4 sm:$0xff]  }
 0x211   :  { %5115 = vmatprep.subr.bf16.mxu0 %v12619_v6  ;;  %5607 = vmatprep.subr.bf16.mxu1 %v12622_v7  ;;  %v12714_v6 = vld [vmem:[#allocation2 + $0xbac] ss:$16 sps:$4 sm:$0xff]   ;;  %v12709_v7 = vld [vmem:[#allocation2 + $0xba0] ss:$16 sps:$4 sm:$0xff]  }
 0x214   :  { %5116 = vmatpush1.bf16.msra.mxu0 %v12617_v8  ;;  %5608 = vmatpush1.bf16.msra.mxu1 %v12620_v9  ;;  %v12712_v8 = vld [vmem:[#allocation2 + $0xba8] ss:$16 sps:$4 sm:$0xff]   ;;  %v12717_v9 = vld [vmem:[#allocation2 + $0xbc4] ss:$16 sps:$4 sm:$0xff]  }
 0x215   :  { %5117 = vmatprep.subr.bf16.mxu0 %v12625_v10  ;;  %5609 = vmatprep.subr.bf16.mxu1 %v12628_v12  ;;  %v12720_v10 = vld [vmem:[#allocation2 + $0xbcc] ss:$16 sps:$4 sm:$0xff]   ;;  %v12715_v12 = vld [vmem:[#allocation2 + $0xbc0] ss:$16 sps:$4 sm:$0xff]  }
 0x218   :  { %5118 = vmatpush1.bf16.msra.mxu0 %v12623_v13  ;;  %5610 = vmatpush1.bf16.msra.mxu1 %v12626_v15  ;;  %v12718_v13 = vld [vmem:[#allocation2 + $0xbc8] ss:$16 sps:$4 sm:$0xff]   ;;  %v12723_v15 = vld [vmem:[#allocation2 + $0xbe4] ss:$16 sps:$4 sm:$0xff]  }
 0x219   :  { %5128 = vmatprep.subr.bf16.mxu0 %v12633_v16  ;;  %5620 = vmatprep.subr.bf16.mxu1 %v12636_v18  ;;  %v12726_v16 = vld [vmem:[#allocation2 + $0xbec] ss:$16 sps:$4 sm:$0xff]   ;;  %v12721_v18 = vld [vmem:[#allocation2 + $0xbe0] ss:$16 sps:$4 sm:$0xff]  }
 0x21b   :  { %5120 = vmatmul.mubr.bf16.vlgmr.msra.gmra.mrb[0].mxu0 %v10531_v11  ;;  %5612 = vmatmul.mubr.bf16.vlgmr.msra.gmra.mrb[0].mxu1 %v10531_v11  ;;  %v12724_v11 = vld [vmem:[#allocation2 + $0xbe8] ss:$16 sps:$4 sm:$0xff]  }
 0x21c   :  { %5129 = vmatpush1.bf16.msra.mxu0 %v12631_v20  ;;  %5621 = vmatpush1.bf16.msra.mxu1 %v12634_v14  ;;  %v12731_v20 = vld [vmem:[#allocation2 + $0xc04] ss:$16 sps:$4 sm:$0xff]   ;;  %v12734_v14 = vld [vmem:[#allocation2 + $0xc0c] ss:$16 sps:$4 sm:$0xff]  }
 0x21d   :  { %5130 = vmatprep.subr.bf16.mxu0 %v12639_v21  ;;  %5622 = vmatprep.subr.bf16.mxu1 %v12642_v22  ;;  %v14422_v21 = vld [vmem:[%s14577_s0 + $0x30] sm:$0xff]  ;;  %v10533_v22 = vcombine.low %v14413_v19, %v14413_v19 }
 0x21e   :  { %5160 = vmatprep.mubr.bf16.mxu0 %v10534_v23  ;;  %5652 = vmatprep.mubr.bf16.mxu1 %v10534_v23  ;;  %v12729_v23 = vld [vmem:[#allocation2 + $0xc00] ss:$16 sps:$4 sm:$0xff]   ;;  %v12743_v19 = vld [vmem:[#allocation2 + $0xc44] ss:$16 sps:$4 sm:$0xff]  }
 0x220   :  { %5131 = vmatpush1.bf16.msra.mxu0 %v12637_v24  ;;  %5623 = vmatpush1.bf16.msra.mxu1 %v12640_v25  ;;  %v12732_v24 = vld [vmem:[#allocation2 + $0xc08] ss:$16 sps:$4 sm:$0xff]   ;;  %v12737_v25 = vld [vmem:[#allocation2 + $0xc24] ss:$16 sps:$4 sm:$0xff]  }
 0x221   :  { %5132 = vmatprep.subr.bf16.mxu0 %v12645_v17  ;;  %5624 = vmatprep.subr.bf16.mxu1 %v12648_v26  ;;  %v12740_v17 = vld [vmem:[#allocation2 + $0xc2c] ss:$16 sps:$4 sm:$0xff]   ;;  %v10536_v26 = vcombine.high %v14422_v21, %v14422_v21 }
 0x224   :  { %5133 = vmatpush1.bf16.msra.mxu0 %v12643_v27  ;;  %5625 = vmatpush1.bf16.msra.mxu1 %v12646_v28  ;;  %v12735_v27 = vld [vmem:[#allocation2 + $0xc20] ss:$16 sps:$4 sm:$0xff]   ;;  %v12738_v28 = vld [vmem:[#allocation2 + $0xc28] ss:$16 sps:$4 sm:$0xff]  }
 0x225   :  { %5134 = vmatprep.subr.bf16.mxu0 %v12651_v29  ;;  %5626 = vmatprep.subr.bf16.mxu1 %v12654_v30  ;;  %v12746_v29 = vld [vmem:[#allocation2 + $0xc4c] ss:$16 sps:$4 sm:$0xff]   ;;  %v12741_v30 = vld [vmem:[#allocation2 + $0xc40] ss:$16 sps:$4 sm:$0xff]  }
 0x228   :  { %5135 = vmatpush1.bf16.msra.mxu0 %v12649_v31  ;;  %5627 = vmatpush1.bf16.msra.mxu1 %v12652_v32  ;;  %v12744_v31 = vld [vmem:[#allocation2 + $0xc48] ss:$16 sps:$4 sm:$0xff]   ;;  %v12749_v32 = vld [vmem:[#allocation2 + $0xc64] ss:$16 sps:$4 sm:$0xff]  }
 0x229   :  { %5136 = vmatprep.subr.bf16.mxu0 %v12657_v33  ;;  %5628 = vmatprep.subr.bf16.mxu1 %v12660_v34  ;;  %v12752_v33 = vld [vmem:[#allocation2 + $0xc6c] ss:$16 sps:$4 sm:$0xff]   ;;  %v12747_v34 = vld [vmem:[#allocation2 + $0xc60] ss:$16 sps:$4 sm:$0xff]  }
 0x22c   :  { %5137 = vmatpush1.bf16.msra.mxu0 %v12655_v35  ;;  %5629 = vmatpush1.bf16.msra.mxu1 %v12658_v36  ;;  %v12750_v35 = vld [vmem:[#allocation2 + $0xc68] ss:$16 sps:$4 sm:$0xff]   ;;  %v12755_v36 = vld [vmem:[#allocation2 + $0xc84] ss:$16 sps:$4 sm:$0xff]  }
 0x22d   :  { %5138 = vmatprep.subr.bf16.mxu0 %v12663_v37  ;;  %5630 = vmatprep.subr.bf16.mxu1 %v12666_v38  ;;  %v12758_v37 = vld [vmem:[#allocation2 + $0xc8c] ss:$16 sps:$4 sm:$0xff]   ;;  %v12753_v38 = vld [vmem:[#allocation2 + $0xc80] ss:$16 sps:$4 sm:$0xff]  }
 0x230   :  { %5139 = vmatpush1.bf16.msra.mxu0 %v12661_v39  ;;  %5631 = vmatpush1.bf16.msra.mxu1 %v12664_v40  ;;  %v12756_v39 = vld [vmem:[#allocation2 + $0xc88] ss:$16 sps:$4 sm:$0xff]   ;;  %v12761_v40 = vld [vmem:[#allocation2 + $0xca4] ss:$16 sps:$4 sm:$0xff]  }
 0x231   :  { %5140 = vmatprep.subr.bf16.mxu0 %v12669_v41  ;;  %5632 = vmatprep.subr.bf16.mxu1 %v12672_v42  ;;  %v12764_v41 = vld [vmem:[#allocation2 + $0xcac] ss:$16 sps:$4 sm:$0xff]   ;;  %v12759_v42 = vld [vmem:[#allocation2 + $0xca0] ss:$16 sps:$4 sm:$0xff]  }
 0x234   :  { %5141 = vmatpush1.bf16.msra.mxu0 %v12667_v43  ;;  %5633 = vmatpush1.bf16.msra.mxu1 %v12670_v44  ;;  %v12762_v43 = vld [vmem:[#allocation2 + $0xca8] ss:$16 sps:$4 sm:$0xff]   ;;  %v12767_v44 = vld [vmem:[#allocation2 + $0xcc4] ss:$16 sps:$4 sm:$0xff]  }
 0x235   :  { %5142 = vmatprep.subr.bf16.mxu0 %v12675_v45  ;;  %5634 = vmatprep.subr.bf16.mxu1 %v12678_v46  ;;  %v12770_v45 = vld [vmem:[#allocation2 + $0xccc] ss:$16 sps:$4 sm:$0xff]   ;;  %v12765_v46 = vld [vmem:[#allocation2 + $0xcc0] ss:$16 sps:$4 sm:$0xff]  }
 0x238   :  { %5143 = vmatpush1.bf16.msra.mxu0 %v12673_v47  ;;  %5635 = vmatpush1.bf16.msra.mxu1 %v12676_v48  ;;  %v12768_v47 = vld [vmem:[#allocation2 + $0xcc8] ss:$16 sps:$4 sm:$0xff]   ;;  %v12773_v48 = vld [vmem:[#allocation2 + $0xce4] ss:$16 sps:$4 sm:$0xff]  }
 0x239   :  { %5144 = vmatprep.subr.bf16.mxu0 %v12681_v49  ;;  %5636 = vmatprep.subr.bf16.mxu1 %v12684_v50  ;;  %v12776_v49 = vld [vmem:[#allocation2 + $0xcec] ss:$16 sps:$4 sm:$0xff]   ;;  %v12771_v50 = vld [vmem:[#allocation2 + $0xce0] ss:$16 sps:$4 sm:$0xff]  }
 0x23c   :  { %5145 = vmatpush1.bf16.msra.mxu0 %v12679_v51  ;;  %5637 = vmatpush1.bf16.msra.mxu1 %v12682_v52  ;;  %v12774_v51 = vld [vmem:[#allocation2 + $0xce8] ss:$16 sps:$4 sm:$0xff]   ;;  %v12779_v52 = vld [vmem:[#allocation2 + $0xd04] ss:$16 sps:$4 sm:$0xff]  }
 0x23d   :  { %5146 = vmatprep.subr.bf16.mxu0 %v12687_v53  ;;  %5638 = vmatprep.subr.bf16.mxu1 %v12690_v54  ;;  %v12782_v53 = vld [vmem:[#allocation2 + $0xd0c] ss:$16 sps:$4 sm:$0xff]   ;;  %v12777_v54 = vld [vmem:[#allocation2 + $0xd00] ss:$16 sps:$4 sm:$0xff]  }
 0x240   :  { %5147 = vmatpush1.bf16.msra.mxu0 %v12685_v55  ;;  %5639 = vmatpush1.bf16.msra.mxu1 %v12688_v56  ;;  %v12780_v55 = vld [vmem:[#allocation2 + $0xd08] ss:$16 sps:$4 sm:$0xff]   ;;  %v12785_v56 = vld [vmem:[#allocation2 + $0xd24] ss:$16 sps:$4 sm:$0xff]  }
 0x241   :  { %5148 = vmatprep.subr.bf16.mxu0 %v12693_v57  ;;  %5640 = vmatprep.subr.bf16.mxu1 %v12696_v58  ;;  %v12788_v57 = vld [vmem:[#allocation2 + $0xd2c] ss:$16 sps:$4 sm:$0xff]   ;;  %v12783_v58 = vld [vmem:[#allocation2 + $0xd20] ss:$16 sps:$4 sm:$0xff]  }
 0x244   :  { %5149 = vmatpush1.bf16.msra.mxu0 %v12691_v59  ;;  %5641 = vmatpush1.bf16.msra.mxu1 %v12694_v60  ;;  %v12786_v59 = vld [vmem:[#allocation2 + $0xd28] ss:$16 sps:$4 sm:$0xff]   ;;  %v12791_v60 = vld [vmem:[#allocation2 + $0xd44] ss:$16 sps:$4 sm:$0xff]  }
 0x245   :  { %5150 = vmatprep.subr.bf16.mxu0 %v12699_v61  ;;  %5642 = vmatprep.subr.bf16.mxu1 %v12702_v62  ;;  %v12794_v61 = vld [vmem:[#allocation2 + $0xd4c] ss:$16 sps:$4 sm:$0xff]   ;;  %v12789_v62 = vld [vmem:[#allocation2 + $0xd40] ss:$16 sps:$4 sm:$0xff]  }
 0x248   :  { %5151 = vmatpush1.bf16.msra.mxu0 %v12697_v63  ;;  %5643 = vmatpush1.bf16.msra.mxu1 %v12700_v0  ;;  %v12792_v63 = vld [vmem:[#allocation2 + $0xd48] ss:$16 sps:$4 sm:$0xff]   ;;  %v12797_v0 = vld [vmem:[#allocation2 + $0xd64] ss:$16 sps:$4 sm:$0xff]  }
 0x249   :  { %5152 = vmatprep.subr.bf16.mxu0 %v12705_v1  ;;  %5644 = vmatprep.subr.bf16.mxu1 %v12708_v2  ;;  %v12800_v1 = vld [vmem:[#allocation2 + $0xd6c] ss:$16 sps:$4 sm:$0xff]   ;;  %v12795_v2 = vld [vmem:[#allocation2 + $0xd60] ss:$16 sps:$4 sm:$0xff]  }
 0x24c   :  { %5153 = vmatpush1.bf16.msra.mxu0 %v12703_v3  ;;  %5645 = vmatpush1.bf16.msra.mxu1 %v12706_v4  ;;  %v12798_v3 = vld [vmem:[#allocation2 + $0xd68] ss:$16 sps:$4 sm:$0xff]   ;;  %v12803_v4 = vld [vmem:[#allocation2 + $0xd84] ss:$16 sps:$4 sm:$0xff]  }
 0x24d   :  { %5154 = vmatprep.subr.bf16.mxu0 %v12711_v5  ;;  %5646 = vmatprep.subr.bf16.mxu1 %v12714_v6  ;;  %v12806_v5 = vld [vmem:[#allocation2 + $0xd8c] ss:$16 sps:$4 sm:$0xff]   ;;  %v12801_v6 = vld [vmem:[#allocation2 + $0xd80] ss:$16 sps:$4 sm:$0xff]  }
 0x250   :  { %5155 = vmatpush1.bf16.msra.mxu0 %v12709_v7  ;;  %5647 = vmatpush1.bf16.msra.mxu1 %v12712_v8  ;;  %v12804_v7 = vld [vmem:[#allocation2 + $0xd88] ss:$16 sps:$4 sm:$0xff]   ;;  %v12809_v8 = vld [vmem:[#allocation2 + $0xda4] ss:$16 sps:$4 sm:$0xff]  }
 0x251   :  { %5156 = vmatprep.subr.bf16.mxu0 %v12717_v9  ;;  %5648 = vmatprep.subr.bf16.mxu1 %v12720_v10  ;;  %v12812_v9 = vld [vmem:[#allocation2 + $0xdac] ss:$16 sps:$4 sm:$0xff]   ;;  %v12807_v10 = vld [vmem:[#allocation2 + $0xda0] ss:$16 sps:$4 sm:$0xff]  }
 0x254   :  { %5157 = vmatpush1.bf16.msra.mxu0 %v12715_v12  ;;  %5649 = vmatpush1.bf16.msra.mxu1 %v12718_v13  ;;  %v12810_v12 = vld [vmem:[#allocation2 + $0xda8] ss:$16 sps:$4 sm:$0xff]   ;;  %v12815_v13 = vld [vmem:[#allocation2 + $0xdc4] ss:$16 sps:$4 sm:$0xff]  }
 0x255   :  { %5158 = vmatprep.subr.bf16.mxu0 %v12723_v15  ;;  %5650 = vmatprep.subr.bf16.mxu1 %v12726_v16  ;;  %v12818_v15 = vld [vmem:[#allocation2 + $0xdcc] ss:$16 sps:$4 sm:$0xff]   ;;  %v12813_v16 = vld [vmem:[#allocation2 + $0xdc0] ss:$16 sps:$4 sm:$0xff]  }
 0x258   :  { %5159 = vmatpush1.bf16.msra.mxu0 %v12721_v18  ;;  %5651 = vmatpush1.bf16.msra.mxu1 %v12724_v11  ;;  %v12816_v18 = vld [vmem:[#allocation2 + $0xdc8] ss:$16 sps:$4 sm:$0xff]   ;;  %v12821_v11 = vld [vmem:[#allocation2 + $0xde4] ss:$16 sps:$4 sm:$0xff]  }
 0x259   :  { %5169 = vmatprep.subr.bf16.mxu0 %v12731_v20  ;;  %5661 = vmatprep.subr.bf16.mxu1 %v12734_v14  ;;  %v12824_v20 = vld [vmem:[#allocation2 + $0xdec] ss:$16 sps:$4 sm:$0xff]   ;;  %v12819_v14 = vld [vmem:[#allocation2 + $0xde0] ss:$16 sps:$4 sm:$0xff]  }
 0x25b   :  { %5161 = vmatmul.mubr.bf16.vlgmr.msra.gmra.mrb[0].mxu0 %v10533_v22  ;;  %5653 = vmatmul.mubr.bf16.vlgmr.msra.gmra.mrb[0].mxu1 %v10533_v22  ;;  %v12822_v22 = vld [vmem:[#allocation2 + $0xde8] ss:$16 sps:$4 sm:$0xff]  }
 0x25c   :  { %5170 = vmatpush1.bf16.msra.mxu0 %v12729_v23  ;;  %5662 = vmatpush1.bf16.msra.mxu1 %v12732_v24  ;;  %v12829_v23 = vld [vmem:[#allocation2 + $0xe04] ss:$16 sps:$4 sm:$0xff]   ;;  %v12832_v24 = vld [vmem:[#allocation2 + $0xe0c] ss:$16 sps:$4 sm:$0xff]  }
 0x25d   :  { %5171 = vmatprep.subr.bf16.mxu0 %v12737_v25  ;;  %5663 = vmatprep.subr.bf16.mxu1 %v12740_v17  ;;  %v14431_v25 = vld [vmem:[%s14577_s0 + $0x38] sm:$0xff]  ;;  %v10535_v17 = vcombine.low %v14422_v21, %v14422_v21  ;;  %v12841_v21 = vld [vmem:[#allocation2 + $0xe44] ss:$16 sps:$4 sm:$0xff]  }
 0x25e   :  { %5201 = vmatprep.mubr.bf16.mxu0 %v10536_v26  ;;  %5693 = vmatprep.mubr.bf16.mxu1 %v10536_v26  ;;  %v12827_v26 = vld [vmem:[#allocation2 + $0xe00] ss:$16 sps:$4 sm:$0xff]  }
 0x260   :  { %5172 = vmatpush1.bf16.msra.mxu0 %v12735_v27  ;;  %5664 = vmatpush1.bf16.msra.mxu1 %v12738_v28  ;;  %v12830_v27 = vld [vmem:[#allocation2 + $0xe08] ss:$16 sps:$4 sm:$0xff]   ;;  %v12835_v28 = vld [vmem:[#allocation2 + $0xe24] ss:$16 sps:$4 sm:$0xff]  }
 0x261   :  { %5173 = vmatprep.subr.bf16.mxu0 %v12743_v19  ;;  %5665 = vmatprep.subr.bf16.mxu1 %v12746_v29  ;;  %v12838_v19 = vld [vmem:[#allocation2 + $0xe2c] ss:$16 sps:$4 sm:$0xff]   ;;  %v10538_v29 = vcombine.high %v14431_v25, %v14431_v25 }
 0x264   :  { %5174 = vmatpush1.bf16.msra.mxu0 %v12741_v30  ;;  %5666 = vmatpush1.bf16.msra.mxu1 %v12744_v31  ;;  %v12833_v30 = vld [vmem:[#allocation2 + $0xe20] ss:$16 sps:$4 sm:$0xff]   ;;  %v12836_v31 = vld [vmem:[#allocation2 + $0xe28] ss:$16 sps:$4 sm:$0xff]  }
 0x265   :  { %5175 = vmatprep.subr.bf16.mxu0 %v12749_v32  ;;  %5667 = vmatprep.subr.bf16.mxu1 %v12752_v33  ;;  %v12844_v32 = vld [vmem:[#allocation2 + $0xe4c] ss:$16 sps:$4 sm:$0xff]   ;;  %v12839_v33 = vld [vmem:[#allocation2 + $0xe40] ss:$16 sps:$4 sm:$0xff]  }
 0x268   :  { %5176 = vmatpush1.bf16.msra.mxu0 %v12747_v34  ;;  %5668 = vmatpush1.bf16.msra.mxu1 %v12750_v35  ;;  %v12842_v34 = vld [vmem:[#allocation2 + $0xe48] ss:$16 sps:$4 sm:$0xff]   ;;  %v12847_v35 = vld [vmem:[#allocation2 + $0xe64] ss:$16 sps:$4 sm:$0xff]  }
 0x269   :  { %5177 = vmatprep.subr.bf16.mxu0 %v12755_v36  ;;  %5669 = vmatprep.subr.bf16.mxu1 %v12758_v37  ;;  %v12850_v36 = vld [vmem:[#allocation2 + $0xe6c] ss:$16 sps:$4 sm:$0xff]   ;;  %v12845_v37 = vld [vmem:[#allocation2 + $0xe60] ss:$16 sps:$4 sm:$0xff]  }
 0x26c   :  { %5178 = vmatpush1.bf16.msra.mxu0 %v12753_v38  ;;  %5670 = vmatpush1.bf16.msra.mxu1 %v12756_v39  ;;  %v12848_v38 = vld [vmem:[#allocation2 + $0xe68] ss:$16 sps:$4 sm:$0xff]   ;;  %v12853_v39 = vld [vmem:[#allocation2 + $0xe84] ss:$16 sps:$4 sm:$0xff]  }
 0x26d   :  { %5179 = vmatprep.subr.bf16.mxu0 %v12761_v40  ;;  %5671 = vmatprep.subr.bf16.mxu1 %v12764_v41  ;;  %v12856_v40 = vld [vmem:[#allocation2 + $0xe8c] ss:$16 sps:$4 sm:$0xff]   ;;  %v12851_v41 = vld [vmem:[#allocation2 + $0xe80] ss:$16 sps:$4 sm:$0xff]  }
 0x270   :  { %5180 = vmatpush1.bf16.msra.mxu0 %v12759_v42  ;;  %5672 = vmatpush1.bf16.msra.mxu1 %v12762_v43  ;;  %v12854_v42 = vld [vmem:[#allocation2 + $0xe88] ss:$16 sps:$4 sm:$0xff]   ;;  %v12859_v43 = vld [vmem:[#allocation2 + $0xea4] ss:$16 sps:$4 sm:$0xff]  }
 0x271   :  { %5181 = vmatprep.subr.bf16.mxu0 %v12767_v44  ;;  %5673 = vmatprep.subr.bf16.mxu1 %v12770_v45  ;;  %v12862_v44 = vld [vmem:[#allocation2 + $0xeac] ss:$16 sps:$4 sm:$0xff]   ;;  %v12857_v45 = vld [vmem:[#allocation2 + $0xea0] ss:$16 sps:$4 sm:$0xff]  }
 0x274   :  { %5182 = vmatpush1.bf16.msra.mxu0 %v12765_v46  ;;  %5674 = vmatpush1.bf16.msra.mxu1 %v12768_v47  ;;  %v12860_v46 = vld [vmem:[#allocation2 + $0xea8] ss:$16 sps:$4 sm:$0xff]   ;;  %v12865_v47 = vld [vmem:[#allocation2 + $0xec4] ss:$16 sps:$4 sm:$0xff]  }
 0x275   :  { %5183 = vmatprep.subr.bf16.mxu0 %v12773_v48  ;;  %5675 = vmatprep.subr.bf16.mxu1 %v12776_v49  ;;  %v12868_v48 = vld [vmem:[#allocation2 + $0xecc] ss:$16 sps:$4 sm:$0xff]   ;;  %v12863_v49 = vld [vmem:[#allocation2 + $0xec0] ss:$16 sps:$4 sm:$0xff]  }
 0x278   :  { %5184 = vmatpush1.bf16.msra.mxu0 %v12771_v50  ;;  %5676 = vmatpush1.bf16.msra.mxu1 %v12774_v51  ;;  %v12866_v50 = vld [vmem:[#allocation2 + $0xec8] ss:$16 sps:$4 sm:$0xff]   ;;  %v12871_v51 = vld [vmem:[#allocation2 + $0xee4] ss:$16 sps:$4 sm:$0xff]  }
 0x279   :  { %5185 = vmatprep.subr.bf16.mxu0 %v12779_v52  ;;  %5677 = vmatprep.subr.bf16.mxu1 %v12782_v53  ;;  %v12874_v52 = vld [vmem:[#allocation2 + $0xeec] ss:$16 sps:$4 sm:$0xff]   ;;  %v12869_v53 = vld [vmem:[#allocation2 + $0xee0] ss:$16 sps:$4 sm:$0xff]  }
 0x27c   :  { %5186 = vmatpush1.bf16.msra.mxu0 %v12777_v54  ;;  %5678 = vmatpush1.bf16.msra.mxu1 %v12780_v55  ;;  %v12872_v54 = vld [vmem:[#allocation2 + $0xee8] ss:$16 sps:$4 sm:$0xff]   ;;  %v12877_v55 = vld [vmem:[#allocation2 + $0xf04] ss:$16 sps:$4 sm:$0xff]  }
 0x27d   :  { %5187 = vmatprep.subr.bf16.mxu0 %v12785_v56  ;;  %5679 = vmatprep.subr.bf16.mxu1 %v12788_v57  ;;  %v12880_v56 = vld [vmem:[#allocation2 + $0xf0c] ss:$16 sps:$4 sm:$0xff]   ;;  %v12875_v57 = vld [vmem:[#allocation2 + $0xf00] ss:$16 sps:$4 sm:$0xff]  }
 0x280   :  { %5188 = vmatpush1.bf16.msra.mxu0 %v12783_v58  ;;  %5680 = vmatpush1.bf16.msra.mxu1 %v12786_v59  ;;  %v12878_v58 = vld [vmem:[#allocation2 + $0xf08] ss:$16 sps:$4 sm:$0xff]   ;;  %v12883_v59 = vld [vmem:[#allocation2 + $0xf24] ss:$16 sps:$4 sm:$0xff]  }
 0x281   :  { %5189 = vmatprep.subr.bf16.mxu0 %v12791_v60  ;;  %5681 = vmatprep.subr.bf16.mxu1 %v12794_v61  ;;  %v12886_v60 = vld [vmem:[#allocation2 + $0xf2c] ss:$16 sps:$4 sm:$0xff]   ;;  %v12881_v61 = vld [vmem:[#allocation2 + $0xf20] ss:$16 sps:$4 sm:$0xff]  }
 0x284   :  { %5190 = vmatpush1.bf16.msra.mxu0 %v12789_v62  ;;  %5682 = vmatpush1.bf16.msra.mxu1 %v12792_v63  ;;  %v12884_v62 = vld [vmem:[#allocation2 + $0xf28] ss:$16 sps:$4 sm:$0xff]   ;;  %v12889_v63 = vld [vmem:[#allocation2 + $0xf44] ss:$16 sps:$4 sm:$0xff]  }
 0x285   :  { %5191 = vmatprep.subr.bf16.mxu0 %v12797_v0  ;;  %5683 = vmatprep.subr.bf16.mxu1 %v12800_v1  ;;  %v12892_v0 = vld [vmem:[#allocation2 + $0xf4c] ss:$16 sps:$4 sm:$0xff]   ;;  %v12887_v1 = vld [vmem:[#allocation2 + $0xf40] ss:$16 sps:$4 sm:$0xff]  }
 0x288   :  { %5192 = vmatpush1.bf16.msra.mxu0 %v12795_v2  ;;  %5684 = vmatpush1.bf16.msra.mxu1 %v12798_v3  ;;  %v12890_v2 = vld [vmem:[#allocation2 + $0xf48] ss:$16 sps:$4 sm:$0xff]   ;;  %v12895_v3 = vld [vmem:[#allocation2 + $0xf64] ss:$16 sps:$4 sm:$0xff]  }
 0x289   :  { %5193 = vmatprep.subr.bf16.mxu0 %v12803_v4  ;;  %5685 = vmatprep.subr.bf16.mxu1 %v12806_v5  ;;  %v12898_v4 = vld [vmem:[#allocation2 + $0xf6c] ss:$16 sps:$4 sm:$0xff]   ;;  %v12893_v5 = vld [vmem:[#allocation2 + $0xf60] ss:$16 sps:$4 sm:$0xff]  }
 0x28c   :  { %5194 = vmatpush1.bf16.msra.mxu0 %v12801_v6  ;;  %5686 = vmatpush1.bf16.msra.mxu1 %v12804_v7  ;;  %v12896_v6 = vld [vmem:[#allocation2 + $0xf68] ss:$16 sps:$4 sm:$0xff]   ;;  %v12901_v7 = vld [vmem:[#allocation2 + $0xf84] ss:$16 sps:$4 sm:$0xff]  }
 0x28d   :  { %5195 = vmatprep.subr.bf16.mxu0 %v12809_v8  ;;  %5687 = vmatprep.subr.bf16.mxu1 %v12812_v9  ;;  %v12904_v8 = vld [vmem:[#allocation2 + $0xf8c] ss:$16 sps:$4 sm:$0xff]   ;;  %v12899_v9 = vld [vmem:[#allocation2 + $0xf80] ss:$16 sps:$4 sm:$0xff]  }
 0x290   :  { %5196 = vmatpush1.bf16.msra.mxu0 %v12807_v10  ;;  %5688 = vmatpush1.bf16.msra.mxu1 %v12810_v12  ;;  %v12902_v10 = vld [vmem:[#allocation2 + $0xf88] ss:$16 sps:$4 sm:$0xff]   ;;  %v12907_v12 = vld [vmem:[#allocation2 + $0xfa4] ss:$16 sps:$4 sm:$0xff]  }
 0x291   :  { %5197 = vmatprep.subr.bf16.mxu0 %v12815_v13  ;;  %5689 = vmatprep.subr.bf16.mxu1 %v12818_v15  ;;  %v12910_v13 = vld [vmem:[#allocation2 + $0xfac] ss:$16 sps:$4 sm:$0xff]   ;;  %v12905_v15 = vld [vmem:[#allocation2 + $0xfa0] ss:$16 sps:$4 sm:$0xff]  }
 0x294   :  { %5198 = vmatpush1.bf16.msra.mxu0 %v12813_v16  ;;  %5690 = vmatpush1.bf16.msra.mxu1 %v12816_v18  ;;  %v12908_v16 = vld [vmem:[#allocation2 + $0xfa8] ss:$16 sps:$4 sm:$0xff]   ;;  %v12913_v18 = vld [vmem:[#allocation2 + $0xfc4] ss:$16 sps:$4 sm:$0xff]  }
 0x295   :  { %5199 = vmatprep.subr.bf16.mxu0 %v12821_v11  ;;  %5691 = vmatprep.subr.bf16.mxu1 %v12824_v20  ;;  %v12916_v11 = vld [vmem:[#allocation2 + $0xfcc] ss:$16 sps:$4 sm:$0xff]   ;;  %v12911_v20 = vld [vmem:[#allocation2 + $0xfc0] ss:$16 sps:$4 sm:$0xff]  }
 0x298   :  { %5200 = vmatpush1.bf16.msra.mxu0 %v12819_v14  ;;  %5692 = vmatpush1.bf16.msra.mxu1 %v12822_v22  ;;  %v12914_v14 = vld [vmem:[#allocation2 + $0xfc8] ss:$16 sps:$4 sm:$0xff]   ;;  %v12919_v22 = vld [vmem:[#allocation2 + $0xfe4] ss:$16 sps:$4 sm:$0xff]  }
 0x299   :  { %5210 = vmatprep.subr.bf16.mxu0 %v12829_v23  ;;  %5702 = vmatprep.subr.bf16.mxu1 %v12832_v24  ;;  %v12922_v23 = vld [vmem:[#allocation2 + $0xfec] ss:$16 sps:$4 sm:$0xff]   ;;  %v12917_v24 = vld [vmem:[#allocation2 + $0xfe0] ss:$16 sps:$4 sm:$0xff]  }
 0x29b   :  { %5202 = vmatmul.mubr.bf16.vlgmr.msra.gmra.mrb[0].mxu0 %v10535_v17  ;;  %5694 = vmatmul.mubr.bf16.vlgmr.msra.gmra.mrb[0].mxu1 %v10535_v17  ;;  %v12920_v17 = vld [vmem:[#allocation2 + $0xfe8] ss:$16 sps:$4 sm:$0xff]  }
 0x29c   :  { %5211 = vmatpush1.bf16.msra.mxu0 %v12827_v26  ;;  %5703 = vmatpush1.bf16.msra.mxu1 %v12830_v27  ;;  %v12927_v26 = vld [vmem:[#allocation2 + $0x1004] ss:$16 sps:$4 sm:$0xff]   ;;  %v12930_v27 = vld [vmem:[#allocation2 + $0x100c] ss:$16 sps:$4 sm:$0xff]  }
 0x29d   :  { %5212 = vmatprep.subr.bf16.mxu0 %v12835_v28  ;;  %5704 = vmatprep.subr.bf16.mxu1 %v12838_v19  ;;  %v14440_v28 = vld [vmem:[%s14577_s0 + $0x40] sm:$0xff]  ;;  %v10537_v19 = vcombine.low %v14431_v25, %v14431_v25 }
 0x29e   :  { %5242 = vmatprep.mubr.bf16.mxu0 %v10538_v29  ;;  %5734 = vmatprep.mubr.bf16.mxu1 %v10538_v29  ;;  %v12925_v29 = vld [vmem:[#allocation2 + $0x1000] ss:$16 sps:$4 sm:$0xff]   ;;  %v12939_v25 = vld [vmem:[#allocation2 + $0x1044] ss:$16 sps:$4 sm:$0xff]  }
 0x2a0   :  { %5213 = vmatpush1.bf16.msra.mxu0 %v12833_v30  ;;  %5705 = vmatpush1.bf16.msra.mxu1 %v12836_v31  ;;  %v12928_v30 = vld [vmem:[#allocation2 + $0x1008] ss:$16 sps:$4 sm:$0xff]   ;;  %v12933_v31 = vld [vmem:[#allocation2 + $0x1024] ss:$16 sps:$4 sm:$0xff]  }
 0x2a1   :  { %5214 = vmatprep.subr.bf16.mxu0 %v12841_v21  ;;  %5706 = vmatprep.subr.bf16.mxu1 %v12844_v32  ;;  %v12936_v21 = vld [vmem:[#allocation2 + $0x102c] ss:$16 sps:$4 sm:$0xff]   ;;  %v10540_v32 = vcombine.high %v14440_v28, %v14440_v28 }
 0x2a4   :  { %5215 = vmatpush1.bf16.msra.mxu0 %v12839_v33  ;;  %5707 = vmatpush1.bf16.msra.mxu1 %v12842_v34  ;;  %v12931_v33 = vld [vmem:[#allocation2 + $0x1020] ss:$16 sps:$4 sm:$0xff]   ;;  %v12934_v34 = vld [vmem:[#allocation2 + $0x1028] ss:$16 sps:$4 sm:$0xff]  }
 0x2a5   :  { %5216 = vmatprep.subr.bf16.mxu0 %v12847_v35  ;;  %5708 = vmatprep.subr.bf16.mxu1 %v12850_v36  ;;  %v12942_v35 = vld [vmem:[#allocation2 + $0x104c] ss:$16 sps:$4 sm:$0xff]   ;;  %v12937_v36 = vld [vmem:[#allocation2 + $0x1040] ss:$16 sps:$4 sm:$0xff]  }
 0x2a8   :  { %5217 = vmatpush1.bf16.msra.mxu0 %v12845_v37  ;;  %5709 = vmatpush1.bf16.msra.mxu1 %v12848_v38  ;;  %v12940_v37 = vld [vmem:[#allocation2 + $0x1048] ss:$16 sps:$4 sm:$0xff]   ;;  %v12945_v38 = vld [vmem:[#allocation2 + $0x1064] ss:$16 sps:$4 sm:$0xff]  }
 0x2a9   :  { %5218 = vmatprep.subr.bf16.mxu0 %v12853_v39  ;;  %5710 = vmatprep.subr.bf16.mxu1 %v12856_v40  ;;  %v12948_v39 = vld [vmem:[#allocation2 + $0x106c] ss:$16 sps:$4 sm:$0xff]   ;;  %v12943_v40 = vld [vmem:[#allocation2 + $0x1060] ss:$16 sps:$4 sm:$0xff]  }
 0x2ac   :  { %5219 = vmatpush1.bf16.msra.mxu0 %v12851_v41  ;;  %5711 = vmatpush1.bf16.msra.mxu1 %v12854_v42  ;;  %v12946_v41 = vld [vmem:[#allocation2 + $0x1068] ss:$16 sps:$4 sm:$0xff]   ;;  %v12951_v42 = vld [vmem:[#allocation2 + $0x1084] ss:$16 sps:$4 sm:$0xff]  }
 0x2ad   :  { %5220 = vmatprep.subr.bf16.mxu0 %v12859_v43  ;;  %5712 = vmatprep.subr.bf16.mxu1 %v12862_v44  ;;  %v12954_v43 = vld [vmem:[#allocation2 + $0x108c] ss:$16 sps:$4 sm:$0xff]   ;;  %v12949_v44 = vld [vmem:[#allocation2 + $0x1080] ss:$16 sps:$4 sm:$0xff]  }
 0x2b0   :  { %5221 = vmatpush1.bf16.msra.mxu0 %v12857_v45  ;;  %5713 = vmatpush1.bf16.msra.mxu1 %v12860_v46  ;;  %v12952_v45 = vld [vmem:[#allocation2 + $0x1088] ss:$16 sps:$4 sm:$0xff]   ;;  %v12957_v46 = vld [vmem:[#allocation2 + $0x10a4] ss:$16 sps:$4 sm:$0xff]  }
 0x2b1   :  { %5222 = vmatprep.subr.bf16.mxu0 %v12865_v47  ;;  %5714 = vmatprep.subr.bf16.mxu1 %v12868_v48  ;;  %v12960_v47 = vld [vmem:[#allocation2 + $0x10ac] ss:$16 sps:$4 sm:$0xff]   ;;  %v12955_v48 = vld [vmem:[#allocation2 + $0x10a0] ss:$16 sps:$4 sm:$0xff]  }
 0x2b4   :  { %5223 = vmatpush1.bf16.msra.mxu0 %v12863_v49  ;;  %5715 = vmatpush1.bf16.msra.mxu1 %v12866_v50  ;;  %v12958_v49 = vld [vmem:[#allocation2 + $0x10a8] ss:$16 sps:$4 sm:$0xff]   ;;  %v12963_v50 = vld [vmem:[#allocation2 + $0x10c4] ss:$16 sps:$4 sm:$0xff]  }
 0x2b5   :  { %5224 = vmatprep.subr.bf16.mxu0 %v12871_v51  ;;  %5716 = vmatprep.subr.bf16.mxu1 %v12874_v52  ;;  %v12966_v51 = vld [vmem:[#allocation2 + $0x10cc] ss:$16 sps:$4 sm:$0xff]   ;;  %v12961_v52 = vld [vmem:[#allocation2 + $0x10c0] ss:$16 sps:$4 sm:$0xff]  }
 0x2b8   :  { %5225 = vmatpush1.bf16.msra.mxu0 %v12869_v53  ;;  %5717 = vmatpush1.bf16.msra.mxu1 %v12872_v54  ;;  %v12964_v53 = vld [vmem:[#allocation2 + $0x10c8] ss:$16 sps:$4 sm:$0xff]   ;;  %v12969_v54 = vld [vmem:[#allocation2 + $0x10e4] ss:$16 sps:$4 sm:$0xff]  }
 0x2b9   :  { %5226 = vmatprep.subr.bf16.mxu0 %v12877_v55  ;;  %5718 = vmatprep.subr.bf16.mxu1 %v12880_v56  ;;  %v12972_v55 = vld [vmem:[#allocation2 + $0x10ec] ss:$16 sps:$4 sm:$0xff]   ;;  %v12967_v56 = vld [vmem:[#allocation2 + $0x10e0] ss:$16 sps:$4 sm:$0xff]  }
 0x2bc   :  { %5227 = vmatpush1.bf16.msra.mxu0 %v12875_v57  ;;  %5719 = vmatpush1.bf16.msra.mxu1 %v12878_v58  ;;  %v12970_v57 = vld [vmem:[#allocation2 + $0x10e8] ss:$16 sps:$4 sm:$0xff]   ;;  %v12975_v58 = vld [vmem:[#allocation2 + $0x1104] ss:$16 sps:$4 sm:$0xff]  }
 0x2bd   :  { %5228 = vmatprep.subr.bf16.mxu0 %v12883_v59  ;;  %5720 = vmatprep.subr.bf16.mxu1 %v12886_v60  ;;  %v12978_v59 = vld [vmem:[#allocation2 + $0x110c] ss:$16 sps:$4 sm:$0xff]   ;;  %v12973_v60 = vld [vmem:[#allocation2 + $0x1100] ss:$16 sps:$4 sm:$0xff]  }
 0x2c0   :  { %5229 = vmatpush1.bf16.msra.mxu0 %v12881_v61  ;;  %5721 = vmatpush1.bf16.msra.mxu1 %v12884_v62  ;;  %v12976_v61 = vld [vmem:[#allocation2 + $0x1108] ss:$16 sps:$4 sm:$0xff]   ;;  %v12981_v62 = vld [vmem:[#allocation2 + $0x1124] ss:$16 sps:$4 sm:$0xff]  }
 0x2c1   :  { %5230 = vmatprep.subr.bf16.mxu0 %v12889_v63  ;;  %5722 = vmatprep.subr.bf16.mxu1 %v12892_v0  ;;  %v12984_v63 = vld [vmem:[#allocation2 + $0x112c] ss:$16 sps:$4 sm:$0xff]   ;;  %v12979_v0 = vld [vmem:[#allocation2 + $0x1120] ss:$16 sps:$4 sm:$0xff]  }
 0x2c4   :  { %5231 = vmatpush1.bf16.msra.mxu0 %v12887_v1  ;;  %5723 = vmatpush1.bf16.msra.mxu1 %v12890_v2  ;;  %v12982_v1 = vld [vmem:[#allocation2 + $0x1128] ss:$16 sps:$4 sm:$0xff]   ;;  %v12987_v2 = vld [vmem:[#allocation2 + $0x1144] ss:$16 sps:$4 sm:$0xff]  }
 0x2c5   :  { %5232 = vmatprep.subr.bf16.mxu0 %v12895_v3  ;;  %5724 = vmatprep.subr.bf16.mxu1 %v12898_v4  ;;  %v12990_v3 = vld [vmem:[#allocation2 + $0x114c] ss:$16 sps:$4 sm:$0xff]   ;;  %v12985_v4 = vld [vmem:[#allocation2 + $0x1140] ss:$16 sps:$4 sm:$0xff]  }
 0x2c8   :  { %5233 = vmatpush1.bf16.msra.mxu0 %v12893_v5  ;;  %5725 = vmatpush1.bf16.msra.mxu1 %v12896_v6  ;;  %v12988_v5 = vld [vmem:[#allocation2 + $0x1148] ss:$16 sps:$4 sm:$0xff]   ;;  %v12993_v6 = vld [vmem:[#allocation2 + $0x1164] ss:$16 sps:$4 sm:$0xff]  }
 0x2c9   :  { %5234 = vmatprep.subr.bf16.mxu0 %v12901_v7  ;;  %5726 = vmatprep.subr.bf16.mxu1 %v12904_v8  ;;  %v12996_v7 = vld [vmem:[#allocation2 + $0x116c] ss:$16 sps:$4 sm:$0xff]   ;;  %v12991_v8 = vld [vmem:[#allocation2 + $0x1160] ss:$16 sps:$4 sm:$0xff]  }
 0x2cc   :  { %5235 = vmatpush1.bf16.msra.mxu0 %v12899_v9  ;;  %5727 = vmatpush1.bf16.msra.mxu1 %v12902_v10  ;;  %v12994_v9 = vld [vmem:[#allocation2 + $0x1168] ss:$16 sps:$4 sm:$0xff]   ;;  %v12999_v10 = vld [vmem:[#allocation2 + $0x1184] ss:$16 sps:$4 sm:$0xff]  }
 0x2cd   :  { %5236 = vmatprep.subr.bf16.mxu0 %v12907_v12  ;;  %5728 = vmatprep.subr.bf16.mxu1 %v12910_v13  ;;  %v13002_v12 = vld [vmem:[#allocation2 + $0x118c] ss:$16 sps:$4 sm:$0xff]   ;;  %v12997_v13 = vld [vmem:[#allocation2 + $0x1180] ss:$16 sps:$4 sm:$0xff]  }
 0x2d0   :  { %5237 = vmatpush1.bf16.msra.mxu0 %v12905_v15  ;;  %5729 = vmatpush1.bf16.msra.mxu1 %v12908_v16  ;;  %v13000_v15 = vld [vmem:[#allocation2 + $0x1188] ss:$16 sps:$4 sm:$0xff]   ;;  %v13005_v16 = vld [vmem:[#allocation2 + $0x11a4] ss:$16 sps:$4 sm:$0xff]  }
 0x2d1   :  { %5238 = vmatprep.subr.bf16.mxu0 %v12913_v18  ;;  %5730 = vmatprep.subr.bf16.mxu1 %v12916_v11  ;;  %v13008_v18 = vld [vmem:[#allocation2 + $0x11ac] ss:$16 sps:$4 sm:$0xff]   ;;  %v13003_v11 = vld [vmem:[#allocation2 + $0x11a0] ss:$16 sps:$4 sm:$0xff]  }
 0x2d4   :  { %5239 = vmatpush1.bf16.msra.mxu0 %v12911_v20  ;;  %5731 = vmatpush1.bf16.msra.mxu1 %v12914_v14  ;;  %v13006_v20 = vld [vmem:[#allocation2 + $0x11a8] ss:$16 sps:$4 sm:$0xff]   ;;  %v13011_v14 = vld [vmem:[#allocation2 + $0x11c4] ss:$16 sps:$4 sm:$0xff]  }
 0x2d5   :  { %5240 = vmatprep.subr.bf16.mxu0 %v12919_v22  ;;  %5732 = vmatprep.subr.bf16.mxu1 %v12922_v23  ;;  %v13014_v22 = vld [vmem:[#allocation2 + $0x11cc] ss:$16 sps:$4 sm:$0xff]   ;;  %v13009_v23 = vld [vmem:[#allocation2 + $0x11c0] ss:$16 sps:$4 sm:$0xff]  }
 0x2d8   :  { %5241 = vmatpush1.bf16.msra.mxu0 %v12917_v24  ;;  %5733 = vmatpush1.bf16.msra.mxu1 %v12920_v17  ;;  %v13012_v24 = vld [vmem:[#allocation2 + $0x11c8] ss:$16 sps:$4 sm:$0xff]   ;;  %v13017_v17 = vld [vmem:[#allocation2 + $0x11e4] ss:$16 sps:$4 sm:$0xff]  }
 0x2d9   :  { %5251 = vmatprep.subr.bf16.mxu0 %v12927_v26  ;;  %5743 = vmatprep.subr.bf16.mxu1 %v12930_v27  ;;  %v13020_v26 = vld [vmem:[#allocation2 + $0x11ec] ss:$16 sps:$4 sm:$0xff]   ;;  %v13015_v27 = vld [vmem:[#allocation2 + $0x11e0] ss:$16 sps:$4 sm:$0xff]  }
 0x2db   :  { %5243 = vmatmul.mubr.bf16.vlgmr.msra.gmra.mrb[0].mxu0 %v10537_v19  ;;  %5735 = vmatmul.mubr.bf16.vlgmr.msra.gmra.mrb[0].mxu1 %v10537_v19  ;;  %v13018_v19 = vld [vmem:[#allocation2 + $0x11e8] ss:$16 sps:$4 sm:$0xff]  }
 0x2dc   :  { %5252 = vmatpush1.bf16.msra.mxu0 %v12925_v29  ;;  %5744 = vmatpush1.bf16.msra.mxu1 %v12928_v30  ;;  %v13025_v29 = vld [vmem:[#allocation2 + $0x1204] ss:$16 sps:$4 sm:$0xff]   ;;  %v13028_v30 = vld [vmem:[#allocation2 + $0x120c] ss:$16 sps:$4 sm:$0xff]  }
 0x2dd   :  { %5253 = vmatprep.subr.bf16.mxu0 %v12933_v31  ;;  %5745 = vmatprep.subr.bf16.mxu1 %v12936_v21  ;;  %v14449_v31 = vld [vmem:[%s14577_s0 + $0x48] sm:$0xff]  ;;  %v10539_v21 = vcombine.low %v14440_v28, %v14440_v28  ;;  %v13037_v28 = vld [vmem:[#allocation2 + $0x1244] ss:$16 sps:$4 sm:$0xff]  }
 0x2de   :  { %5283 = vmatprep.mubr.bf16.mxu0 %v10540_v32  ;;  %5775 = vmatprep.mubr.bf16.mxu1 %v10540_v32  ;;  %v13023_v32 = vld [vmem:[#allocation2 + $0x1200] ss:$16 sps:$4 sm:$0xff]  }
 0x2e0   :  { %5254 = vmatpush1.bf16.msra.mxu0 %v12931_v33  ;;  %5746 = vmatpush1.bf16.msra.mxu1 %v12934_v34  ;;  %v13026_v33 = vld [vmem:[#allocation2 + $0x1208] ss:$16 sps:$4 sm:$0xff]   ;;  %v13031_v34 = vld [vmem:[#allocation2 + $0x1224] ss:$16 sps:$4 sm:$0xff]  }
 0x2e1   :  { %5255 = vmatprep.subr.bf16.mxu0 %v12939_v25  ;;  %5747 = vmatprep.subr.bf16.mxu1 %v12942_v35  ;;  %v13034_v25 = vld [vmem:[#allocation2 + $0x122c] ss:$16 sps:$4 sm:$0xff]   ;;  %v10542_v35 = vcombine.high %v14449_v31, %v14449_v31 }
 0x2e4   :  { %5256 = vmatpush1.bf16.msra.mxu0 %v12937_v36  ;;  %5748 = vmatpush1.bf16.msra.mxu1 %v12940_v37  ;;  %v13029_v36 = vld [vmem:[#allocation2 + $0x1220] ss:$16 sps:$4 sm:$0xff]   ;;  %v13032_v37 = vld [vmem:[#allocation2 + $0x1228] ss:$16 sps:$4 sm:$0xff]  }
 0x2e5   :  { %5257 = vmatprep.subr.bf16.mxu0 %v12945_v38  ;;  %5749 = vmatprep.subr.bf16.mxu1 %v12948_v39  ;;  %v13040_v38 = vld [vmem:[#allocation2 + $0x124c] ss:$16 sps:$4 sm:$0xff]   ;;  %v13035_v39 = vld [vmem:[#allocation2 + $0x1240] ss:$16 sps:$4 sm:$0xff]  }
 0x2e8   :  { %5258 = vmatpush1.bf16.msra.mxu0 %v12943_v40  ;;  %5750 = vmatpush1.bf16.msra.mxu1 %v12946_v41  ;;  %v13038_v40 = vld [vmem:[#allocation2 + $0x1248] ss:$16 sps:$4 sm:$0xff]   ;;  %v13043_v41 = vld [vmem:[#allocation2 + $0x1264] ss:$16 sps:$4 sm:$0xff]  }
 0x2e9   :  { %5259 = vmatprep.subr.bf16.mxu0 %v12951_v42  ;;  %5751 = vmatprep.subr.bf16.mxu1 %v12954_v43  ;;  %v13046_v42 = vld [vmem:[#allocation2 + $0x126c] ss:$16 sps:$4 sm:$0xff]   ;;  %v13041_v43 = vld [vmem:[#allocation2 + $0x1260] ss:$16 sps:$4 sm:$0xff]  }
 0x2ec   :  { %5260 = vmatpush1.bf16.msra.mxu0 %v12949_v44  ;;  %5752 = vmatpush1.bf16.msra.mxu1 %v12952_v45  ;;  %v13044_v44 = vld [vmem:[#allocation2 + $0x1268] ss:$16 sps:$4 sm:$0xff]   ;;  %v13049_v45 = vld [vmem:[#allocation2 + $0x1284] ss:$16 sps:$4 sm:$0xff]  }
 0x2ed   :  { %5261 = vmatprep.subr.bf16.mxu0 %v12957_v46  ;;  %5753 = vmatprep.subr.bf16.mxu1 %v12960_v47  ;;  %v13052_v46 = vld [vmem:[#allocation2 + $0x128c] ss:$16 sps:$4 sm:$0xff]   ;;  %v13047_v47 = vld [vmem:[#allocation2 + $0x1280] ss:$16 sps:$4 sm:$0xff]  }
 0x2f0   :  { %5262 = vmatpush1.bf16.msra.mxu0 %v12955_v48  ;;  %5754 = vmatpush1.bf16.msra.mxu1 %v12958_v49  ;;  %v13050_v48 = vld [vmem:[#allocation2 + $0x1288] ss:$16 sps:$4 sm:$0xff]   ;;  %v13055_v49 = vld [vmem:[#allocation2 + $0x12a4] ss:$16 sps:$4 sm:$0xff]  }
 0x2f1   :  { %5263 = vmatprep.subr.bf16.mxu0 %v12963_v50  ;;  %5755 = vmatprep.subr.bf16.mxu1 %v12966_v51  ;;  %v13058_v50 = vld [vmem:[#allocation2 + $0x12ac] ss:$16 sps:$4 sm:$0xff]   ;;  %v13053_v51 = vld [vmem:[#allocation2 + $0x12a0] ss:$16 sps:$4 sm:$0xff]  }
 0x2f4   :  { %5264 = vmatpush1.bf16.msra.mxu0 %v12961_v52  ;;  %5756 = vmatpush1.bf16.msra.mxu1 %v12964_v53  ;;  %v13056_v52 = vld [vmem:[#allocation2 + $0x12a8] ss:$16 sps:$4 sm:$0xff]   ;;  %v13061_v53 = vld [vmem:[#allocation2 + $0x12c4] ss:$16 sps:$4 sm:$0xff]  }
 0x2f5   :  { %5265 = vmatprep.subr.bf16.mxu0 %v12969_v54  ;;  %5757 = vmatprep.subr.bf16.mxu1 %v12972_v55  ;;  %v13064_v54 = vld [vmem:[#allocation2 + $0x12cc] ss:$16 sps:$4 sm:$0xff]   ;;  %v13059_v55 = vld [vmem:[#allocation2 + $0x12c0] ss:$16 sps:$4 sm:$0xff]  }
 0x2f8   :  { %5266 = vmatpush1.bf16.msra.mxu0 %v12967_v56  ;;  %5758 = vmatpush1.bf16.msra.mxu1 %v12970_v57  ;;  %v13062_v56 = vld [vmem:[#allocation2 + $0x12c8] ss:$16 sps:$4 sm:$0xff]   ;;  %v13067_v57 = vld [vmem:[#allocation2 + $0x12e4] ss:$16 sps:$4 sm:$0xff]  }
 0x2f9   :  { %5267 = vmatprep.subr.bf16.mxu0 %v12975_v58  ;;  %5759 = vmatprep.subr.bf16.mxu1 %v12978_v59  ;;  %v13070_v58 = vld [vmem:[#allocation2 + $0x12ec] ss:$16 sps:$4 sm:$0xff]   ;;  %v13065_v59 = vld [vmem:[#allocation2 + $0x12e0] ss:$16 sps:$4 sm:$0xff]  }
 0x2fc   :  { %5268 = vmatpush1.bf16.msra.mxu0 %v12973_v60  ;;  %5760 = vmatpush1.bf16.msra.mxu1 %v12976_v61  ;;  %v13068_v60 = vld [vmem:[#allocation2 + $0x12e8] ss:$16 sps:$4 sm:$0xff]   ;;  %v13073_v61 = vld [vmem:[#allocation2 + $0x1304] ss:$16 sps:$4 sm:$0xff]  }
 0x2fd   :  { %5269 = vmatprep.subr.bf16.mxu0 %v12981_v62  ;;  %5761 = vmatprep.subr.bf16.mxu1 %v12984_v63  ;;  %v13076_v62 = vld [vmem:[#allocation2 + $0x130c] ss:$16 sps:$4 sm:$0xff]   ;;  %v13071_v63 = vld [vmem:[#allocation2 + $0x1300] ss:$16 sps:$4 sm:$0xff]  }
 0x300   :  { %5270 = vmatpush1.bf16.msra.mxu0 %v12979_v0  ;;  %5762 = vmatpush1.bf16.msra.mxu1 %v12982_v1  ;;  %v13074_v0 = vld [vmem:[#allocation2 + $0x1308] ss:$16 sps:$4 sm:$0xff]   ;;  %v13079_v1 = vld [vmem:[#allocation2 + $0x1324] ss:$16 sps:$4 sm:$0xff]  }
 0x301   :  { %5271 = vmatprep.subr.bf16.mxu0 %v12987_v2  ;;  %5763 = vmatprep.subr.bf16.mxu1 %v12990_v3  ;;  %v13082_v2 = vld [vmem:[#allocation2 + $0x132c] ss:$16 sps:$4 sm:$0xff]   ;;  %v13077_v3 = vld [vmem:[#allocation2 + $0x1320] ss:$16 sps:$4 sm:$0xff]  }
 0x304   :  { %5272 = vmatpush1.bf16.msra.mxu0 %v12985_v4  ;;  %5764 = vmatpush1.bf16.msra.mxu1 %v12988_v5  ;;  %v13080_v4 = vld [vmem:[#allocation2 + $0x1328] ss:$16 sps:$4 sm:$0xff]   ;;  %v13085_v5 = vld [vmem:[#allocation2 + $0x1344] ss:$16 sps:$4 sm:$0xff]  }
 0x305   :  { %5273 = vmatprep.subr.bf16.mxu0 %v12993_v6  ;;  %5765 = vmatprep.subr.bf16.mxu1 %v12996_v7  ;;  %v13088_v6 = vld [vmem:[#allocation2 + $0x134c] ss:$16 sps:$4 sm:$0xff]   ;;  %v13083_v7 = vld [vmem:[#allocation2 + $0x1340] ss:$16 sps:$4 sm:$0xff]  }
 0x308   :  { %5274 = vmatpush1.bf16.msra.mxu0 %v12991_v8  ;;  %5766 = vmatpush1.bf16.msra.mxu1 %v12994_v9  ;;  %v13086_v8 = vld [vmem:[#allocation2 + $0x1348] ss:$16 sps:$4 sm:$0xff]   ;;  %v13091_v9 = vld [vmem:[#allocation2 + $0x1364] ss:$16 sps:$4 sm:$0xff]  }
 0x309   :  { %5275 = vmatprep.subr.bf16.mxu0 %v12999_v10  ;;  %5767 = vmatprep.subr.bf16.mxu1 %v13002_v12  ;;  %v13094_v10 = vld [vmem:[#allocation2 + $0x136c] ss:$16 sps:$4 sm:$0xff]   ;;  %v13089_v12 = vld [vmem:[#allocation2 + $0x1360] ss:$16 sps:$4 sm:$0xff]  }
 0x30c   :  { %5276 = vmatpush1.bf16.msra.mxu0 %v12997_v13  ;;  %5768 = vmatpush1.bf16.msra.mxu1 %v13000_v15  ;;  %v13092_v13 = vld [vmem:[#allocation2 + $0x1368] ss:$16 sps:$4 sm:$0xff]   ;;  %v13097_v15 = vld [vmem:[#allocation2 + $0x1384] ss:$16 sps:$4 sm:$0xff]  }
 0x30d   :  { %5277 = vmatprep.subr.bf16.mxu0 %v13005_v16  ;;  %5769 = vmatprep.subr.bf16.mxu1 %v13008_v18  ;;  %v13100_v16 = vld [vmem:[#allocation2 + $0x138c] ss:$16 sps:$4 sm:$0xff]   ;;  %v13095_v18 = vld [vmem:[#allocation2 + $0x1380] ss:$16 sps:$4 sm:$0xff]  }
 0x310   :  { %5278 = vmatpush1.bf16.msra.mxu0 %v13003_v11  ;;  %5770 = vmatpush1.bf16.msra.mxu1 %v13006_v20  ;;  %v13098_v11 = vld [vmem:[#allocation2 + $0x1388] ss:$16 sps:$4 sm:$0xff]   ;;  %v13103_v20 = vld [vmem:[#allocation2 + $0x13a4] ss:$16 sps:$4 sm:$0xff]  }
 0x311   :  { %5279 = vmatprep.subr.bf16.mxu0 %v13011_v14  ;;  %5771 = vmatprep.subr.bf16.mxu1 %v13014_v22  ;;  %v13106_v14 = vld [vmem:[#allocation2 + $0x13ac] ss:$16 sps:$4 sm:$0xff]   ;;  %v13101_v22 = vld [vmem:[#allocation2 + $0x13a0] ss:$16 sps:$4 sm:$0xff]  }
 0x314   :  { %5280 = vmatpush1.bf16.msra.mxu0 %v13009_v23  ;;  %5772 = vmatpush1.bf16.msra.mxu1 %v13012_v24  ;;  %v13104_v23 = vld [vmem:[#allocation2 + $0x13a8] ss:$16 sps:$4 sm:$0xff]   ;;  %v13109_v24 = vld [vmem:[#allocation2 + $0x13c4] ss:$16 sps:$4 sm:$0xff]  }
 0x315   :  { %5281 = vmatprep.subr.bf16.mxu0 %v13017_v17  ;;  %5773 = vmatprep.subr.bf16.mxu1 %v13020_v26  ;;  %v13112_v17 = vld [vmem:[#allocation2 + $0x13cc] ss:$16 sps:$4 sm:$0xff]   ;;  %v13107_v26 = vld [vmem:[#allocation2 + $0x13c0] ss:$16 sps:$4 sm:$0xff]  }
 0x318   :  { %5282 = vmatpush1.bf16.msra.mxu0 %v13015_v27  ;;  %5774 = vmatpush1.bf16.msra.mxu1 %v13018_v19  ;;  %v13110_v27 = vld [vmem:[#allocation2 + $0x13c8] ss:$16 sps:$4 sm:$0xff]   ;;  %v13115_v19 = vld [vmem:[#allocation2 + $0x13e4] ss:$16 sps:$4 sm:$0xff]  }
 0x319   :  { %5292 = vmatprep.subr.bf16.mxu0 %v13025_v29  ;;  %5784 = vmatprep.subr.bf16.mxu1 %v13028_v30  ;;  %v13118_v29 = vld [vmem:[#allocation2 + $0x13ec] ss:$16 sps:$4 sm:$0xff]   ;;  %v13113_v30 = vld [vmem:[#allocation2 + $0x13e0] ss:$16 sps:$4 sm:$0xff]  }
 0x31b   :  { %5284 = vmatmul.mubr.bf16.vlgmr.msra.gmra.mrb[0].mxu0 %v10539_v21  ;;  %5776 = vmatmul.mubr.bf16.vlgmr.msra.gmra.mrb[0].mxu1 %v10539_v21  ;;  %v13116_v21 = vld [vmem:[#allocation2 + $0x13e8] ss:$16 sps:$4 sm:$0xff]  }
 0x31c   :  { %5293 = vmatpush1.bf16.msra.mxu0 %v13023_v32  ;;  %5785 = vmatpush1.bf16.msra.mxu1 %v13026_v33  ;;  %v13123_v32 = vld [vmem:[#allocation2 + $0x1404] ss:$16 sps:$4 sm:$0xff]   ;;  %v13126_v33 = vld [vmem:[#allocation2 + $0x140c] ss:$16 sps:$4 sm:$0xff]  }
 0x31d   :  { %5294 = vmatprep.subr.bf16.mxu0 %v13031_v34  ;;  %5786 = vmatprep.subr.bf16.mxu1 %v13034_v25  ;;  %v10541_v34 = vcombine.low %v14449_v31, %v14449_v31  ;;  %v14460_v25 = vld [vmem:[%s14577_s0 + $0x50] sm:$0xff] }
 0x31e   :  { %5324 = vmatprep.mubr.bf16.mxu0 %v10542_v35  ;;  %5816 = vmatprep.mubr.bf16.mxu1 %v10542_v35  ;;  %v13121_v35 = vld [vmem:[#allocation2 + $0x1400] ss:$16 sps:$4 sm:$0xff]  }
 0x31f   :  { %v13127_v31 = vld [vmem:[#allocation2 + $0x1420] ss:$16 sps:$4 sm:$0xff]  }
 0x320   :  { %5295 = vmatpush1.bf16.msra.mxu0 %v13029_v36  ;;  %5787 = vmatpush1.bf16.msra.mxu1 %v13032_v37  ;;  %v13124_v36 = vld [vmem:[#allocation2 + $0x1408] ss:$16 sps:$4 sm:$0xff]   ;;  %v13129_v37 = vld [vmem:[#allocation2 + $0x1424] ss:$16 sps:$4 sm:$0xff]  }
 0x321   :  { %5296 = vmatprep.subr.bf16.mxu0 %v13037_v28  ;;  %5788 = vmatprep.subr.bf16.mxu1 %v13040_v38  ;;  %v13132_v28 = vld [vmem:[#allocation2 + $0x142c] ss:$16 sps:$4 sm:$0xff]   ;;  %v10544_v38 = vcombine.high %v14460_v25, %v14460_v25 }
 0x324   :  { %5297 = vmatpush1.bf16.msra.mxu0 %v13035_v39  ;;  %5789 = vmatpush1.bf16.msra.mxu1 %v13038_v40  ;;  %v13130_v39 = vld [vmem:[#allocation2 + $0x1428] ss:$16 sps:$4 sm:$0xff]   ;;  %v13135_v40 = vld [vmem:[#allocation2 + $0x1444] ss:$16 sps:$4 sm:$0xff]  }
 0x325   :  { %5298 = vmatprep.subr.bf16.mxu0 %v13043_v41  ;;  %5790 = vmatprep.subr.bf16.mxu1 %v13046_v42  ;;  %v13138_v41 = vld [vmem:[#allocation2 + $0x144c] ss:$16 sps:$4 sm:$0xff]   ;;  %v13133_v42 = vld [vmem:[#allocation2 + $0x1440] ss:$16 sps:$4 sm:$0xff]  }
 0x328   :  { %5299 = vmatpush1.bf16.msra.mxu0 %v13041_v43  ;;  %5791 = vmatpush1.bf16.msra.mxu1 %v13044_v44  ;;  %v13136_v43 = vld [vmem:[#allocation2 + $0x1448] ss:$16 sps:$4 sm:$0xff]   ;;  %v13141_v44 = vld [vmem:[#allocation2 + $0x1464] ss:$16 sps:$4 sm:$0xff]  }
 0x329   :  { %5300 = vmatprep.subr.bf16.mxu0 %v13049_v45  ;;  %5792 = vmatprep.subr.bf16.mxu1 %v13052_v46  ;;  %v13144_v45 = vld [vmem:[#allocation2 + $0x146c] ss:$16 sps:$4 sm:$0xff]   ;;  %v13139_v46 = vld [vmem:[#allocation2 + $0x1460] ss:$16 sps:$4 sm:$0xff]  }
 0x32c   :  { %5301 = vmatpush1.bf16.msra.mxu0 %v13047_v47  ;;  %5793 = vmatpush1.bf16.msra.mxu1 %v13050_v48  ;;  %v13142_v47 = vld [vmem:[#allocation2 + $0x1468] ss:$16 sps:$4 sm:$0xff]   ;;  %v13147_v48 = vld [vmem:[#allocation2 + $0x1484] ss:$16 sps:$4 sm:$0xff]  }
 0x32d   :  { %5302 = vmatprep.subr.bf16.mxu0 %v13055_v49  ;;  %5794 = vmatprep.subr.bf16.mxu1 %v13058_v50  ;;  %v13150_v49 = vld [vmem:[#allocation2 + $0x148c] ss:$16 sps:$4 sm:$0xff]   ;;  %v13145_v50 = vld [vmem:[#allocation2 + $0x1480] ss:$16 sps:$4 sm:$0xff]  }
 0x330   :  { %5303 = vmatpush1.bf16.msra.mxu0 %v13053_v51  ;;  %5795 = vmatpush1.bf16.msra.mxu1 %v13056_v52  ;;  %v13148_v51 = vld [vmem:[#allocation2 + $0x1488] ss:$16 sps:$4 sm:$0xff]   ;;  %v13153_v52 = vld [vmem:[#allocation2 + $0x14a4] ss:$16 sps:$4 sm:$0xff]  }
 0x331   :  { %5304 = vmatprep.subr.bf16.mxu0 %v13061_v53  ;;  %5796 = vmatprep.subr.bf16.mxu1 %v13064_v54  ;;  %v13156_v53 = vld [vmem:[#allocation2 + $0x14ac] ss:$16 sps:$4 sm:$0xff]   ;;  %v13151_v54 = vld [vmem:[#allocation2 + $0x14a0] ss:$16 sps:$4 sm:$0xff]  }
 0x334   :  { %5305 = vmatpush1.bf16.msra.mxu0 %v13059_v55  ;;  %5797 = vmatpush1.bf16.msra.mxu1 %v13062_v56  ;;  %v13154_v55 = vld [vmem:[#allocation2 + $0x14a8] ss:$16 sps:$4 sm:$0xff]   ;;  %v13159_v56 = vld [vmem:[#allocation2 + $0x14c4] ss:$16 sps:$4 sm:$0xff]  }
 0x335   :  { %5306 = vmatprep.subr.bf16.mxu0 %v13067_v57  ;;  %5798 = vmatprep.subr.bf16.mxu1 %v13070_v58  ;;  %v13162_v57 = vld [vmem:[#allocation2 + $0x14cc] ss:$16 sps:$4 sm:$0xff]   ;;  %v13157_v58 = vld [vmem:[#allocation2 + $0x14c0] ss:$16 sps:$4 sm:$0xff]  }
 0x338   :  { %5307 = vmatpush1.bf16.msra.mxu0 %v13065_v59  ;;  %5799 = vmatpush1.bf16.msra.mxu1 %v13068_v60  ;;  %v13160_v59 = vld [vmem:[#allocation2 + $0x14c8] ss:$16 sps:$4 sm:$0xff]   ;;  %v13165_v60 = vld [vmem:[#allocation2 + $0x14e4] ss:$16 sps:$4 sm:$0xff]  }
 0x339   :  { %5308 = vmatprep.subr.bf16.mxu0 %v13073_v61  ;;  %5800 = vmatprep.subr.bf16.mxu1 %v13076_v62  ;;  %v13168_v61 = vld [vmem:[#allocation2 + $0x14ec] ss:$16 sps:$4 sm:$0xff]   ;;  %v13163_v62 = vld [vmem:[#allocation2 + $0x14e0] ss:$16 sps:$4 sm:$0xff]  }
 0x33c   :  { %5309 = vmatpush1.bf16.msra.mxu0 %v13071_v63  ;;  %5801 = vmatpush1.bf16.msra.mxu1 %v13074_v0  ;;  %v13166_v63 = vld [vmem:[#allocation2 + $0x14e8] ss:$16 sps:$4 sm:$0xff]   ;;  %v13171_v0 = vld [vmem:[#allocation2 + $0x1504] ss:$16 sps:$4 sm:$0xff]  }
 0x33d   :  { %5310 = vmatprep.subr.bf16.mxu0 %v13079_v1  ;;  %5802 = vmatprep.subr.bf16.mxu1 %v13082_v2  ;;  %v13174_v1 = vld [vmem:[#allocation2 + $0x150c] ss:$16 sps:$4 sm:$0xff]   ;;  %v13169_v2 = vld [vmem:[#allocation2 + $0x1500] ss:$16 sps:$4 sm:$0xff]  }
 0x340   :  { %5311 = vmatpush1.bf16.msra.mxu0 %v13077_v3  ;;  %5803 = vmatpush1.bf16.msra.mxu1 %v13080_v4  ;;  %v13172_v3 = vld [vmem:[#allocation2 + $0x1508] ss:$16 sps:$4 sm:$0xff]   ;;  %v13177_v4 = vld [vmem:[#allocation2 + $0x1524] ss:$16 sps:$4 sm:$0xff]  }
 0x341   :  { %5312 = vmatprep.subr.bf16.mxu0 %v13085_v5  ;;  %5804 = vmatprep.subr.bf16.mxu1 %v13088_v6  ;;  %v13180_v5 = vld [vmem:[#allocation2 + $0x152c] ss:$16 sps:$4 sm:$0xff]   ;;  %v13175_v6 = vld [vmem:[#allocation2 + $0x1520] ss:$16 sps:$4 sm:$0xff]  }
 0x344   :  { %5313 = vmatpush1.bf16.msra.mxu0 %v13083_v7  ;;  %5805 = vmatpush1.bf16.msra.mxu1 %v13086_v8  ;;  %v13178_v7 = vld [vmem:[#allocation2 + $0x1528] ss:$16 sps:$4 sm:$0xff]   ;;  %v13183_v8 = vld [vmem:[#allocation2 + $0x1544] ss:$16 sps:$4 sm:$0xff]  }
 0x345   :  { %5314 = vmatprep.subr.bf16.mxu0 %v13091_v9  ;;  %5806 = vmatprep.subr.bf16.mxu1 %v13094_v10  ;;  %v13186_v9 = vld [vmem:[#allocation2 + $0x154c] ss:$16 sps:$4 sm:$0xff]   ;;  %v13181_v10 = vld [vmem:[#allocation2 + $0x1540] ss:$16 sps:$4 sm:$0xff]  }
 0x348   :  { %5315 = vmatpush1.bf16.msra.mxu0 %v13089_v12  ;;  %5807 = vmatpush1.bf16.msra.mxu1 %v13092_v13  ;;  %v13184_v12 = vld [vmem:[#allocation2 + $0x1548] ss:$16 sps:$4 sm:$0xff]   ;;  %v13189_v13 = vld [vmem:[#allocation2 + $0x1564] ss:$16 sps:$4 sm:$0xff]  }
 0x349   :  { %5316 = vmatprep.subr.bf16.mxu0 %v13097_v15  ;;  %5808 = vmatprep.subr.bf16.mxu1 %v13100_v16  ;;  %v13192_v15 = vld [vmem:[#allocation2 + $0x156c] ss:$16 sps:$4 sm:$0xff]   ;;  %v13187_v16 = vld [vmem:[#allocation2 + $0x1560] ss:$16 sps:$4 sm:$0xff]  }
 0x34c   :  { %5317 = vmatpush1.bf16.msra.mxu0 %v13095_v18  ;;  %5809 = vmatpush1.bf16.msra.mxu1 %v13098_v11  ;;  %v13190_v18 = vld [vmem:[#allocation2 + $0x1568] ss:$16 sps:$4 sm:$0xff]   ;;  %v13195_v11 = vld [vmem:[#allocation2 + $0x1584] ss:$16 sps:$4 sm:$0xff]  }
 0x34d   :  { %5318 = vmatprep.subr.bf16.mxu0 %v13103_v20  ;;  %5810 = vmatprep.subr.bf16.mxu1 %v13106_v14  ;;  %v13198_v20 = vld [vmem:[#allocation2 + $0x158c] ss:$16 sps:$4 sm:$0xff]   ;;  %v13193_v14 = vld [vmem:[#allocation2 + $0x1580] ss:$16 sps:$4 sm:$0xff]  }
 0x350   :  { %5319 = vmatpush1.bf16.msra.mxu0 %v13101_v22  ;;  %5811 = vmatpush1.bf16.msra.mxu1 %v13104_v23  ;;  %v13196_v22 = vld [vmem:[#allocation2 + $0x1588] ss:$16 sps:$4 sm:$0xff]   ;;  %v13201_v23 = vld [vmem:[#allocation2 + $0x15a4] ss:$16 sps:$4 sm:$0xff]  }
 0x351   :  { %5320 = vmatprep.subr.bf16.mxu0 %v13109_v24  ;;  %5812 = vmatprep.subr.bf16.mxu1 %v13112_v17  ;;  %v13204_v24 = vld [vmem:[#allocation2 + $0x15ac] ss:$16 sps:$4 sm:$0xff]   ;;  %v13199_v17 = vld [vmem:[#allocation2 + $0x15a0] ss:$16 sps:$4 sm:$0xff]  }
 0x354   :  { %5321 = vmatpush1.bf16.msra.mxu0 %v13107_v26  ;;  %5813 = vmatpush1.bf16.msra.mxu1 %v13110_v27  ;;  %v13202_v26 = vld [vmem:[#allocation2 + $0x15a8] ss:$16 sps:$4 sm:$0xff]   ;;  %v13207_v27 = vld [vmem:[#allocation2 + $0x15c4] ss:$16 sps:$4 sm:$0xff]  }
 0x355   :  { %5322 = vmatprep.subr.bf16.mxu0 %v13115_v19  ;;  %5814 = vmatprep.subr.bf16.mxu1 %v13118_v29  ;;  %v13210_v19 = vld [vmem:[#allocation2 + $0x15cc] ss:$16 sps:$4 sm:$0xff]   ;;  %v13205_v29 = vld [vmem:[#allocation2 + $0x15c0] ss:$16 sps:$4 sm:$0xff]  }
 0x358   :  { %5323 = vmatpush1.bf16.msra.mxu0 %v13113_v30  ;;  %5815 = vmatpush1.bf16.msra.mxu1 %v13116_v21  ;;  %v13208_v30 = vld [vmem:[#allocation2 + $0x15c8] ss:$16 sps:$4 sm:$0xff]   ;;  %v13213_v21 = vld [vmem:[#allocation2 + $0x15e4] ss:$16 sps:$4 sm:$0xff]  }
 0x359   :  { %5333 = vmatprep.subr.bf16.mxu0 %v13123_v32  ;;  %5825 = vmatprep.subr.bf16.mxu1 %v13126_v33  ;;  %v13216_v32 = vld [vmem:[#allocation2 + $0x15ec] ss:$16 sps:$4 sm:$0xff]   ;;  %v13211_v33 = vld [vmem:[#allocation2 + $0x15e0] ss:$16 sps:$4 sm:$0xff]  }
 0x35b   :  { %5325 = vmatmul.mubr.bf16.vlgmr.msra.gmra.mrb[0].mxu0 %v10541_v34  ;;  %5817 = vmatmul.mubr.bf16.vlgmr.msra.gmra.mrb[0].mxu1 %v10541_v34  ;;  %v13214_v34 = vld [vmem:[#allocation2 + $0x15e8] ss:$16 sps:$4 sm:$0xff]  }
 0x35c   :  { %5334 = vmatpush1.bf16.msra.mxu0 %v13121_v35  ;;  %5826 = vmatpush1.bf16.msra.mxu1 %v13124_v36  ;;  %v13221_v35 = vld [vmem:[#allocation2 + $0x1604] ss:$16 sps:$4 sm:$0xff]   ;;  %v13224_v36 = vld [vmem:[#allocation2 + $0x160c] ss:$16 sps:$4 sm:$0xff]  }
 0x35d   :  { %5335 = vmatprep.subr.bf16.mxu0 %v13129_v37  ;;  %5827 = vmatprep.subr.bf16.mxu1 %v13132_v28  ;;  %v10543_v37 = vcombine.low %v14460_v25, %v14460_v25  ;;  %v14469_v28 = vld [vmem:[%s14577_s0 + $0x58] sm:$0xff]  ;;  %v13225_v25 = vld [vmem:[#allocation2 + $0x1620] ss:$16 sps:$4 sm:$0xff]   ;;  %s14145_s0 = smov [#allocation22]  }
 0x35e   :  { %5365 = vmatprep.mubr.bf16.mxu0 %v10544_v38  ;;  %5857 = vmatprep.mubr.bf16.mxu1 %v10544_v38  ;;  %v13219_v38 = vld [vmem:[#allocation2 + $0x1600] ss:$16 sps:$4 sm:$0xff]   ;;  %s10508_s29 = sshll.u32 %s14145_s0, 4  ;;  %s10509_s29 = int_to_ptr.vmem [resolvable:$true] %s10508_s29 }
 0x35f   :  { %s14085_s30 = scalar_lea.vmem %s10509_s29, 128  ;;  %p14090_p13 = scmp.lt.s32.totalorder %s10509_s29, %s10509_s29 }
 0x360   :  { %5336 = vmatpush1.bf16.msra.mxu0 %v13127_v31  ;;  %5828 = vmatpush1.bf16.msra.mxu1 %v13130_v39  ;;  %v13222_v31 = vld [vmem:[#allocation2 + $0x1608] ss:$16 sps:$4 sm:$0xff]   ;;  %v13227_v39 = vld [vmem:[#allocation2 + $0x1624] ss:$16 sps:$4 sm:$0xff]   ;;  %p14086_p12 = scmp.ne.s32.totalorder %s10509_s29, %s14085_s30  ;;  %p14091_p0 = scmp.lt.s32.totalorder %s14085_s30, %s14085_s30 }
 0x361   :  { %5337 = vmatprep.subr.bf16.mxu0 %v13135_v40  ;;  %5829 = vmatprep.subr.bf16.mxu1 %v13138_v41  ;;  %v13230_v40 = vld [vmem:[#allocation2 + $0x162c] ss:$16 sps:$4 sm:$0xff]   ;;  %v10546_v41 = vcombine.high %v14469_v28, %v14469_v28 }
 0x362   :  { %p14092_p1 = por %p14091_p0, %p14090_p13 }
 0x364   :  { %5338 = vmatpush1.bf16.msra.mxu0 %v13133_v42  ;;  %5830 = vmatpush1.bf16.msra.mxu1 %v13136_v43  ;;  %v13228_v42 = vld [vmem:[#allocation2 + $0x1628] ss:$16 sps:$4 sm:$0xff]   ;;  %v13233_v43 = vld [vmem:[#allocation2 + $0x1644] ss:$16 sps:$4 sm:$0xff]   ;;  %p14093_p2 = pnand %p14092_p1, %p14086_p12 }
 0x365   :  { %5339 = vmatprep.subr.bf16.mxu0 %v13141_v44  ;;  %5831 = vmatprep.subr.bf16.mxu1 %v13144_v45  ;;  %v13236_v44 = vld [vmem:[#allocation2 + $0x164c] ss:$16 sps:$4 sm:$0xff]   ;;  %v13231_v45 = vld [vmem:[#allocation2 + $0x1640] ss:$16 sps:$4 sm:$0xff]  }
 0x368   :  { %5340 = vmatpush1.bf16.msra.mxu0 %v13139_v46  ;;  %5832 = vmatpush1.bf16.msra.mxu1 %v13142_v47  ;;  %v13234_v46 = vld [vmem:[#allocation2 + $0x1648] ss:$16 sps:$4 sm:$0xff]   ;;  %v13239_v47 = vld [vmem:[#allocation2 + $0x1664] ss:$16 sps:$4 sm:$0xff]  }
 0x369   :  { %5341 = vmatprep.subr.bf16.mxu0 %v13147_v48  ;;  %5833 = vmatprep.subr.bf16.mxu1 %v13150_v49  ;;  %v13242_v48 = vld [vmem:[#allocation2 + $0x166c] ss:$16 sps:$4 sm:$0xff]   ;;  %v13237_v49 = vld [vmem:[#allocation2 + $0x1660] ss:$16 sps:$4 sm:$0xff]  }
 0x36c   :  { %5342 = vmatpush1.bf16.msra.mxu0 %v13145_v50  ;;  %5834 = vmatpush1.bf16.msra.mxu1 %v13148_v51  ;;  %v13240_v50 = vld [vmem:[#allocation2 + $0x1668] ss:$16 sps:$4 sm:$0xff]   ;;  %v13245_v51 = vld [vmem:[#allocation2 + $0x1684] ss:$16 sps:$4 sm:$0xff]  }
 0x36d   :  { %5343 = vmatprep.subr.bf16.mxu0 %v13153_v52  ;;  %5835 = vmatprep.subr.bf16.mxu1 %v13156_v53  ;;  %v13248_v52 = vld [vmem:[#allocation2 + $0x168c] ss:$16 sps:$4 sm:$0xff]   ;;  %v13243_v53 = vld [vmem:[#allocation2 + $0x1680] ss:$16 sps:$4 sm:$0xff]  }
 0x370   :  { %5344 = vmatpush1.bf16.msra.mxu0 %v13151_v54  ;;  %5836 = vmatpush1.bf16.msra.mxu1 %v13154_v55  ;;  %v13246_v54 = vld [vmem:[#allocation2 + $0x1688] ss:$16 sps:$4 sm:$0xff]   ;;  %v13251_v55 = vld [vmem:[#allocation2 + $0x16a4] ss:$16 sps:$4 sm:$0xff]  }
 0x371   :  { %5345 = vmatprep.subr.bf16.mxu0 %v13159_v56  ;;  %5837 = vmatprep.subr.bf16.mxu1 %v13162_v57  ;;  %v13254_v56 = vld [vmem:[#allocation2 + $0x16ac] ss:$16 sps:$4 sm:$0xff]   ;;  %v13249_v57 = vld [vmem:[#allocation2 + $0x16a0] ss:$16 sps:$4 sm:$0xff]  }
 0x374   :  { %5346 = vmatpush1.bf16.msra.mxu0 %v13157_v58  ;;  %5838 = vmatpush1.bf16.msra.mxu1 %v13160_v59  ;;  %v13252_v58 = vld [vmem:[#allocation2 + $0x16a8] ss:$16 sps:$4 sm:$0xff]   ;;  %v13257_v59 = vld [vmem:[#allocation2 + $0x16c4] ss:$16 sps:$4 sm:$0xff]  }
 0x375   :  { %5347 = vmatprep.subr.bf16.mxu0 %v13165_v60  ;;  %5839 = vmatprep.subr.bf16.mxu1 %v13168_v61  ;;  %v13260_v60 = vld [vmem:[#allocation2 + $0x16cc] ss:$16 sps:$4 sm:$0xff]   ;;  %v13255_v61 = vld [vmem:[#allocation2 + $0x16c0] ss:$16 sps:$4 sm:$0xff]  }
 0x378   :  { %5348 = vmatpush1.bf16.msra.mxu0 %v13163_v62  ;;  %5840 = vmatpush1.bf16.msra.mxu1 %v13166_v63  ;;  %v13258_v62 = vld [vmem:[#allocation2 + $0x16c8] ss:$16 sps:$4 sm:$0xff]   ;;  %v13263_v63 = vld [vmem:[#allocation2 + $0x16e4] ss:$16 sps:$4 sm:$0xff]  }
 0x379   :  { %5349 = vmatprep.subr.bf16.mxu0 %v13171_v0  ;;  %5841 = vmatprep.subr.bf16.mxu1 %v13174_v1  ;;  %v13266_v0 = vld [vmem:[#allocation2 + $0x16ec] ss:$16 sps:$4 sm:$0xff]   ;;  %v13261_v1 = vld [vmem:[#allocation2 + $0x16e0] ss:$16 sps:$4 sm:$0xff]  }
 0x37c   :  { %5350 = vmatpush1.bf16.msra.mxu0 %v13169_v2  ;;  %5842 = vmatpush1.bf16.msra.mxu1 %v13172_v3  ;;  %v13264_v2 = vld [vmem:[#allocation2 + $0x16e8] ss:$16 sps:$4 sm:$0xff]   ;;  %v13269_v3 = vld [vmem:[#allocation2 + $0x1704] ss:$16 sps:$4 sm:$0xff]  }
 0x37d   :  { %5351 = vmatprep.subr.bf16.mxu0 %v13177_v4  ;;  %5843 = vmatprep.subr.bf16.mxu1 %v13180_v5  ;;  %v13272_v4 = vld [vmem:[#allocation2 + $0x170c] ss:$16 sps:$4 sm:$0xff]   ;;  %v13267_v5 = vld [vmem:[#allocation2 + $0x1700] ss:$16 sps:$4 sm:$0xff]  }
 0x380   :  { %5352 = vmatpush1.bf16.msra.mxu0 %v13175_v6  ;;  %5844 = vmatpush1.bf16.msra.mxu1 %v13178_v7  ;;  %v13270_v6 = vld [vmem:[#allocation2 + $0x1708] ss:$16 sps:$4 sm:$0xff]   ;;  %v13275_v7 = vld [vmem:[#allocation2 + $0x1724] ss:$16 sps:$4 sm:$0xff]  }
 0x381   :  { %5353 = vmatprep.subr.bf16.mxu0 %v13183_v8  ;;  %5845 = vmatprep.subr.bf16.mxu1 %v13186_v9  ;;  %v13278_v8 = vld [vmem:[#allocation2 + $0x172c] ss:$16 sps:$4 sm:$0xff]   ;;  %v13273_v9 = vld [vmem:[#allocation2 + $0x1720] ss:$16 sps:$4 sm:$0xff]  }
 0x384   :  { %5354 = vmatpush1.bf16.msra.mxu0 %v13181_v10  ;;  %5846 = vmatpush1.bf16.msra.mxu1 %v13184_v12  ;;  %v13276_v10 = vld [vmem:[#allocation2 + $0x1728] ss:$16 sps:$4 sm:$0xff]   ;;  %v13281_v12 = vld [vmem:[#allocation2 + $0x1744] ss:$16 sps:$4 sm:$0xff]  }
 0x385   :  { %5355 = vmatprep.subr.bf16.mxu0 %v13189_v13  ;;  %5847 = vmatprep.subr.bf16.mxu1 %v13192_v15  ;;  %v13284_v13 = vld [vmem:[#allocation2 + $0x174c] ss:$16 sps:$4 sm:$0xff]   ;;  %v13279_v15 = vld [vmem:[#allocation2 + $0x1740] ss:$16 sps:$4 sm:$0xff]  }
 0x388   :  { %5356 = vmatpush1.bf16.msra.mxu0 %v13187_v16  ;;  %5848 = vmatpush1.bf16.msra.mxu1 %v13190_v18  ;;  %v13282_v16 = vld [vmem:[#allocation2 + $0x1748] ss:$16 sps:$4 sm:$0xff]   ;;  %v13287_v18 = vld [vmem:[#allocation2 + $0x1764] ss:$16 sps:$4 sm:$0xff]  }
 0x389   :  { %5357 = vmatprep.subr.bf16.mxu0 %v13195_v11  ;;  %5849 = vmatprep.subr.bf16.mxu1 %v13198_v20  ;;  %v13290_v11 = vld [vmem:[#allocation2 + $0x176c] ss:$16 sps:$4 sm:$0xff]   ;;  %v13285_v20 = vld [vmem:[#allocation2 + $0x1760] ss:$16 sps:$4 sm:$0xff]  }
 0x38c   :  { %5358 = vmatpush1.bf16.msra.mxu0 %v13193_v14  ;;  %5850 = vmatpush1.bf16.msra.mxu1 %v13196_v22  ;;  %v13288_v14 = vld [vmem:[#allocation2 + $0x1768] ss:$16 sps:$4 sm:$0xff]   ;;  %v13293_v22 = vld [vmem:[#allocation2 + $0x1784] ss:$16 sps:$4 sm:$0xff]  }
 0x38d   :  { %5359 = vmatprep.subr.bf16.mxu0 %v13201_v23  ;;  %5851 = vmatprep.subr.bf16.mxu1 %v13204_v24  ;;  %v13296_v23 = vld [vmem:[#allocation2 + $0x178c] ss:$16 sps:$4 sm:$0xff]   ;;  %v13291_v24 = vld [vmem:[#allocation2 + $0x1780] ss:$16 sps:$4 sm:$0xff]  }
 0x390   :  { %5360 = vmatpush1.bf16.msra.mxu0 %v13199_v17  ;;  %5852 = vmatpush1.bf16.msra.mxu1 %v13202_v26  ;;  %v13294_v17 = vld [vmem:[#allocation2 + $0x1788] ss:$16 sps:$4 sm:$0xff]   ;;  %v13299_v26 = vld [vmem:[#allocation2 + $0x17a4] ss:$16 sps:$4 sm:$0xff]  }
 0x391   :  { %5361 = vmatprep.subr.bf16.mxu0 %v13207_v27  ;;  %5853 = vmatprep.subr.bf16.mxu1 %v13210_v19  ;;  %v13302_v27 = vld [vmem:[#allocation2 + $0x17ac] ss:$16 sps:$4 sm:$0xff]   ;;  %v13297_v19 = vld [vmem:[#allocation2 + $0x17a0] ss:$16 sps:$4 sm:$0xff]  }
 0x394   :  { %5362 = vmatpush1.bf16.msra.mxu0 %v13205_v29  ;;  %5854 = vmatpush1.bf16.msra.mxu1 %v13208_v30  ;;  %v13300_v29 = vld [vmem:[#allocation2 + $0x17a8] ss:$16 sps:$4 sm:$0xff]   ;;  %v13305_v30 = vld [vmem:[#allocation2 + $0x17c4] ss:$16 sps:$4 sm:$0xff]  }
 0x395   :  { %5363 = vmatprep.subr.bf16.mxu0 %v13213_v21  ;;  %5855 = vmatprep.subr.bf16.mxu1 %v13216_v32  ;;  %v13308_v21 = vld [vmem:[#allocation2 + $0x17cc] ss:$16 sps:$4 sm:$0xff]   ;;  %v13303_v32 = vld [vmem:[#allocation2 + $0x17c0] ss:$16 sps:$4 sm:$0xff]  }
 0x398   :  { %5364 = vmatpush1.bf16.msra.mxu0 %v13211_v33  ;;  %5856 = vmatpush1.bf16.msra.mxu1 %v13214_v34  ;;  %v13306_v33 = vld [vmem:[#allocation2 + $0x17c8] ss:$16 sps:$4 sm:$0xff]   ;;  %v13311_v34 = vld [vmem:[#allocation2 + $0x17e4] ss:$16 sps:$4 sm:$0xff]  }
 0x399   :  { %5374 = vmatprep.subr.bf16.mxu0 %v13221_v35  ;;  %5866 = vmatprep.subr.bf16.mxu1 %v13224_v36  ;;  %v13314_v35 = vld [vmem:[#allocation2 + $0x17ec] ss:$16 sps:$4 sm:$0xff]   ;;  %v5915_v36 = vld [vmem:[#allocation7] sm:$0xff] }
 0x39b   :  { %5366 = vmatmul.mubr.bf16.vlgmr.msra.gmra.mrb[0].mxu0 %v10543_v37  ;;  %5858 = vmatmul.mubr.bf16.vlgmr.msra.gmra.mrb[0].mxu1 %v10543_v37  ;;  %v5919_v37 = vld [vmem:[#allocation7 + $0x20] sm:$0xff] }
 0x39c   :  { %5375 = vmatpush1.bf16.msra.mxu0 %v13219_v38  ;;  %5867 = vmatpush1.bf16.msra.mxu1 %v13222_v31  ;;  %v5916_v38 = vld [vmem:[#allocation7 + $0x8] sm:$0xff] }
 0x39d   :  { %5376 = vmatprep.subr.bf16.mxu0 %v13227_v39  ;;  %5868 = vmatprep.subr.bf16.mxu1 %v13230_v40  ;;  %v5920_v31 = vld [vmem:[#allocation7 + $0x28] sm:$0xff]  ;;  %v13312_v40 = vld [vmem:[#allocation2 + $0x17e8] ss:$16 sps:$4 sm:$0xff]  }
 0x39e   :  { %5406 = vmatprep.mubr.bf16.mxu0 %v10546_v41  ;;  %5898 = vmatprep.mubr.bf16.mxu1 %v10546_v41  ;;  %v13309_v39 = vld [vmem:[#allocation2 + $0x17e0] ss:$16 sps:$4 sm:$0xff]   ;;  %v11316_v41 = vcombine.high %v5915_v36, %v5919_v37 }
 0x3a0   :  { %5377 = vmatpush1.bf16.msra.mxu0 %v13225_v25  ;;  %5869 = vmatpush1.bf16.msra.mxu1 %v13228_v42  ;;  %v11318_v25 = vcombine.high %v5916_v38, %v5920_v31  ;;  %v5923_v42 = vld [vmem:[#allocation7 + $0x40] sm:$0xff] }
 0x3a1   :  { %5378 = vmatprep.subr.bf16.mxu0 %v13233_v43  ;;  %5870 = vmatprep.subr.bf16.mxu1 %v13236_v44  ;;  %v5927_v43 = vld [vmem:[#allocation7 + $0x60] sm:$0xff]  ;;  %v5924_v44 = vld [vmem:[#allocation7 + $0x48] sm:$0xff] }
 0x3a4   :  { %5379 = vmatpush1.bf16.msra.mxu0 %v13231_v45  ;;  %5871 = vmatpush1.bf16.msra.mxu1 %v13234_v46  ;;  %v5928_v45 = vld [vmem:[#allocation7 + $0x68] sm:$0xff]  ;;  %v10545_v46 = vcombine.low %v14469_v28, %v14469_v28 }
 0x3a5   :  { %5380 = vmatprep.subr.bf16.mxu0 %v13239_v47  ;;  %5872 = vmatprep.subr.bf16.mxu1 %v13242_v48  ;;  %v11315_v47 = vcombine.low %v5915_v36, %v5919_v37  ;;  %v11317_v48 = vcombine.low %v5916_v38, %v5920_v31  ;;  %v5979_v37 = vld [vmem:[#allocation7 + $0x200] sm:$0xff]  ;;  %v5980_v31 = vld [vmem:[#allocation7 + $0x208] sm:$0xff] }
 0x3a6   :  { %v5983_v38 = vld [vmem:[#allocation7 + $0x220] sm:$0xff] }
 0x3a8   :  { %5381 = vmatpush1.bf16.msra.mxu0 %v13237_v49  ;;  %5873 = vmatpush1.bf16.msra.mxu1 %v13240_v50  ;;  %v11324_v49 = vcombine.high %v5923_v42, %v5927_v43  ;;  %v11326_v50 = vcombine.high %v5924_v44, %v5928_v45 }
 0x3a9   :  { %5382 = vmatprep.subr.bf16.mxu0 %v13245_v51  ;;  %5874 = vmatprep.subr.bf16.mxu1 %v13248_v52  ;;  %v5931_v51 = vld [vmem:[#allocation7 + $0x80] sm:$0xff] }
 0x3aa   :  { %v5935_v52 = vld [vmem:[#allocation7 + $0xa0] sm:$0xff] }
 0x3ab   :  { %v11332_v28 = vcombine.high %v5931_v51, %v5935_v52 }
 0x3ac   :  { %5383 = vmatpush1.bf16.msra.mxu0 %v13243_v53  ;;  %5875 = vmatpush1.bf16.msra.mxu1 %v13246_v54  ;;  %v5932_v53 = vld [vmem:[#allocation7 + $0x88] sm:$0xff] }
 0x3ad   :  { %5384 = vmatprep.subr.bf16.mxu0 %v13251_v55  ;;  %5876 = vmatprep.subr.bf16.mxu1 %v13254_v56  ;;  %v5936_v54 = vld [vmem:[#allocation7 + $0xa8] sm:$0xff]  ;;  %v11323_v55 = vcombine.low %v5923_v42, %v5927_v43  ;;  %v11325_v56 = vcombine.low %v5924_v44, %v5928_v45  ;;  %v5987_v43 = vld [vmem:[#allocation7 + $0x240] sm:$0xff] }
 0x3ae   :  { %v5991_v44 = vld [vmem:[#allocation7 + $0x260] sm:$0xff]  ;;  %v5988_v45 = vld [vmem:[#allocation7 + $0x248] sm:$0xff] }
 0x3b0   :  { %5385 = vmatpush1.bf16.msra.mxu0 %v13249_v57  ;;  %5877 = vmatpush1.bf16.msra.mxu1 %v13252_v58  ;;  %v11334_v57 = vcombine.high %v5932_v53, %v5936_v54  ;;  %v5939_v58 = vld [vmem:[#allocation7 + $0xc0] sm:$0xff] }
 0x3b1   :  { %5386 = vmatprep.subr.bf16.mxu0 %v13257_v59  ;;  %5878 = vmatprep.subr.bf16.mxu1 %v13260_v60  ;;  %v5943_v59 = vld [vmem:[#allocation7 + $0xe0] sm:$0xff]  ;;  %v5940_v60 = vld [vmem:[#allocation7 + $0xc8] sm:$0xff] }
 0x3b4   :  { %5387 = vmatpush1.bf16.msra.mxu0 %v13255_v61  ;;  %5879 = vmatpush1.bf16.msra.mxu1 %v13258_v62  ;;  %v5944_v61 = vld [vmem:[#allocation7 + $0xe8] sm:$0xff]  ;;  %v11331_v62 = vcombine.low %v5931_v51, %v5935_v52  ;;  %v5995_v51 = vld [vmem:[#allocation7 + $0x280] sm:$0xff] }
 0x3b5   :  { %5388 = vmatprep.subr.bf16.mxu0 %v13263_v63  ;;  %5880 = vmatprep.subr.bf16.mxu1 %v13266_v0  ;;  %v11333_v63 = vcombine.low %v5932_v53, %v5936_v54  ;;  %v11340_v0 = vcombine.high %v5939_v58, %v5943_v59  ;;  %v5999_v52 = vld [vmem:[#allocation7 + $0x2a0] sm:$0xff]  ;;  %v5996_v53 = vld [vmem:[#allocation7 + $0x288] sm:$0xff] }
 0x3b6   :  { %v6000_v54 = vld [vmem:[#allocation7 + $0x2a8] sm:$0xff] }
 0x3b8   :  { %5389 = vmatpush1.bf16.msra.mxu0 %v13261_v1  ;;  %5881 = vmatpush1.bf16.msra.mxu1 %v13264_v2  ;;  %v11342_v1 = vcombine.high %v5940_v60, %v5944_v61  ;;  %v5947_v2 = vld [vmem:[#allocation7 + $0x100] sm:$0xff] }
 0x3b9   :  { %5390 = vmatprep.subr.bf16.mxu0 %v13269_v3  ;;  %5882 = vmatprep.subr.bf16.mxu1 %v13272_v4  ;;  %v5951_v3 = vld [vmem:[#allocation7 + $0x120] sm:$0xff]  ;;  %v5948_v4 = vld [vmem:[#allocation7 + $0x108] sm:$0xff] }
 0x3bc   :  { %5391 = vmatpush1.bf16.msra.mxu0 %v13267_v5  ;;  %5883 = vmatpush1.bf16.msra.mxu1 %v13270_v6  ;;  %v5952_v5 = vld [vmem:[#allocation7 + $0x128] sm:$0xff]  ;;  %v11339_v6 = vcombine.low %v5939_v58, %v5943_v59  ;;  %v6003_v58 = vld [vmem:[#allocation7 + $0x2c0] sm:$0xff] }
 0x3bd   :  { %5392 = vmatprep.subr.bf16.mxu0 %v13275_v7  ;;  %5884 = vmatprep.subr.bf16.mxu1 %v13278_v8  ;;  %v11341_v7 = vcombine.low %v5940_v60, %v5944_v61  ;;  %v11348_v8 = vcombine.high %v5947_v2, %v5951_v3  ;;  %v6007_v59 = vld [vmem:[#allocation7 + $0x2e0] sm:$0xff]  ;;  %v6004_v60 = vld [vmem:[#allocation7 + $0x2c8] sm:$0xff] }
 0x3be   :  { %v6008_v61 = vld [vmem:[#allocation7 + $0x2e8] sm:$0xff] }
 0x3c0   :  { %5393 = vmatpush1.bf16.msra.mxu0 %v13273_v9  ;;  %5885 = vmatpush1.bf16.msra.mxu1 %v13276_v10  ;;  %v11350_v9 = vcombine.high %v5948_v4, %v5952_v5  ;;  %v5955_v10 = vld [vmem:[#allocation7 + $0x140] sm:$0xff] }
 0x3c1   :  { %5394 = vmatprep.subr.bf16.mxu0 %v13281_v12  ;;  %5886 = vmatprep.subr.bf16.mxu1 %v13284_v13  ;;  %v5959_v12 = vld [vmem:[#allocation7 + $0x160] sm:$0xff]  ;;  %v5956_v13 = vld [vmem:[#allocation7 + $0x148] sm:$0xff] }
 0x3c4   :  { %5395 = vmatpush1.bf16.msra.mxu0 %v13279_v15  ;;  %5887 = vmatpush1.bf16.msra.mxu1 %v13282_v16  ;;  %v5960_v15 = vld [vmem:[#allocation7 + $0x168] sm:$0xff]  ;;  %v11347_v16 = vcombine.low %v5947_v2, %v5951_v3  ;;  %v6011_v2 = vld [vmem:[#allocation7 + $0x300] sm:$0xff] }
 0x3c5   :  { %5396 = vmatprep.subr.bf16.mxu0 %v13287_v18  ;;  %5888 = vmatprep.subr.bf16.mxu1 %v13290_v11  ;;  %v11349_v18 = vcombine.low %v5948_v4, %v5952_v5  ;;  %v11356_v11 = vcombine.high %v5955_v10, %v5959_v12  ;;  %v6015_v3 = vld [vmem:[#allocation7 + $0x320] sm:$0xff]  ;;  %v6012_v4 = vld [vmem:[#allocation7 + $0x308] sm:$0xff] }
 0x3c6   :  { %v6016_v5 = vld [vmem:[#allocation7 + $0x328] sm:$0xff] }
 0x3c8   :  { %5397 = vmatpush1.bf16.msra.mxu0 %v13285_v20  ;;  %5889 = vmatpush1.bf16.msra.mxu1 %v13288_v14  ;;  %v11358_v20 = vcombine.high %v5956_v13, %v5960_v15  ;;  %v5963_v14 = vld [vmem:[#allocation7 + $0x180] sm:$0xff] }
 0x3c9   :  { %5398 = vmatprep.subr.bf16.mxu0 %v13293_v22  ;;  %5890 = vmatprep.subr.bf16.mxu1 %v13296_v23  ;;  %v5967_v22 = vld [vmem:[#allocation7 + $0x1a0] sm:$0xff]  ;;  %v5964_v23 = vld [vmem:[#allocation7 + $0x188] sm:$0xff] }
 0x3cc   :  { %5399 = vmatpush1.bf16.msra.mxu0 %v13291_v24  ;;  %5891 = vmatpush1.bf16.msra.mxu1 %v13294_v17  ;;  %v5968_v24 = vld [vmem:[#allocation7 + $0x1a8] sm:$0xff]  ;;  %v11355_v17 = vcombine.low %v5955_v10, %v5959_v12  ;;  %v6019_v10 = vld [vmem:[#allocation7 + $0x340] sm:$0xff] }
 0x3cd   :  { %5400 = vmatprep.subr.bf16.mxu0 %v13299_v26  ;;  %5892 = vmatprep.subr.bf16.mxu1 %v13302_v27  ;;  %v11357_v26 = vcombine.low %v5956_v13, %v5960_v15  ;;  %v11364_v27 = vcombine.high %v5963_v14, %v5967_v22  ;;  %v6023_v12 = vld [vmem:[#allocation7 + $0x360] sm:$0xff]  ;;  %v6020_v13 = vld [vmem:[#allocation7 + $0x348] sm:$0xff] }
 0x3ce   :  { %v6024_v15 = vld [vmem:[#allocation7 + $0x368] sm:$0xff] }
 0x3d0   :  { %5401 = vmatpush1.bf16.msra.mxu0 %v13297_v19  ;;  %5893 = vmatpush1.bf16.msra.mxu1 %v13300_v29  ;;  %v11366_v19 = vcombine.high %v5964_v23, %v5968_v24  ;;  %v5971_v29 = vld [vmem:[#allocation7 + $0x1c0] sm:$0xff] }
 0x3d1   :  { %5402 = vmatprep.subr.bf16.mxu0 %v13305_v30  ;;  %5894 = vmatprep.subr.bf16.mxu1 %v13308_v21  ;;  %v5975_v30 = vld [vmem:[#allocation7 + $0x1e0] sm:$0xff]  ;;  %v5972_v21 = vld [vmem:[#allocation7 + $0x1c8] sm:$0xff] }
 0x3d4   :  { %5403 = vmatpush1.bf16.msra.mxu0 %v13303_v32  ;;  %5895 = vmatpush1.bf16.msra.mxu1 %v13306_v33  ;;  %v5976_v32 = vld [vmem:[#allocation7 + $0x1e8] sm:$0xff]  ;;  %v11363_v33 = vcombine.low %v5963_v14, %v5967_v22  ;;  %v11419_v14 = vcombine.low %v6019_v10, %v6023_v12  ;;  %v11421_v22 = vcombine.low %v6020_v13, %v6024_v15 }
 0x3d5   :  { %5404 = vmatprep.subr.bf16.mxu0 %v13311_v34  ;;  %5896 = vmatprep.subr.bf16.mxu1 %v13314_v35  ;;  %v11365_v34 = vcombine.low %v5964_v23, %v5968_v24  ;;  %v11372_v35 = vcombine.high %v5971_v29, %v5975_v30  ;;  %v11374_v36 = vcombine.high %v5972_v21, %v5976_v32  ;;  %v6027_v23 = vld [vmem:[#allocation7 + $0x380] sm:$0xff] }
 0x3d6   :  { %v6031_v24 = vld [vmem:[#allocation7 + $0x3a0] sm:$0xff] }
 0x3d8   :  { %5405 = vmatpush1.bf16.msra.mxu0 %v13309_v39  ;;  %5897 = vmatpush1.bf16.msra.mxu1 %v13312_v40  ;;  %v5984_v39 = vld [vmem:[#allocation7 + $0x228] sm:$0xff]  ;;  %v11371_v40 = vcombine.low %v5971_v29, %v5975_v30 }
 0x3d9   :  { %7493 = vmatprep.subr.bf16.mxu0 %v11316_v41  ;;  %7575 = vmatprep.subr.bf16.mxu1 %v11318_v25  ;;  %v11373_v41 = vcombine.low %v5972_v21, %v5976_v32  ;;  %v11380_v25 = vcombine.high %v5979_v37, %v5983_v38  ;;  %v11382_v42 = vcombine.high %v5980_v31, %v5984_v39  ;;  %v6035_v21 = vld [vmem:[#allocation7 + $0x3c0] sm:$0xff] }
 0x3da   :  { %v6039_v32 = vld [vmem:[#allocation7 + $0x3e0] sm:$0xff] }
 0x3db   :  { %5407 = vmatmul.mubr.bf16.vlgmr.msra.gmra.mrb[0].mxu0 %v10545_v46  ;;  %5899 = vmatmul.mubr.bf16.vlgmr.msra.gmra.mrb[0].mxu1 %v10545_v46  ;;  %v5992_v46 = vld [vmem:[#allocation7 + $0x268] sm:$0xff] }
 0x3dc   :  { %7494 = vmatpush1.bf16.msra.mxu0 %v11315_v47  ;;  %7576 = vmatpush1.bf16.msra.mxu1 %v11317_v48  ;;  %v11379_v47 = vcombine.low %v5979_v37, %v5983_v38  ;;  %v11381_v48 = vcombine.low %v5980_v31, %v5984_v39  ;;  %v6043_v31 = vld [vmem:[#allocation7 + $0x400] sm:$0xff] }
 0x3dd   :  { %7495 = vmatprep.subr.bf16.mxu0 %v11324_v49  ;;  %7577 = vmatprep.subr.bf16.mxu1 %v11326_v50  ;;  %v11388_v49 = vcombine.high %v5987_v43, %v5991_v44  ;;  %v11390_v50 = vcombine.high %v5988_v45, %v5992_v46  ;;  %v6047_v39 = vld [vmem:[#allocation7 + $0x420] sm:$0xff] }
 0x3e0   :  { %7496 = vmatpush1.bf16.msra.mxu0 %v11323_v55  ;;  %7578 = vmatpush1.bf16.msra.mxu1 %v11325_v56  ;;  %v11387_v55 = vcombine.low %v5987_v43, %v5991_v44  ;;  %v11389_v56 = vcombine.low %v5988_v45, %v5992_v46  ;;  %v979_v45 = vlaneseq }
 0x3e1   :  { %7497 = vmatprep.subr.bf16.mxu0 %v11332_v28  ;;  %7579 = vmatprep.subr.bf16.mxu1 %v11334_v57  ;;  %v11396_v28 = vcombine.high %v5995_v51, %v5999_v52  ;;  %v11398_v57 = vcombine.high %v5996_v53, %v6000_v54 }
 0x3e2   :  { %v14475_v46 = vshrl.u32 %v979_v45, 7  ;;  %v6091_v45 = vld [vmem:[#allocation7 + $0x580] sm:$0xff] }
 0x3e4   :  { %7498 = vmatpush1.bf16.msra.mxu0 %v11331_v62  ;;  %7580 = vmatpush1.bf16.msra.mxu1 %v11333_v63  ;;  %v11395_v62 = vcombine.low %v5995_v51, %v5999_v52  ;;  %v11397_v63 = vcombine.low %v5996_v53, %v6000_v54 }
 0x3e5   :  { %7499 = vmatprep.subr.bf16.mxu0 %v11340_v0  ;;  %7581 = vmatprep.subr.bf16.mxu1 %v11342_v1  ;;  %v11404_v0 = vcombine.high %v6003_v58, %v6007_v59  ;;  %v11406_v1 = vcombine.high %v6004_v60, %v6008_v61 }
 0x3e8   :  { %7500 = vmatpush1.bf16.msra.mxu0 %v11339_v6  ;;  %7582 = vmatpush1.bf16.msra.mxu1 %v11341_v7  ;;  %v11403_v6 = vcombine.low %v6003_v58, %v6007_v59  ;;  %v11405_v7 = vcombine.low %v6004_v60, %v6008_v61 }
 0x3e9   :  { %7501 = vmatprep.subr.bf16.mxu0 %v11348_v8  ;;  %7583 = vmatprep.subr.bf16.mxu1 %v11350_v9  ;;  %v11412_v8 = vcombine.high %v6011_v2, %v6015_v3  ;;  %v11414_v9 = vcombine.high %v6012_v4, %v6016_v5 }
 0x3ec   :  { %7502 = vmatpush1.bf16.msra.mxu0 %v11347_v16  ;;  %7584 = vmatpush1.bf16.msra.mxu1 %v11349_v18  ;;  %v11411_v16 = vcombine.low %v6011_v2, %v6015_v3  ;;  %v11413_v18 = vcombine.low %v6012_v4, %v6016_v5  ;;  %v6051_v2 = vld [vmem:[#allocation7 + $0x440] sm:$0xff]  ;;  %v6052_v5 = vld [vmem:[#allocation7 + $0x448] sm:$0xff] }
 0x3ed   :  { %7503 = vmatprep.subr.bf16.mxu0 %v11356_v11  ;;  %7585 = vmatprep.subr.bf16.mxu1 %v11358_v20  ;;  %v11420_v11 = vcombine.high %v6019_v10, %v6023_v12  ;;  %v11422_v20 = vcombine.high %v6020_v13, %v6024_v15  ;;  %v6055_v4 = vld [vmem:[#allocation7 + $0x460] sm:$0xff]  ;;  %v6060_v15 = vld [vmem:[#allocation7 + $0x488] sm:$0xff] }
 0x3ee   :  { %v11452_v10 = vcombine.high %v6051_v2, %v6055_v4  ;;  %v6063_v13 = vld [vmem:[#allocation7 + $0x4a0] sm:$0xff] }
 0x3f0   :  { %7504 = vmatpush1.bf16.msra.mxu0 %v11355_v17  ;;  %7586 = vmatpush1.bf16.msra.mxu1 %v11357_v26  ;;  %v6028_v17 = vld [vmem:[#allocation7 + $0x388] sm:$0xff]  ;;  %v11428_v26 = vcombine.high %v6027_v23, %v6031_v24 }
 0x3f1   :  { %7505 = vmatprep.subr.bf16.mxu0 %v11364_v27  ;;  %7587 = vmatprep.subr.bf16.mxu1 %v11366_v19  ;;  %v6032_v27 = vld [vmem:[#allocation7 + $0x3a8] sm:$0xff]  ;;  %v11427_v19 = vcombine.low %v6027_v23, %v6031_v24  ;;  %v6067_v23 = vld [vmem:[#allocation7 + $0x4c0] sm:$0xff] }
 0x3f2   :  { %v11429_v29 = vcombine.low %v6028_v17, %v6032_v27  ;;  %v11430_v30 = vcombine.high %v6028_v17, %v6032_v27  ;;  %v6071_v24 = vld [vmem:[#allocation7 + $0x4e0] sm:$0xff]  ;;  %v6068_v17 = vld [vmem:[#allocation7 + $0x4c8] sm:$0xff] }
 0x3f4   :  { %7506 = vmatpush1.bf16.msra.mxu0 %v11363_v33  ;;  %7588 = vmatpush1.bf16.msra.mxu1 %v11365_v34  ;;  %v6036_v33 = vld [vmem:[#allocation7 + $0x3c8] sm:$0xff]  ;;  %v11436_v34 = vcombine.high %v6035_v21, %v6039_v32 }
 0x3f5   :  { %7507 = vmatprep.subr.bf16.mxu0 %v11372_v35  ;;  %7589 = vmatprep.subr.bf16.mxu1 %v11374_v36  ;;  %v6040_v35 = vld [vmem:[#allocation7 + $0x3e8] sm:$0xff]  ;;  %v11435_v36 = vcombine.low %v6035_v21, %v6039_v32  ;;  %v6075_v21 = vld [vmem:[#allocation7 + $0x500] sm:$0xff] }
 0x3f6   :  { %v11437_v37 = vcombine.low %v6036_v33, %v6040_v35  ;;  %v11438_v38 = vcombine.high %v6036_v33, %v6040_v35  ;;  %v6079_v32 = vld [vmem:[#allocation7 + $0x520] sm:$0xff]  ;;  %v6076_v33 = vld [vmem:[#allocation7 + $0x508] sm:$0xff]  ;;  %v11467_v35 = vcombine.low %v6067_v23, %v6071_v24 }
 0x3f8   :  { %7508 = vmatpush1.bf16.msra.mxu0 %v11371_v40  ;;  %7590 = vmatpush1.bf16.msra.mxu1 %v11373_v41  ;;  %v6044_v40 = vld [vmem:[#allocation7 + $0x408] sm:$0xff]  ;;  %v11444_v41 = vcombine.high %v6043_v31, %v6047_v39 }
 0x3f9   :  { %7509 = vmatprep.subr.bf16.mxu0 %v11380_v25  ;;  %7591 = vmatprep.subr.bf16.mxu1 %v11382_v42  ;;  %v6048_v25 = vld [vmem:[#allocation7 + $0x428] sm:$0xff]  ;;  %v11443_v42 = vcombine.low %v6043_v31, %v6047_v39  ;;  %v6083_v31 = vld [vmem:[#allocation7 + $0x540] sm:$0xff] }
 0x3fa   :  { %v11445_v43 = vcombine.low %v6044_v40, %v6048_v25  ;;  %v11446_v44 = vcombine.high %v6044_v40, %v6048_v25  ;;  %v6087_v39 = vld [vmem:[#allocation7 + $0x560] sm:$0xff]  ;;  %v6084_v40 = vld [vmem:[#allocation7 + $0x548] sm:$0xff]  ;;  %v11475_v25 = vcombine.low %v6075_v21, %v6079_v32 }
 0x3fc   :  { %7510 = vmatpush1.bf16.msra.mxu0 %v11379_v47  ;;  %7592 = vmatpush1.bf16.msra.mxu1 %v11381_v48  ;;  %v14478_v47 = vsub.s32 0, %v14475_v46  ;;  %v14480_v48 = vld [vmem:[#allocation5] sm:$0xf] }
 0x3fd   :  { %7511 = vmatprep.subr.bf16.mxu0 %v11388_v49  ;;  %7593 = vmatprep.subr.bf16.mxu1 %v11390_v50  ;;  %v14483_v49 = vsub.s32 1, %v14475_v46  ;;  %v14486_v50 = vsub.s32 3, %v14475_v46 }
 0x3fe   :  { %v982_v51 = vrot.slane %v14480_v48, %v14478_v47 }
 0x3ff   :  { %v986_v52 = vrot.slane %v14480_v48, %v14483_v49  ;;  %v994_v53 = vrot.slane %v14480_v48, %v14486_v50 }
 0x400   :  { %7512 = vmatpush1.bf16.msra.mxu0 %v11387_v55  ;;  %7594 = vmatpush1.bf16.msra.mxu1 %v11389_v56 }
 0x401   :  { %7513 = vmatprep.subr.bf16.mxu0 %v11396_v28  ;;  %7595 = vmatprep.subr.bf16.mxu1 %v11398_v57 }
 0x404   :  { %7514 = vmatpush1.bf16.msra.mxu0 %v11395_v62  ;;  %7596 = vmatpush1.bf16.msra.mxu1 %v11397_v63 }
 0x405   :  { %7515 = vmatprep.subr.bf16.mxu0 %v11404_v0  ;;  %7597 = vmatprep.subr.bf16.mxu1 %v11406_v1 }
 0x408   :  { %7516 = vmatpush1.bf16.msra.mxu0 %v11403_v6  ;;  %7598 = vmatpush1.bf16.msra.mxu1 %v11405_v7  ;;  %v6056_v6 = vld [vmem:[#allocation7 + $0x468] sm:$0xff] }
 0x409   :  { %7517 = vmatprep.subr.bf16.mxu0 %v11412_v8  ;;  %7599 = vmatprep.subr.bf16.mxu1 %v11414_v9  ;;  %v6059_v9 = vld [vmem:[#allocation7 + $0x480] sm:$0xff]  ;;  %v11454_v12 = vcombine.high %v6052_v5, %v6056_v6 }
 0x40a   :  { %v11459_v27 = vcombine.low %v6059_v9, %v6063_v13 }
 0x40c   :  { %7518 = vmatpush1.bf16.msra.mxu0 %v11411_v16  ;;  %7600 = vmatpush1.bf16.msra.mxu1 %v11413_v18  ;;  %v6064_v16 = vld [vmem:[#allocation7 + $0x4a8] sm:$0xff] }
 0x40d   :  { %7519 = vmatprep.subr.bf16.mxu0 %v11420_v11  ;;  %7601 = vmatprep.subr.bf16.mxu1 %v11422_v20  ;;  %v11451_v11 = vcombine.low %v6051_v2, %v6055_v4  ;;  %v11453_v20 = vcombine.low %v6052_v5, %v6056_v6  ;;  %v6107_v2 = vld [vmem:[#allocation7 + $0x600] sm:$0xff]  ;;  %v6108_v4 = vld [vmem:[#allocation7 + $0x608] sm:$0xff] }
 0x40e   :  { %v6112_v5 = vld [vmem:[#allocation7 + $0x628] sm:$0xff] }
 0x410   :  { %7520 = vmatpush1.bf16.msra.mxu0 %v11419_v14  ;;  %7602 = vmatpush1.bf16.msra.mxu1 %v11421_v22  ;;  %v11460_v14 = vcombine.high %v6059_v9, %v6063_v13  ;;  %v11462_v22 = vcombine.high %v6060_v15, %v6064_v16  ;;  %v6115_v13 = vld [vmem:[#allocation7 + $0x640] sm:$0xff] }
 0x411   :  { %7521 = vmatprep.subr.bf16.mxu0 %v11428_v26  ;;  %7603 = vmatprep.subr.bf16.mxu1 %v11430_v30  ;;  %v6072_v26 = vld [vmem:[#allocation7 + $0x4e8] sm:$0xff] }
 0x412   :  { %v11470_v30 = vcombine.high %v6068_v17, %v6072_v26 }
 0x414   :  { %7522 = vmatpush1.bf16.msra.mxu0 %v11427_v19  ;;  %7604 = vmatpush1.bf16.msra.mxu1 %v11429_v29  ;;  %v11461_v19 = vcombine.low %v6060_v15, %v6064_v16  ;;  %v11468_v29 = vcombine.high %v6067_v23, %v6071_v24  ;;  %v6119_v15 = vld [vmem:[#allocation7 + $0x660] sm:$0xff]  ;;  %v6116_v16 = vld [vmem:[#allocation7 + $0x648] sm:$0xff] }
 0x415   :  { %7523 = vmatprep.subr.bf16.mxu0 %v11436_v34  ;;  %7605 = vmatprep.subr.bf16.mxu1 %v11438_v38  ;;  %v6080_v34 = vld [vmem:[#allocation7 + $0x528] sm:$0xff]  ;;  %v6123_v24 = vld [vmem:[#allocation7 + $0x680] sm:$0xff] }
 0x416   :  { %v11478_v38 = vcombine.high %v6076_v33, %v6080_v34 }
 0x418   :  { %7524 = vmatpush1.bf16.msra.mxu0 %v11435_v36  ;;  %7606 = vmatpush1.bf16.msra.mxu1 %v11437_v37  ;;  %v11469_v36 = vcombine.low %v6068_v17, %v6072_v26  ;;  %v11476_v37 = vcombine.high %v6075_v21, %v6079_v32  ;;  %v6127_v17 = vld [vmem:[#allocation7 + $0x6a0] sm:$0xff]  ;;  %v6124_v26 = vld [vmem:[#allocation7 + $0x688] sm:$0xff] }
 0x419   :  { %7534 = vmatprep.subr.bf16.mxu0 %v11444_v41  ;;  %7616 = vmatprep.subr.bf16.mxu1 %v11446_v44  ;;  %v6088_v41 = vld [vmem:[#allocation7 + $0x568] sm:$0xff]  ;;  %v6131_v32 = vld [vmem:[#allocation7 + $0x6c0] sm:$0xff] }
 0x41a   :  { %v11486_v44 = vcombine.high %v6084_v40, %v6088_v41 }
 0x4ae   :  { %v5408_v54 = vpop.f32.mrb[0].mxu0  ;;  %v14494_v55 = vpop.f32.mrb[0].mxu1 }
 0x4af   :  { %v11968_v56 = vadd.f32 %v5408_v54, %v982_v51  ;;  %v5410_v28 = vpop.f32.mrb[1].mxu0  ;;  %v5902_v57 = vpop.f32.mrb[1].mxu1  ;;  %v6095_v51 = vld [vmem:[#allocation7 + $0x5a0] sm:$0xff]  ;;  %v11483_v54 = vcombine.low %v6083_v31, %v6087_v39 }
 0x4b0   :  { %v11969_v58 = vadd.f32 %v5410_v28, %v986_v52  ;;  %v11971_v59 = vadd.f32 %v5902_v57, %v994_v53  ;;  %v5412_v60 = vpop.f32.mrb[2].mxu0  ;;  %v5904_v61 = vpop.f32.mrb[2].mxu1  ;;  %v6092_v52 = vld [vmem:[#allocation7 + $0x588] sm:$0xff]  ;;  %v11492_v28 = vcombine.high %v6091_v45, %v6095_v51 }
 0x4b1   :  { %v5907_v62 = vmax.f32 %v11968_v56, 0.0  ;;  %v5413_v63 = vpop.f32.mrb[3].mxu0  ;;  %v5905_v0 = vpop.f32.mrb[3].mxu1  ;;  %v6096_v53 = vld [vmem:[#allocation7 + $0x5a8] sm:$0xff]  ;;  %v11485_v56 = vcombine.low %v6084_v40, %v6088_v41  ;;  %v6143_v40 = vld [vmem:[#allocation7 + $0x720] sm:$0xff] }
 0x4b2   :  { %v5908_v1 = vmax.f32 %v11969_v58, 0.0  ;;  %v5910_v3 = vmax.f32 %v11971_v59, 0.0  ;;  %v11494_v57 = vcombine.high %v6092_v52, %v6096_v53  ;;  %v6099_v58 = vld [vmem:[#allocation7 + $0x5c0] sm:$0xff]  ;;  %v6100_v60 = vld [vmem:[#allocation7 + $0x5c8] sm:$0xff]  ;;  %v11493_v63 = vcombine.low %v6092_v52, %v6096_v53 }
 0x4b3   :  { %v14498_v8 = vpack.c.bf16 %v5907_v62, %v5907_v62  ;;  %v6103_v59 = vld [vmem:[#allocation7 + $0x5e0] sm:$0xff]  ;;  %v6104_v61 = vld [vmem:[#allocation7 + $0x5e8] sm:$0xff]  ;;  %v11491_v62 = vcombine.low %v6091_v45, %v6095_v51 }
 0x4b4   :  { %v14496_v7 = vpack.c.bf16 %v5908_v1, %v5908_v1  ;;  %v14502_v18 = vpack.c.bf16 %v5910_v3, %v5910_v3  ;;  %v11500_v0 = vcombine.high %v6099_v58, %v6103_v59  ;;  %v11502_v1 = vcombine.high %v6100_v60, %v6104_v61  ;;  %v6111_v3 = vld [vmem:[#allocation7 + $0x620] sm:$0xff]  ;;  %v6140_v41 = vld [vmem:[#allocation7 + $0x708] sm:$0xff] }
 0x4b5   :  { %v11499_v6 = vcombine.low %v6099_v58, %v6103_v59  ;;  %v11501_v9 = vcombine.low %v6100_v60, %v6104_v61  ;;  %v6147_v51 = vld [vmem:[#allocation7 + $0x740] sm:$0xff]  ;;  %v6148_v53 = vld [vmem:[#allocation7 + $0x748] sm:$0xff] }
 0x4b6   :  { %7525 = vmatprep.mubr.bf16.mxu0 %v14496_v7  ;;  %7607 = vmatprep.mubr.bf16.mxu1 %v14496_v7  ;;  %v6151_v52 = vld [vmem:[#allocation7 + $0x760] sm:$0xff] }
 0x4b7   :  { %7526 = vmatmul.mubr.bf16.vlgmr.msra.gmra.mrb[4].mxu0 %v14498_v8  ;;  %7608 = vmatmul.mubr.bf16.vlgmr.msra.gmra.mrb[4].mxu1 %v14498_v8  ;;  %v11548_v58 = vcombine.high %v6147_v51, %v6151_v52  ;;  %v6155_v60 = vld [vmem:[#allocation7 + $0x780] sm:$0xff] }
 0x4b8   :  { %7535 = vmatpush1.bf16.msra.mxu0 %v11443_v42  ;;  %7617 = vmatpush1.bf16.msra.mxu1 %v11445_v43  ;;  %v11477_v42 = vcombine.low %v6076_v33, %v6080_v34  ;;  %v11484_v43 = vcombine.high %v6083_v31, %v6087_v39  ;;  %v6135_v33 = vld [vmem:[#allocation7 + $0x6e0] sm:$0xff]  ;;  %v6132_v34 = vld [vmem:[#allocation7 + $0x6c8] sm:$0xff] }
 0x4b9   :  { %7566 = vmatprep.mubr.bf16.mxu0 %v14502_v18  ;;  %7648 = vmatprep.mubr.bf16.mxu1 %v14502_v18  ;;  %v6139_v39 = vld [vmem:[#allocation7 + $0x700] sm:$0xff] }
 0x4ba   :  { %7536 = vmatprep.subr.bf16.mxu0 %v11452_v10  ;;  %7618 = vmatprep.subr.bf16.mxu1 %v11454_v12  ;;  %v11508_v10 = vcombine.high %v6107_v2, %v6111_v3  ;;  %v11510_v12 = vcombine.high %v6108_v4, %v6112_v5  ;;  %v6159_v61 = vld [vmem:[#allocation7 + $0x7a0] sm:$0xff] }
 0x4bc   :  { %7537 = vmatpush1.bf16.msra.mxu0 %v11451_v11  ;;  %7619 = vmatpush1.bf16.msra.mxu1 %v11453_v20  ;;  %v6120_v11 = vld [vmem:[#allocation7 + $0x668] sm:$0xff]  ;;  %v11507_v20 = vcombine.low %v6107_v2, %v6111_v3  ;;  %v11556_v3 = vcombine.high %v6155_v60, %v6159_v61 }
 0x4bd   :  { %7538 = vmatprep.subr.bf16.mxu0 %v11460_v14  ;;  %7620 = vmatprep.subr.bf16.mxu1 %v11462_v22  ;;  %v11509_v14 = vcombine.low %v6108_v4, %v6112_v5  ;;  %v11516_v22 = vcombine.high %v6115_v13, %v6119_v15  ;;  %v11518_v23 = vcombine.high %v6116_v16, %v6120_v11  ;;  %v6163_v5 = vld [vmem:[#allocation7 + $0x7c0] sm:$0xff] }
 0x4c0   :  { %7539 = vmatpush1.bf16.msra.mxu0 %v11459_v27  ;;  %7621 = vmatpush1.bf16.msra.mxu1 %v11461_v19  ;;  %v6128_v27 = vld [vmem:[#allocation7 + $0x6a8] sm:$0xff]  ;;  %v11515_v19 = vcombine.low %v6115_v13, %v6119_v15 }
 0x4c1   :  { %7540 = vmatprep.subr.bf16.mxu0 %v11468_v29  ;;  %7622 = vmatprep.subr.bf16.mxu1 %v11470_v30  ;;  %v11517_v29 = vcombine.low %v6116_v16, %v6120_v11  ;;  %v11524_v30 = vcombine.high %v6123_v24, %v6127_v17  ;;  %v11526_v21 = vcombine.high %v6124_v26, %v6128_v27 }
 0x4c4   :  { %7541 = vmatpush1.bf16.msra.mxu0 %v11467_v35  ;;  %7623 = vmatpush1.bf16.msra.mxu1 %v11469_v36  ;;  %v6136_v35 = vld [vmem:[#allocation7 + $0x6e8] sm:$0xff]  ;;  %v11523_v36 = vcombine.low %v6123_v24, %v6127_v17 }
 0x4c5   :  { %7542 = vmatprep.subr.bf16.mxu0 %v11476_v37  ;;  %7624 = vmatprep.subr.bf16.mxu1 %v11478_v38  ;;  %v11525_v37 = vcombine.low %v6124_v26, %v6128_v27  ;;  %v11532_v38 = vcombine.high %v6131_v32, %v6135_v33  ;;  %v11534_v31 = vcombine.high %v6132_v34, %v6136_v35 }
 0x4c8   :  { %7543 = vmatpush1.bf16.msra.mxu0 %v11475_v25  ;;  %7625 = vmatpush1.bf16.msra.mxu1 %v11477_v42  ;;  %v6144_v25 = vld [vmem:[#allocation7 + $0x728] sm:$0xff]  ;;  %v11531_v42 = vcombine.low %v6131_v32, %v6135_v33 }
 0x4c9   :  { %7544 = vmatprep.subr.bf16.mxu0 %v11484_v43  ;;  %7626 = vmatprep.subr.bf16.mxu1 %v11486_v44  ;;  %v11533_v43 = vcombine.low %v6132_v34, %v6136_v35  ;;  %v11540_v44 = vcombine.high %v6139_v39, %v6143_v40  ;;  %v11542_v45 = vcombine.high %v6140_v41, %v6144_v25 }
 0x4cc   :  { %7545 = vmatpush1.bf16.msra.mxu0 %v11483_v54  ;;  %7627 = vmatpush1.bf16.msra.mxu1 %v11485_v56  ;;  %v6152_v54 = vld [vmem:[#allocation7 + $0x768] sm:$0xff]  ;;  %v11539_v56 = vcombine.low %v6139_v39, %v6143_v40 }
 0x4cd   :  { %7546 = vmatprep.subr.bf16.mxu0 %v11492_v28  ;;  %7628 = vmatprep.subr.bf16.mxu1 %v11494_v57  ;;  %v11541_v28 = vcombine.low %v6140_v41, %v6144_v25  ;;  %v14509_v57 = vsub.s32 2, %v14475_v46  ;;  %v11550_v59 = vcombine.high %v6148_v53, %v6152_v54 }
 0x4cf   :  { %v990_v2 = vrot.slane %v14480_v48, %v14509_v57  ;;  %v5921_v48 = vld [vmem:[#allocation7 + $0x30] sm:$0xff] }
 0x4d0   :  { %7547 = vmatpush1.bf16.msra.mxu0 %v11491_v62  ;;  %7629 = vmatpush1.bf16.msra.mxu1 %v11493_v63  ;;  %v6156_v62 = vld [vmem:[#allocation7 + $0x788] sm:$0xff] }
 0x4d1   :  { %7548 = vmatprep.subr.bf16.mxu0 %v11500_v0  ;;  %7630 = vmatprep.subr.bf16.mxu1 %v11502_v1  ;;  %v6160_v63 = vld [vmem:[#allocation7 + $0x7a8] sm:$0xff]  ;;  %v11547_v0 = vcombine.low %v6147_v51, %v6151_v52  ;;  %v11549_v1 = vcombine.low %v6148_v53, %v6152_v54  ;;  %v11970_v15 = vadd.f32 %v14494_v55, %v990_v2  ;;  %v5926_v55 = vld [vmem:[#allocation7 + $0x58] sm:$0xff] }
 0x4d2   :  { %v11558_v4 = vcombine.high %v6156_v62, %v6160_v63  ;;  %v11557_v13 = vcombine.low %v6156_v62, %v6160_v63  ;;  %v5957_v63 = vld [vmem:[#allocation7 + $0x150] sm:$0xff]  ;;  %v5962_v2 = vld [vmem:[#allocation7 + $0x178] sm:$0xff] }
 0x4d3   :  { %v5909_v17 = vmax.f32 %v11970_v15, 0.0 }
 0x4d4   :  { %7549 = vmatpush1.bf16.msra.mxu0 %v11499_v6  ;;  %7631 = vmatpush1.bf16.msra.mxu1 %v11501_v9  ;;  %v6167_v6 = vld [vmem:[#allocation7 + $0x7e0] sm:$0xff]  ;;  %v6164_v9 = vld [vmem:[#allocation7 + $0x7c8] sm:$0xff] }
 0x4d5   :  { %7550 = vmatprep.subr.bf16.mxu0 %v11508_v10  ;;  %7632 = vmatprep.subr.bf16.mxu1 %v11510_v12  ;;  %v6168_v10 = vld [vmem:[#allocation7 + $0x7e8] sm:$0xff]  ;;  %v11555_v12 = vcombine.low %v6155_v60, %v6159_v61  ;;  %v11564_v16 = vcombine.high %v6163_v5, %v6167_v6  ;;  %v14514_v32 = vpack.c.bf16 %v5909_v17, %v5909_v17 }
 0x4d6   :  { %v11566_v11 = vcombine.high %v6164_v9, %v6168_v10  ;;  %v11565_v24 = vcombine.low %v6164_v9, %v6168_v10  ;;  %v5965_v9 = vld [vmem:[#allocation7 + $0x190] sm:$0xff] }
 0x4d7   :  { %v5969_v10 = vld [vmem:[#allocation7 + $0x1b0] sm:$0xff] }
 0x4d8   :  { %7551 = vmatpush1.bf16.msra.mxu0 %v11507_v20  ;;  %7633 = vmatpush1.bf16.msra.mxu1 %v11509_v14  ;;  %v5917_v20 = vld [vmem:[#allocation7 + $0x10] sm:$0xff]  ;;  %v5918_v14 = vld [vmem:[#allocation7 + $0x18] sm:$0xff] }
 0x4d9   :  { %7552 = vmatprep.subr.bf16.mxu0 %v11516_v22  ;;  %7634 = vmatprep.subr.bf16.mxu1 %v11518_v23  ;;  %v5922_v22 = vld [vmem:[#allocation7 + $0x38] sm:$0xff]  ;;  %v11563_v23 = vcombine.low %v6163_v5, %v6167_v6  ;;  %v11320_v26 = vcombine.high %v5917_v20, %v5921_v48 }
 0x4da   :  { %v11322_v27 = vcombine.high %v5918_v14, %v5922_v22  ;;  %v11321_v33 = vcombine.low %v5918_v14, %v5922_v22  ;;  %v5977_v14 = vld [vmem:[#allocation7 + $0x1f0] sm:$0xff]  ;;  %v5974_v22 = vld [vmem:[#allocation7 + $0x1d8] sm:$0xff] }
 0x4dc   :  { %7553 = vmatpush1.bf16.msra.mxu0 %v11515_v19  ;;  %7635 = vmatpush1.bf16.msra.mxu1 %v11517_v29  ;;  %v5925_v19 = vld [vmem:[#allocation7 + $0x50] sm:$0xff] }
 0x4dd   :  { %7554 = vmatprep.subr.bf16.mxu0 %v11524_v30  ;;  %7636 = vmatprep.subr.bf16.mxu1 %v11526_v21  ;;  %v5929_v29 = vld [vmem:[#allocation7 + $0x70] sm:$0xff]  ;;  %v5930_v30 = vld [vmem:[#allocation7 + $0x78] sm:$0xff]  ;;  %v11319_v21 = vcombine.low %v5917_v20, %v5921_v48 }
 0x4de   :  { %v11328_v34 = vcombine.high %v5925_v19, %v5929_v29  ;;  %v11330_v35 = vcombine.high %v5926_v55, %v5930_v30  ;;  %v11327_v39 = vcombine.low %v5925_v19, %v5929_v29  ;;  %v11329_v40 = vcombine.low %v5926_v55, %v5930_v30  ;;  %v5973_v48 = vld [vmem:[#allocation7 + $0x1d0] sm:$0xff]  ;;  %v5982_v55 = vld [vmem:[#allocation7 + $0x218] sm:$0xff] }
 0x4df   :  { %v5981_v19 = vld [vmem:[#allocation7 + $0x210] sm:$0xff]  ;;  %v5986_v30 = vld [vmem:[#allocation7 + $0x238] sm:$0xff] }
 0x4e0   :  { %7555 = vmatpush1.bf16.msra.mxu0 %v11523_v36  ;;  %7637 = vmatpush1.bf16.msra.mxu1 %v11525_v37  ;;  %v5933_v36 = vld [vmem:[#allocation7 + $0x90] sm:$0xff] }
 0x4e1   :  { %7556 = vmatprep.subr.bf16.mxu0 %v11532_v38  ;;  %7638 = vmatprep.subr.bf16.mxu1 %v11534_v31  ;;  %v5937_v37 = vld [vmem:[#allocation7 + $0xb0] sm:$0xff]  ;;  %v5934_v38 = vld [vmem:[#allocation7 + $0x98] sm:$0xff] }
 0x4e2   :  { %v5938_v31 = vld [vmem:[#allocation7 + $0xb8] sm:$0xff]  ;;  %v11336_v41 = vcombine.high %v5933_v36, %v5937_v37  ;;  %v11335_v51 = vcombine.low %v5933_v36, %v5937_v37  ;;  %v5985_v29 = vld [vmem:[#allocation7 + $0x230] sm:$0xff] }
 0x4e3   :  { %v11338_v25 = vcombine.high %v5934_v38, %v5938_v31  ;;  %v11337_v52 = vcombine.low %v5934_v38, %v5938_v31  ;;  %v5989_v36 = vld [vmem:[#allocation7 + $0x250] sm:$0xff]  ;;  %v5990_v38 = vld [vmem:[#allocation7 + $0x258] sm:$0xff] }
 0x4e4   :  { %7557 = vmatpush1.bf16.msra.mxu0 %v11531_v42  ;;  %7639 = vmatpush1.bf16.msra.mxu1 %v11533_v43  ;;  %v5941_v42 = vld [vmem:[#allocation7 + $0xd0] sm:$0xff]  ;;  %v5994_v31 = vld [vmem:[#allocation7 + $0x278] sm:$0xff] }
 0x4e5   :  { %7558 = vmatprep.subr.bf16.mxu0 %v11540_v44  ;;  %7640 = vmatprep.subr.bf16.mxu1 %v11542_v45  ;;  %v5945_v43 = vld [vmem:[#allocation7 + $0xf0] sm:$0xff]  ;;  %v5942_v44 = vld [vmem:[#allocation7 + $0xd8] sm:$0xff] }
 0x4e6   :  { %v5946_v45 = vld [vmem:[#allocation7 + $0xf8] sm:$0xff]  ;;  %v11344_v53 = vcombine.high %v5941_v42, %v5945_v43  ;;  %v5993_v37 = vld [vmem:[#allocation7 + $0x270] sm:$0xff] }
 0x4e7   :  { %v11346_v54 = vcombine.high %v5942_v44, %v5946_v45  ;;  %v11345_v60 = vcombine.low %v5942_v44, %v5946_v45  ;;  %v5998_v44 = vld [vmem:[#allocation7 + $0x298] sm:$0xff] }
 0x4e8   :  { %7559 = vmatpush1.bf16.msra.mxu0 %v11539_v56  ;;  %7641 = vmatpush1.bf16.msra.mxu1 %v11541_v28  ;;  %v5949_v56 = vld [vmem:[#allocation7 + $0x110] sm:$0xff]  ;;  %v6002_v45 = vld [vmem:[#allocation7 + $0x2b8] sm:$0xff] }
 0x4e9   :  { %7560 = vmatprep.subr.bf16.mxu0 %v11548_v58  ;;  %7642 = vmatprep.subr.bf16.mxu1 %v11550_v59  ;;  %v5953_v28 = vld [vmem:[#allocation7 + $0x130] sm:$0xff]  ;;  %v5954_v58 = vld [vmem:[#allocation7 + $0x138] sm:$0xff]  ;;  %v11343_v59 = vcombine.low %v5941_v42, %v5945_v43 }
 0x4ea   :  { %v11352_v61 = vcombine.high %v5949_v56, %v5953_v28  ;;  %v5997_v42 = vld [vmem:[#allocation7 + $0x290] sm:$0xff] }
 0x4eb   :  { %v6001_v43 = vld [vmem:[#allocation7 + $0x2b0] sm:$0xff] }
 0x4ec   :  { %7561 = vmatpush1.bf16.msra.mxu0 %v11547_v0  ;;  %7643 = vmatpush1.bf16.msra.mxu1 %v11549_v1  ;;  %v5961_v0 = vld [vmem:[#allocation7 + $0x170] sm:$0xff]  ;;  %v5958_v1 = vld [vmem:[#allocation7 + $0x158] sm:$0xff] }
 0x4ed   :  { %7562 = vmatprep.subr.bf16.mxu0 %v11556_v3  ;;  %7644 = vmatprep.subr.bf16.mxu1 %v11558_v4  ;;  %v11351_v3 = vcombine.low %v5949_v56, %v5953_v28  ;;  %v11360_v5 = vcombine.high %v5957_v63, %v5961_v0  ;;  %v11362_v6 = vcombine.high %v5958_v1, %v5962_v2  ;;  %v6005_v56 = vld [vmem:[#allocation7 + $0x2d0] sm:$0xff] }
 0x4ee   :  { %v11359_v15 = vcombine.low %v5957_v63, %v5961_v0  ;;  %v6009_v28 = vld [vmem:[#allocation7 + $0x2f0] sm:$0xff] }
 0x4ef   :  { %v6013_v63 = vld [vmem:[#allocation7 + $0x310] sm:$0xff] }
 0x4f0   :  { %7563 = vmatpush1.bf16.msra.mxu0 %v11555_v12  ;;  %7645 = vmatpush1.bf16.msra.mxu1 %v11557_v13  ;;  %v5966_v12 = vld [vmem:[#allocation7 + $0x198] sm:$0xff]  ;;  %v6017_v0 = vld [vmem:[#allocation7 + $0x330] sm:$0xff] }
 0x4f1   :  { %7564 = vmatprep.subr.bf16.mxu0 %v11564_v16  ;;  %7646 = vmatprep.subr.bf16.mxu1 %v11566_v11  ;;  %v5970_v13 = vld [vmem:[#allocation7 + $0x1b8] sm:$0xff]  ;;  %v11361_v16 = vcombine.low %v5958_v1, %v5962_v2  ;;  %v11368_v11 = vcombine.high %v5965_v9, %v5969_v10 }
 0x4f2   :  { %v11370_v20 = vcombine.high %v5966_v12, %v5970_v13  ;;  %v11369_v17 = vcombine.low %v5966_v12, %v5970_v13  ;;  %v6014_v1 = vld [vmem:[#allocation7 + $0x318] sm:$0xff] }
 0x4f3   :  { %v6018_v2 = vld [vmem:[#allocation7 + $0x338] sm:$0xff] }
 0x4f4   :  { %7565 = vmatpush1.bf16.msra.mxu0 %v11563_v23  ;;  %7647 = vmatpush1.bf16.msra.mxu1 %v11565_v24  ;;  %v5978_v23 = vld [vmem:[#allocation7 + $0x1f8] sm:$0xff]  ;;  %v11367_v24 = vcombine.low %v5965_v9, %v5969_v10  ;;  %v6021_v9 = vld [vmem:[#allocation7 + $0x350] sm:$0xff] }
 0x4f5   :  { %7657 = vmatprep.subr.bf16.mxu0 %v11320_v26  ;;  %7739 = vmatprep.subr.bf16.mxu1 %v11322_v27  ;;  %v11376_v26 = vcombine.high %v5973_v48, %v5977_v14  ;;  %v11378_v27 = vcombine.high %v5974_v22, %v5978_v23  ;;  %v6025_v10 = vld [vmem:[#allocation7 + $0x370] sm:$0xff]  ;;  %v6022_v12 = vld [vmem:[#allocation7 + $0x358] sm:$0xff] }
 0x4f6   :  { %v6026_v13 = vld [vmem:[#allocation7 + $0x378] sm:$0xff] }
 0x4f7   :  { %7567 = vmatmul.mubr.bf16.vlgmr.msra.gmra.mrb[4].mxu0 %v14514_v32  ;;  %7649 = vmatmul.mubr.bf16.vlgmr.msra.gmra.mrb[4].mxu1 %v14514_v32 }
 0x4f8   :  { %7658 = vmatpush1.bf16.msra.mxu0 %v11319_v21  ;;  %7689 = vmatprep.mubr.bf16.mxu0 %v14496_v7  ;;  %v11375_v21 = vcombine.low %v5973_v48, %v5977_v14  ;;  %v6029_v48 = vld [vmem:[#allocation7 + $0x390] sm:$0xff] }
 0x4f9   :  { %7740 = vmatpush1.bf16.msra.mxu1 %v11321_v33  ;;  %7771 = vmatprep.mubr.bf16.mxu1 %v14496_v7  ;;  %v5950_v7 = vld [vmem:[#allocation7 + $0x118] sm:$0xff]  ;;  %v11377_v33 = vcombine.low %v5974_v22, %v5978_v23  ;;  %v6033_v14 = vld [vmem:[#allocation7 + $0x3b0] sm:$0xff] }
 0x4fa   :  { %7659 = vmatprep.subr.bf16.mxu0 %v11328_v34  ;;  %7741 = vmatprep.subr.bf16.mxu1 %v11330_v35  ;;  %v11354_v62 = vcombine.high %v5950_v7, %v5954_v58  ;;  %v11353_v4 = vcombine.low %v5950_v7, %v5954_v58  ;;  %v11384_v34 = vcombine.high %v5981_v19, %v5985_v29  ;;  %v6006_v7 = vld [vmem:[#allocation7 + $0x2d8] sm:$0xff] }
 0x4fb   :  { %v11386_v35 = vcombine.high %v5982_v55, %v5986_v30  ;;  %v6010_v58 = vld [vmem:[#allocation7 + $0x2f8] sm:$0xff] }
 0x4fc   :  { %7660 = vmatpush1.bf16.msra.mxu0 %v11327_v39  ;;  %v11383_v39 = vcombine.low %v5981_v19, %v5985_v29  ;;  %v6030_v22 = vld [vmem:[#allocation7 + $0x398] sm:$0xff]  ;;  %v6037_v19 = vld [vmem:[#allocation7 + $0x3d0] sm:$0xff] }
 0x4fd   :  { %7742 = vmatpush1.bf16.msra.mxu1 %v11329_v40  ;;  %7661 = vmatprep.subr.bf16.mxu0 %v11336_v41  ;;  %v11385_v40 = vcombine.low %v5982_v55, %v5986_v30  ;;  %v11392_v41 = vcombine.high %v5989_v36, %v5993_v37  ;;  %v6034_v23 = vld [vmem:[#allocation7 + $0x3b8] sm:$0xff]  ;;  %v6041_v29 = vld [vmem:[#allocation7 + $0x3f0] sm:$0xff] }
 0x4fe   :  { %7743 = vmatprep.subr.bf16.mxu1 %v11338_v25  ;;  %v11394_v25 = vcombine.high %v5990_v38, %v5994_v31  ;;  %v6038_v55 = vld [vmem:[#allocation7 + $0x3d8] sm:$0xff] }
 0x4ff   :  { %v6042_v30 = vld [vmem:[#allocation7 + $0x3f8] sm:$0xff] }
 0x500   :  { %7662 = vmatpush1.bf16.msra.mxu0 %v11335_v51  ;;  %v11391_v51 = vcombine.low %v5989_v36, %v5993_v37  ;;  %v6045_v36 = vld [vmem:[#allocation7 + $0x410] sm:$0xff] }
 0x501   :  { %7744 = vmatpush1.bf16.msra.mxu1 %v11337_v52  ;;  %7663 = vmatprep.subr.bf16.mxu0 %v11344_v53  ;;  %v11393_v52 = vcombine.low %v5990_v38, %v5994_v31  ;;  %v11400_v53 = vcombine.high %v5997_v42, %v6001_v43  ;;  %v6049_v37 = vld [vmem:[#allocation7 + $0x430] sm:$0xff]  ;;  %v6046_v38 = vld [vmem:[#allocation7 + $0x418] sm:$0xff] }
 0x502   :  { %7745 = vmatprep.subr.bf16.mxu1 %v11346_v54  ;;  %v11402_v54 = vcombine.high %v5998_v44, %v6002_v45  ;;  %v6050_v31 = vld [vmem:[#allocation7 + $0x438] sm:$0xff] }
 0x504   :  { %7664 = vmatpush1.bf16.msra.mxu0 %v11343_v59  ;;  %v11399_v59 = vcombine.low %v5997_v42, %v6001_v43  ;;  %v6053_v42 = vld [vmem:[#allocation7 + $0x450] sm:$0xff] }
 0x505   :  { %7746 = vmatpush1.bf16.msra.mxu1 %v11345_v60  ;;  %7665 = vmatprep.subr.bf16.mxu0 %v11352_v61  ;;  %v11401_v60 = vcombine.low %v5998_v44, %v6002_v45  ;;  %v11408_v61 = vcombine.high %v6005_v56, %v6009_v28  ;;  %v6057_v43 = vld [vmem:[#allocation7 + $0x470] sm:$0xff]  ;;  %v11447_v44 = vcombine.low %v6045_v36, %v6049_v37  ;;  %v6054_v45 = vld [vmem:[#allocation7 + $0x458] sm:$0xff] }
 0x506   :  { %7747 = vmatprep.subr.bf16.mxu1 %v11354_v62  ;;  %v11410_v62 = vcombine.high %v6006_v7, %v6010_v58 }
 0x508   :  { %7666 = vmatpush1.bf16.msra.mxu0 %v11351_v3  ;;  %v11407_v3 = vcombine.low %v6005_v56, %v6009_v28  ;;  %v6065_v56 = vld [vmem:[#allocation7 + $0x4b0] sm:$0xff] }
 0x509   :  { %7748 = vmatpush1.bf16.msra.mxu1 %v11353_v4  ;;  %7667 = vmatprep.subr.bf16.mxu0 %v11360_v5  ;;  %v11409_v4 = vcombine.low %v6006_v7, %v6010_v58  ;;  %v11416_v5 = vcombine.high %v6013_v63, %v6017_v0  ;;  %v6062_v7 = vld [vmem:[#allocation7 + $0x498] sm:$0xff] }
 0x50a   :  { %7749 = vmatprep.subr.bf16.mxu1 %v11362_v6  ;;  %v11418_v6 = vcombine.high %v6014_v1, %v6018_v2  ;;  %v6066_v58 = vld [vmem:[#allocation7 + $0x4b8] sm:$0xff] }
 0x50c   :  { %7668 = vmatpush1.bf16.msra.mxu0 %v11359_v15  ;;  %v11415_v15 = vcombine.low %v6013_v63, %v6017_v0  ;;  %v6069_v63 = vld [vmem:[#allocation7 + $0x4d0] sm:$0xff] }
 0x50d   :  { %7750 = vmatpush1.bf16.msra.mxu1 %v11361_v16  ;;  %7669 = vmatprep.subr.bf16.mxu0 %v11368_v11  ;;  %v11417_v16 = vcombine.low %v6014_v1, %v6018_v2  ;;  %v11424_v11 = vcombine.high %v6021_v9, %v6025_v10  ;;  %v6073_v0 = vld [vmem:[#allocation7 + $0x4f0] sm:$0xff]  ;;  %v6070_v1 = vld [vmem:[#allocation7 + $0x4d8] sm:$0xff] }
 0x50e   :  { %7751 = vmatprep.subr.bf16.mxu1 %v11370_v20  ;;  %v11426_v20 = vcombine.high %v6022_v12, %v6026_v13  ;;  %v6074_v2 = vld [vmem:[#allocation7 + $0x4f8] sm:$0xff] }
 0x510   :  { %7670 = vmatpush1.bf16.msra.mxu0 %v11367_v24  ;;  %v11423_v24 = vcombine.low %v6021_v9, %v6025_v10  ;;  %v6081_v9 = vld [vmem:[#allocation7 + $0x530] sm:$0xff]  ;;  %v6078_v10 = vld [vmem:[#allocation7 + $0x518] sm:$0xff] }
 0x511   :  { %7752 = vmatpush1.bf16.msra.mxu1 %v11369_v17  ;;  %7671 = vmatprep.subr.bf16.mxu0 %v11376_v26  ;;  %v11425_v17 = vcombine.low %v6022_v12, %v6026_v13  ;;  %v11432_v26 = vcombine.high %v6029_v48, %v6033_v14  ;;  %v6082_v12 = vld [vmem:[#allocation7 + $0x538] sm:$0xff]  ;;  %v11473_v13 = vcombine.low %v6070_v1, %v6074_v2 }
 0x512   :  { %7753 = vmatprep.subr.bf16.mxu1 %v11378_v27  ;;  %v11434_v27 = vcombine.high %v6030_v22, %v6034_v23 }
 0x514   :  { %7672 = vmatpush1.bf16.msra.mxu0 %v11375_v21  ;;  %v11431_v21 = vcombine.low %v6029_v48, %v6033_v14  ;;  %v6086_v48 = vld [vmem:[#allocation7 + $0x558] sm:$0xff] }
 0x515   :  { %7754 = vmatpush1.bf16.msra.mxu1 %v11377_v33  ;;  %7673 = vmatprep.subr.bf16.mxu0 %v11384_v34  ;;  %v11433_v33 = vcombine.low %v6030_v22, %v6034_v23  ;;  %v11440_v34 = vcombine.high %v6037_v19, %v6041_v29  ;;  %v6090_v14 = vld [vmem:[#allocation7 + $0x578] sm:$0xff]  ;;  %v11481_v23 = vcombine.low %v6078_v10, %v6082_v12 }
 0x516   :  { %7755 = vmatprep.subr.bf16.mxu1 %v11386_v35  ;;  %v11442_v35 = vcombine.high %v6038_v55, %v6042_v30 }
 0x518   :  { %7674 = vmatpush1.bf16.msra.mxu0 %v11383_v39  ;;  %v11439_v39 = vcombine.low %v6037_v19, %v6041_v29  ;;  %v6094_v19 = vld [vmem:[#allocation7 + $0x598] sm:$0xff] }
 0x519   :  { %7756 = vmatpush1.bf16.msra.mxu1 %v11385_v40  ;;  %7675 = vmatprep.subr.bf16.mxu0 %v11392_v41  ;;  %v11441_v40 = vcombine.low %v6038_v55, %v6042_v30  ;;  %v11448_v41 = vcombine.high %v6045_v36, %v6049_v37  ;;  %v6098_v29 = vld [vmem:[#allocation7 + $0x5b8] sm:$0xff]  ;;  %v11489_v30 = vcombine.low %v6086_v48, %v6090_v14 }
 0x51a   :  { %7757 = vmatprep.subr.bf16.mxu1 %v11394_v25  ;;  %v11450_v25 = vcombine.high %v6046_v38, %v6050_v31  ;;  %v6102_v36 = vld [vmem:[#allocation7 + $0x5d8] sm:$0xff] }
 0x51b   :  { %v6106_v37 = vld [vmem:[#allocation7 + $0x5f8] sm:$0xff] }
 0x51c   :  { %7676 = vmatpush1.bf16.msra.mxu0 %v11391_v51  ;;  %v6058_v51 = vld [vmem:[#allocation7 + $0x478] sm:$0xff] }
 0x51d   :  { %7758 = vmatpush1.bf16.msra.mxu1 %v11393_v52  ;;  %7677 = vmatprep.subr.bf16.mxu0 %v11400_v53  ;;  %v11449_v52 = vcombine.low %v6046_v38, %v6050_v31  ;;  %v11456_v53 = vcombine.high %v6053_v42, %v6057_v43  ;;  %v11458_v28 = vcombine.high %v6054_v45, %v6058_v51 }
 0x51e   :  { %7759 = vmatprep.subr.bf16.mxu1 %v11402_v54  ;;  %v6061_v54 = vld [vmem:[#allocation7 + $0x490] sm:$0xff]  ;;  %v11497_v31 = vcombine.low %v6094_v19, %v6098_v29 }
 0x520   :  { %7678 = vmatpush1.bf16.msra.mxu0 %v11399_v59  ;;  %v11455_v59 = vcombine.low %v6053_v42, %v6057_v43  ;;  %v6110_v42 = vld [vmem:[#allocation7 + $0x618] sm:$0xff] }
 0x521   :  { %7760 = vmatpush1.bf16.msra.mxu1 %v11401_v60  ;;  %7679 = vmatprep.subr.bf16.mxu0 %v11408_v61  ;;  %v11457_v60 = vcombine.low %v6054_v45, %v6058_v51  ;;  %v11464_v61 = vcombine.high %v6061_v54, %v6065_v56  ;;  %v6114_v43 = vld [vmem:[#allocation7 + $0x638] sm:$0xff]  ;;  %v11505_v45 = vcombine.low %v6102_v36, %v6106_v37 }
 0x522   :  { %7761 = vmatprep.subr.bf16.mxu1 %v11410_v62  ;;  %v11466_v62 = vcombine.high %v6062_v7, %v6066_v58 }
 0x524   :  { %7680 = vmatpush1.bf16.msra.mxu0 %v11407_v3  ;;  %v11463_v3 = vcombine.low %v6061_v54, %v6065_v56  ;;  %v6121_v54 = vld [vmem:[#allocation7 + $0x670] sm:$0xff]  ;;  %v6118_v56 = vld [vmem:[#allocation7 + $0x658] sm:$0xff] }
 0x525   :  { %7762 = vmatpush1.bf16.msra.mxu1 %v11409_v4  ;;  %7681 = vmatprep.subr.bf16.mxu0 %v11416_v5  ;;  %v11472_v4 = vcombine.high %v6069_v63, %v6073_v0  ;;  %v11474_v5 = vcombine.high %v6070_v1, %v6074_v2 }
 0x526   :  { %7763 = vmatprep.subr.bf16.mxu1 %v11418_v6  ;;  %v6077_v6 = vld [vmem:[#allocation7 + $0x510] sm:$0xff] }
 0x527   :  { %v11479_v22 = vcombine.low %v6077_v6, %v6081_v9 }
 0x528   :  { %7682 = vmatpush1.bf16.msra.mxu0 %v11415_v15  ;;  %v11480_v15 = vcombine.high %v6077_v6, %v6081_v9  ;;  %v6134_v6 = vld [vmem:[#allocation7 + $0x6d8] sm:$0xff] }
 0x529   :  { %7764 = vmatpush1.bf16.msra.mxu1 %v11417_v16  ;;  %7683 = vmatprep.subr.bf16.mxu0 %v11424_v11  ;;  %v11482_v16 = vcombine.high %v6078_v10, %v6082_v12  ;;  %v6085_v11 = vld [vmem:[#allocation7 + $0x550] sm:$0xff]  ;;  %v6138_v9 = vld [vmem:[#allocation7 + $0x6f8] sm:$0xff] }
 0x52a   :  { %7765 = vmatprep.subr.bf16.mxu1 %v11426_v20  ;;  %v6089_v20 = vld [vmem:[#allocation7 + $0x570] sm:$0xff] }
 0x52b   :  { %v11487_v55 = vcombine.low %v6085_v11, %v6089_v20 }
 0x52c   :  { %7684 = vmatpush1.bf16.msra.mxu0 %v11423_v24  ;;  %v11488_v24 = vcombine.high %v6085_v11, %v6089_v20  ;;  %v6142_v11 = vld [vmem:[#allocation7 + $0x718] sm:$0xff] }
 0x52d   :  { %7766 = vmatpush1.bf16.msra.mxu1 %v11425_v17  ;;  %7685 = vmatprep.subr.bf16.mxu0 %v11432_v26  ;;  %v11490_v17 = vcombine.high %v6086_v48, %v6090_v14  ;;  %v6093_v26 = vld [vmem:[#allocation7 + $0x590] sm:$0xff]  ;;  %v6146_v20 = vld [vmem:[#allocation7 + $0x738] sm:$0xff]  ;;  %v11537_v14 = vcombine.low %v6134_v6, %v6138_v9 }
 0x52e   :  { %7767 = vmatprep.subr.bf16.mxu1 %v11434_v27  ;;  %v6097_v27 = vld [vmem:[#allocation7 + $0x5b0] sm:$0xff] }
 0x52f   :  { %v11495_v38 = vcombine.low %v6093_v26, %v6097_v27 }
 0x530   :  { %7686 = vmatpush1.bf16.msra.mxu0 %v11431_v21  ;;  %v11496_v21 = vcombine.high %v6093_v26, %v6097_v27  ;;  %v6150_v26 = vld [vmem:[#allocation7 + $0x758] sm:$0xff] }
 0x531   :  { %7768 = vmatpush1.bf16.msra.mxu1 %v11433_v33  ;;  %7687 = vmatprep.subr.bf16.mxu0 %v11440_v34  ;;  %v11498_v33 = vcombine.high %v6094_v19, %v6098_v29  ;;  %v6101_v34 = vld [vmem:[#allocation7 + $0x5d0] sm:$0xff]  ;;  %v6154_v27 = vld [vmem:[#allocation7 + $0x778] sm:$0xff]  ;;  %v11545_v29 = vcombine.low %v6142_v11, %v6146_v20 }
 0x532   :  { %7769 = vmatprep.subr.bf16.mxu1 %v11442_v35  ;;  %v6105_v35 = vld [vmem:[#allocation7 + $0x5f0] sm:$0xff] }
 0x534   :  { %7688 = vmatpush1.bf16.msra.mxu0 %v11439_v39  ;;  %v11504_v39 = vcombine.high %v6101_v34, %v6105_v35 }
 0x535   :  { %7770 = vmatpush1.bf16.msra.mxu1 %v11441_v40  ;;  %7698 = vmatprep.subr.bf16.mxu0 %v11448_v41  ;;  %v11506_v40 = vcombine.high %v6102_v36, %v6106_v37  ;;  %v6109_v41 = vld [vmem:[#allocation7 + $0x610] sm:$0xff]  ;;  %v11553_v37 = vcombine.low %v6150_v26, %v6154_v27 }
 0x536   :  { %7780 = vmatprep.subr.bf16.mxu1 %v11450_v25  ;;  %v6113_v25 = vld [vmem:[#allocation7 + $0x630] sm:$0xff] }
 0x537   :  { %7690 = vmatmul.mubr.bf16.vlgmr.msra.gmra.mrb[8].mxu0 %v14498_v8  ;;  %v11512_v51 = vcombine.high %v6109_v41, %v6113_v25 }
 0x538   :  { %7772 = vmatmul.mubr.bf16.vlgmr.msra.gmra.mrb[8].mxu1 %v14498_v8  ;;  %7699 = vmatpush1.bf16.msra.mxu0 %v11447_v44  ;;  %v11465_v8 = vcombine.low %v6062_v7, %v6066_v58  ;;  %v11503_v44 = vcombine.low %v6101_v34, %v6105_v35  ;;  %v11511_v7 = vcombine.low %v6109_v41, %v6113_v25  ;;  %v6158_v34 = vld [vmem:[#allocation7 + $0x798] sm:$0xff] }
 0x539   :  { %7730 = vmatprep.mubr.bf16.mxu0 %v14502_v18  ;;  %7781 = vmatpush1.bf16.msra.mxu1 %v11449_v52  ;;  %v11514_v52 = vcombine.high %v6110_v42, %v6114_v43  ;;  %v11513_v58 = vcombine.low %v6110_v42, %v6114_v43  ;;  %v6162_v35 = vld [vmem:[#allocation7 + $0x7b8] sm:$0xff] }
 0x53a   :  { %7812 = vmatprep.mubr.bf16.mxu1 %v14502_v18  ;;  %7700 = vmatprep.subr.bf16.mxu0 %v11456_v53  ;;  %v11471_v18 = vcombine.low %v6069_v63, %v6073_v0  ;;  %v6117_v53 = vld [vmem:[#allocation7 + $0x650] sm:$0xff]  ;;  %v6126_v63 = vld [vmem:[#allocation7 + $0x698] sm:$0xff]  ;;  %v11561_v43 = vcombine.low %v6158_v34, %v6162_v35 }
 0x53b   :  { %7782 = vmatprep.subr.bf16.mxu1 %v11458_v28  ;;  %v6122_v28 = vld [vmem:[#allocation7 + $0x678] sm:$0xff]  ;;  %v11519_v1 = vcombine.low %v6117_v53, %v6121_v54 }
 0x53c   :  { %7701 = vmatpush1.bf16.msra.mxu0 %v11455_v59  ;;  %v11520_v59 = vcombine.high %v6117_v53, %v6121_v54  ;;  %v6130_v0 = vld [vmem:[#allocation7 + $0x6b8] sm:$0xff]  ;;  %v11521_v2 = vcombine.low %v6118_v56, %v6122_v28  ;;  %v13322_v54 = vld [vmem:[#allocation10 + $0xc] ss:$16 sps:$4 sm:$0xff]  }
 0x53d   :  { %7783 = vmatpush1.bf16.msra.mxu1 %v11457_v60  ;;  %7702 = vmatprep.subr.bf16.mxu0 %v11464_v61  ;;  %v11522_v60 = vcombine.high %v6118_v56, %v6122_v28  ;;  %v6125_v61 = vld [vmem:[#allocation7 + $0x690] sm:$0xff]  ;;  %v11529_v12 = vcombine.low %v6126_v63, %v6130_v0  ;;  %v6166_v41 = vld [vmem:[#allocation7 + $0x7d8] sm:$0xff] }
 0x53e   :  { %7784 = vmatprep.subr.bf16.mxu1 %v11466_v62  ;;  %v6129_v62 = vld [vmem:[#allocation7 + $0x6b0] sm:$0xff]  ;;  %v6170_v25 = vld [vmem:[#allocation7 + $0x7f8] sm:$0xff] }
 0x53f   :  { %v11527_v10 = vcombine.low %v6125_v61, %v6129_v62  ;;  %v13319_v53 = vld [vmem:[#allocation10 + $0x4] ss:$16 sps:$4 sm:$0xff]   ;;  %v13317_v56 = vld [vmem:[#allocation10] ss:$16 sps:$4 sm:$0xff]   ;;  %v13320_v28 = vld [vmem:[#allocation10 + $0x8] ss:$16 sps:$4 sm:$0xff]  }
 0x540   :  { %7703 = vmatpush1.bf16.msra.mxu0 %v11463_v3  ;;  %v11528_v3 = vcombine.high %v6125_v61, %v6129_v62  ;;  %v13331_v61 = vld [vmem:[#allocation10 + $0x44] ss:$16 sps:$4 sm:$0xff]   ;;  %v13334_v62 = vld [vmem:[#allocation10 + $0x4c] ss:$16 sps:$4 sm:$0xff]  }
 0x541   :  { %7785 = vmatpush1.bf16.msra.mxu1 %v11465_v8  ;;  %7704 = vmatprep.subr.bf16.mxu0 %v11472_v4  ;;  %v11530_v8 = vcombine.high %v6126_v63, %v6130_v0  ;;  %v6133_v4 = vld [vmem:[#allocation7 + $0x6d0] sm:$0xff]  ;;  %v13329_v63 = vld [vmem:[#allocation10 + $0x40] ss:$16 sps:$4 sm:$0xff]  }
 0x542   :  { %7786 = vmatprep.subr.bf16.mxu1 %v11474_v5  ;;  %v6137_v5 = vld [vmem:[#allocation7 + $0x6f0] sm:$0xff] }
 0x543   :  { %v11535_v48 = vcombine.low %v6133_v4, %v6137_v5  ;;  %v13332_v0 = vld [vmem:[#allocation10 + $0x48] ss:$16 sps:$4 sm:$0xff]  }
 0x544   :  { %7705 = vmatpush1.bf16.msra.mxu0 %v11471_v18  ;;  %v11536_v18 = vcombine.high %v6133_v4, %v6137_v5  ;;  %v13346_v4 = vld [vmem:[#allocation10 + $0x8c] ss:$16 sps:$4 sm:$0xff]   ;;  %v13341_v5 = vld [vmem:[#allocation10 + $0x80] ss:$16 sps:$4 sm:$0xff]  }
 0x545   :  { %7787 = vmatpush1.bf16.msra.mxu1 %v11473_v13  ;;  %7706 = vmatprep.subr.bf16.mxu0 %v11480_v15  ;;  %v11538_v13 = vcombine.high %v6134_v6, %v6138_v9  ;;  %v6141_v15 = vld [vmem:[#allocation7 + $0x710] sm:$0xff]  ;;  %v13349_v9 = vld [vmem:[#allocation10 + $0xa4] ss:$16 sps:$4 sm:$0xff]  }
 0x546   :  { %7788 = vmatprep.subr.bf16.mxu1 %v11482_v16  ;;  %v6145_v16 = vld [vmem:[#allocation7 + $0x730] sm:$0xff] }
 0x547   :  { %v11543_v19 = vcombine.low %v6141_v15, %v6145_v16  ;;  %v13344_v6 = vld [vmem:[#allocation10 + $0x88] ss:$16 sps:$4 sm:$0xff]  }
 0x548   :  { %7707 = vmatpush1.bf16.msra.mxu0 %v11479_v22  ;;  %v11544_v22 = vcombine.high %v6141_v15, %v6145_v16  ;;  %v13358_v15 = vld [vmem:[#allocation10 + $0xcc] ss:$16 sps:$4 sm:$0xff]   ;;  %v13353_v16 = vld [vmem:[#allocation10 + $0xc0] ss:$16 sps:$4 sm:$0xff]  }
 0x549   :  { %7789 = vmatpush1.bf16.msra.mxu1 %v11481_v23  ;;  %7708 = vmatprep.subr.bf16.mxu0 %v11488_v24  ;;  %v11546_v23 = vcombine.high %v6142_v11, %v6146_v20  ;;  %v6149_v24 = vld [vmem:[#allocation7 + $0x750] sm:$0xff]  ;;  %v13361_v20 = vld [vmem:[#allocation10 + $0xe4] ss:$16 sps:$4 sm:$0xff]  }
 0x54a   :  { %7790 = vmatprep.subr.bf16.mxu1 %v11490_v17  ;;  %v6153_v17 = vld [vmem:[#allocation7 + $0x770] sm:$0xff] }
 0x54b   :  { %v11551_v36 = vcombine.low %v6149_v24, %v6153_v17  ;;  %v13356_v11 = vld [vmem:[#allocation10 + $0xc8] ss:$16 sps:$4 sm:$0xff]  }
 0x54c   :  { %7709 = vmatpush1.bf16.msra.mxu0 %v11487_v55  ;;  %v11552_v55 = vcombine.high %v6149_v24, %v6153_v17  ;;  %v13370_v24 = vld [vmem:[#allocation10 + $0x10c] ss:$16 sps:$4 sm:$0xff]   ;;  %v13365_v17 = vld [vmem:[#allocation10 + $0x100] ss:$16 sps:$4 sm:$0xff]  }
 0x54d   :  { %7791 = vmatpush1.bf16.msra.mxu1 %v11489_v30  ;;  %7710 = vmatprep.subr.bf16.mxu0 %v11496_v21  ;;  %v11554_v30 = vcombine.high %v6150_v26, %v6154_v27  ;;  %v6157_v21 = vld [vmem:[#allocation7 + $0x790] sm:$0xff]  ;;  %v13373_v27 = vld [vmem:[#allocation10 + $0x124] ss:$16 sps:$4 sm:$0xff]  }
 0x54e   :  { %7792 = vmatprep.subr.bf16.mxu1 %v11498_v33  ;;  %v6161_v33 = vld [vmem:[#allocation7 + $0x7b0] sm:$0xff] }
 0x54f   :  { %v11559_v42 = vcombine.low %v6157_v21, %v6161_v33  ;;  %v13368_v26 = vld [vmem:[#allocation10 + $0x108] ss:$16 sps:$4 sm:$0xff]  }
 0x550   :  { %7711 = vmatpush1.bf16.msra.mxu0 %v11495_v38  ;;  %v11560_v38 = vcombine.high %v6157_v21, %v6161_v33  ;;  %v13382_v21 = vld [vmem:[#allocation10 + $0x14c] ss:$16 sps:$4 sm:$0xff]   ;;  %v13377_v33 = vld [vmem:[#allocation10 + $0x140] ss:$16 sps:$4 sm:$0xff]  }
 0x551   :  { %7793 = vmatpush1.bf16.msra.mxu1 %v11497_v31  ;;  %7712 = vmatprep.subr.bf16.mxu0 %v11504_v39  ;;  %v11562_v31 = vcombine.high %v6158_v34, %v6162_v35  ;;  %v6165_v39 = vld [vmem:[#allocation7 + $0x7d0] sm:$0xff]  ;;  %v13385_v35 = vld [vmem:[#allocation10 + $0x164] ss:$16 sps:$4 sm:$0xff]  }
 0x552   :  { %7794 = vmatprep.subr.bf16.mxu1 %v11506_v40  ;;  %v6169_v40 = vld [vmem:[#allocation7 + $0x7f0] sm:$0xff] }
 0x553   :  { %v13380_v34 = vld [vmem:[#allocation10 + $0x148] ss:$16 sps:$4 sm:$0xff]  }
 0x554   :  { %7713 = vmatpush1.bf16.msra.mxu0 %v11503_v44  ;;  %v11568_v44 = vcombine.high %v6165_v39, %v6169_v40 }
 0x555   :  { %7795 = vmatpush1.bf16.msra.mxu1 %v11505_v45  ;;  %7714 = vmatprep.subr.bf16.mxu0 %v11512_v51  ;;  %v11570_v45 = vcombine.high %v6166_v41, %v6170_v25  ;;  %v11567_v51 = vcombine.low %v6165_v39, %v6169_v40  ;;  %v13394_v39 = vld [vmem:[#allocation10 + $0x18c] ss:$16 sps:$4 sm:$0xff]   ;;  %v13389_v40 = vld [vmem:[#allocation10 + $0x180] ss:$16 sps:$4 sm:$0xff]  }
 0x556   :  { %7796 = vmatprep.subr.bf16.mxu1 %v11514_v52  ;;  %v11569_v52 = vcombine.low %v6166_v41, %v6170_v25  ;;  %v13392_v41 = vld [vmem:[#allocation10 + $0x188] ss:$16 sps:$4 sm:$0xff]   ;;  %v13397_v25 = vld [vmem:[#allocation10 + $0x1a4] ss:$16 sps:$4 sm:$0xff]  }
 0x558   :  { %7715 = vmatpush1.bf16.msra.mxu0 %v11511_v7  ;;  %v13325_v7 = vld [vmem:[#allocation10 + $0x24] ss:$16 sps:$4 sm:$0xff]  }
 0x559   :  { %7797 = vmatpush1.bf16.msra.mxu1 %v11513_v58  ;;  %7716 = vmatprep.subr.bf16.mxu0 %v11520_v59  ;;  %v13328_v58 = vld [vmem:[#allocation10 + $0x2c] ss:$16 sps:$4 sm:$0xff]   ;;  %v13323_v59 = vld [vmem:[#allocation10 + $0x20] ss:$16 sps:$4 sm:$0xff]  }
 0x55a   :  { %7798 = vmatprep.subr.bf16.mxu1 %v11522_v60  ;;  %v13326_v60 = vld [vmem:[#allocation10 + $0x28] ss:$16 sps:$4 sm:$0xff]  }
 0x55c   :  { %7717 = vmatpush1.bf16.msra.mxu0 %v11519_v1  ;;  %v13337_v1 = vld [vmem:[#allocation10 + $0x64] ss:$16 sps:$4 sm:$0xff]  }
 0x55d   :  { %7799 = vmatpush1.bf16.msra.mxu1 %v11521_v2  ;;  %7718 = vmatprep.subr.bf16.mxu0 %v11528_v3  ;;  %v13340_v2 = vld [vmem:[#allocation10 + $0x6c] ss:$16 sps:$4 sm:$0xff]   ;;  %v13335_v3 = vld [vmem:[#allocation10 + $0x60] ss:$16 sps:$4 sm:$0xff]  }
 0x55e   :  { %7800 = vmatprep.subr.bf16.mxu1 %v11530_v8  ;;  %v13343_v8 = vld [vmem:[#allocation10 + $0x84] ss:$16 sps:$4 sm:$0xff]  }
 0x560   :  { %7719 = vmatpush1.bf16.msra.mxu0 %v11527_v10  ;;  %v13352_v10 = vld [vmem:[#allocation10 + $0xac] ss:$16 sps:$4 sm:$0xff]  }
 0x561   :  { %7801 = vmatpush1.bf16.msra.mxu1 %v11529_v12  ;;  %7720 = vmatprep.subr.bf16.mxu0 %v11536_v18  ;;  %v13347_v12 = vld [vmem:[#allocation10 + $0xa0] ss:$16 sps:$4 sm:$0xff]   ;;  %v13350_v18 = vld [vmem:[#allocation10 + $0xa8] ss:$16 sps:$4 sm:$0xff]  }
 0x562   :  { %7802 = vmatprep.subr.bf16.mxu1 %v11538_v13  ;;  %v13355_v13 = vld [vmem:[#allocation10 + $0xc4] ss:$16 sps:$4 sm:$0xff]  }
 0x564   :  { %7721 = vmatpush1.bf16.msra.mxu0 %v11535_v48  ;;  %v13364_v48 = vld [vmem:[#allocation10 + $0xec] ss:$16 sps:$4 sm:$0xff]  }
 0x565   :  { %7803 = vmatpush1.bf16.msra.mxu1 %v11537_v14  ;;  %7722 = vmatprep.subr.bf16.mxu0 %v11544_v22  ;;  %v13359_v14 = vld [vmem:[#allocation10 + $0xe0] ss:$16 sps:$4 sm:$0xff]   ;;  %v13362_v22 = vld [vmem:[#allocation10 + $0xe8] ss:$16 sps:$4 sm:$0xff]  }
 0x566   :  { %7804 = vmatprep.subr.bf16.mxu1 %v11546_v23  ;;  %v13367_v23 = vld [vmem:[#allocation10 + $0x104] ss:$16 sps:$4 sm:$0xff]  }
 0x568   :  { %7723 = vmatpush1.bf16.msra.mxu0 %v11543_v19  ;;  %v13376_v19 = vld [vmem:[#allocation10 + $0x12c] ss:$16 sps:$4 sm:$0xff]  }
 0x569   :  { %7805 = vmatpush1.bf16.msra.mxu1 %v11545_v29  ;;  %7724 = vmatprep.subr.bf16.mxu0 %v11552_v55  ;;  %v13371_v29 = vld [vmem:[#allocation10 + $0x120] ss:$16 sps:$4 sm:$0xff]   ;;  %v13374_v55 = vld [vmem:[#allocation10 + $0x128] ss:$16 sps:$4 sm:$0xff]  }
 0x56a   :  { %7806 = vmatprep.subr.bf16.mxu1 %v11554_v30  ;;  %v13379_v30 = vld [vmem:[#allocation10 + $0x144] ss:$16 sps:$4 sm:$0xff]  }
 0x56c   :  { %7725 = vmatpush1.bf16.msra.mxu0 %v11551_v36  ;;  %v13388_v36 = vld [vmem:[#allocation10 + $0x16c] ss:$16 sps:$4 sm:$0xff]  }
 0x56d   :  { %7807 = vmatpush1.bf16.msra.mxu1 %v11553_v37  ;;  %7726 = vmatprep.subr.bf16.mxu0 %v11560_v38  ;;  %v13383_v37 = vld [vmem:[#allocation10 + $0x160] ss:$16 sps:$4 sm:$0xff]   ;;  %v13386_v38 = vld [vmem:[#allocation10 + $0x168] ss:$16 sps:$4 sm:$0xff]  }
 0x56e   :  { %7808 = vmatprep.subr.bf16.mxu1 %v11562_v31  ;;  %v13391_v31 = vld [vmem:[#allocation10 + $0x184] ss:$16 sps:$4 sm:$0xff]  }
 0x570   :  { %7727 = vmatpush1.bf16.msra.mxu0 %v11559_v42  ;;  %v13400_v42 = vld [vmem:[#allocation10 + $0x1ac] ss:$16 sps:$4 sm:$0xff]  }
 0x571   :  { %7809 = vmatpush1.bf16.msra.mxu1 %v11561_v43  ;;  %7728 = vmatprep.subr.bf16.mxu0 %v11568_v44  ;;  %v13395_v43 = vld [vmem:[#allocation10 + $0x1a0] ss:$16 sps:$4 sm:$0xff]   ;;  %v13398_v44 = vld [vmem:[#allocation10 + $0x1a8] ss:$16 sps:$4 sm:$0xff]  }
 0x572   :  { %7810 = vmatprep.subr.bf16.mxu1 %v11570_v45  ;;  %v13403_v45 = vld [vmem:[#allocation10 + $0x1c4] ss:$16 sps:$4 sm:$0xff]  }
 0x574   :  { %7729 = vmatpush1.bf16.msra.mxu0 %v11567_v51  ;;  %v13406_v51 = vld [vmem:[#allocation10 + $0x1cc] ss:$16 sps:$4 sm:$0xff]  }
 0x575   :  { %7811 = vmatpush1.bf16.msra.mxu1 %v11569_v52  ;;  %9395 = vmatprep.subr.bf16.mxu0 %v13319_v53  ;;  %v13401_v52 = vld [vmem:[#allocation10 + $0x1c0] ss:$16 sps:$4 sm:$0xff]   ;;  %v13404_v53 = vld [vmem:[#allocation10 + $0x1c8] ss:$16 sps:$4 sm:$0xff]  }
 0x576   :  { %9559 = vmatprep.subr.bf16.mxu1 %v13322_v54  ;;  %v13409_v54 = vld [vmem:[#allocation10 + $0x1e4] ss:$16 sps:$4 sm:$0xff]  }
 0x577   :  { %7731 = vmatmul.mubr.bf16.vlgmr.msra.gmra.mrb[8].mxu0 %v14514_v32 }
 0x578   :  { %7813 = vmatmul.mubr.bf16.vlgmr.msra.gmra.mrb[8].mxu1 %v14514_v32  ;;  %9396 = vmatpush1.bf16.msra.mxu0 %v13317_v56  ;;  %v13338_v32 = vld [vmem:[#allocation10 + $0x68] ss:$16 sps:$4 sm:$0xff]   ;;  %v13412_v56 = vld [vmem:[#allocation10 + $0x1ec] ss:$16 sps:$4 sm:$0xff]  }
 0x579   :  { %9560 = vmatpush1.bf16.msra.mxu1 %v13320_v28  ;;  %9397 = vmatprep.subr.bf16.mxu0 %v13325_v7  ;;  %v13407_v28 = vld [vmem:[#allocation10 + $0x1e0] ss:$16 sps:$4 sm:$0xff]   ;;  %v13410_v7 = vld [vmem:[#allocation10 + $0x1e8] ss:$16 sps:$4 sm:$0xff]  }
 0x57a   :  { %9561 = vmatprep.subr.bf16.mxu1 %v13328_v58  ;;  %v13415_v58 = vld [vmem:[#allocation10 + $0x204] ss:$16 sps:$4 sm:$0xff]  }
 0x57c   :  { %9398 = vmatpush1.bf16.msra.mxu0 %v13323_v59  ;;  %v13418_v59 = vld [vmem:[#allocation10 + $0x20c] ss:$16 sps:$4 sm:$0xff]  }
 0x57d   :  { %9562 = vmatpush1.bf16.msra.mxu1 %v13326_v60  ;;  %9399 = vmatprep.subr.bf16.mxu0 %v13331_v61  ;;  %v14526_v60 = vld [vmem:[#allocation8] sm:$0xff] }
 0x57e   :  { %9563 = vmatprep.subr.bf16.mxu1 %v13334_v62  ;;  %v6176_v61 = vrot.slane %v14526_v60, %v14478_v47  ;;  %v6180_v62 = vrot.slane %v14526_v60, %v14483_v49 }
 0x580   :  { %9400 = vmatpush1.bf16.msra.mxu0 %v13329_v63  ;;  %v6188_v63 = vrot.slane %v14526_v60, %v14486_v50 }
 0x581   :  { %9564 = vmatpush1.bf16.msra.mxu1 %v13332_v0  ;;  %9401 = vmatprep.subr.bf16.mxu0 %v13337_v1 }
 0x582   :  { %9565 = vmatprep.subr.bf16.mxu1 %v13340_v2 }
 0x584   :  { %9402 = vmatpush1.bf16.msra.mxu0 %v13335_v3 }
 0x585   :  { %9566 = vmatpush1.bf16.msra.mxu1 %v13338_v32  ;;  %9403 = vmatprep.subr.bf16.mxu0 %v13343_v8 }
 0x586   :  { %9567 = vmatprep.subr.bf16.mxu1 %v13346_v4 }
 0x588   :  { %9404 = vmatpush1.bf16.msra.mxu0 %v13341_v5 }
 0x589   :  { %9568 = vmatpush1.bf16.msra.mxu1 %v13344_v6  ;;  %9405 = vmatprep.subr.bf16.mxu0 %v13349_v9 }
 0x58a   :  { %9569 = vmatprep.subr.bf16.mxu1 %v13352_v10 }
 0x58c   :  { %9406 = vmatpush1.bf16.msra.mxu0 %v13347_v12 }
 0x58d   :  { %9570 = vmatpush1.bf16.msra.mxu1 %v13350_v18  ;;  %9407 = vmatprep.subr.bf16.mxu0 %v13355_v13 }
 0x58e   :  { %9571 = vmatprep.subr.bf16.mxu1 %v13358_v15 }
 0x590   :  { %9408 = vmatpush1.bf16.msra.mxu0 %v13353_v16  ;;  %v13413_v16 = vld [vmem:[#allocation10 + $0x200] ss:$16 sps:$4 sm:$0xff]  }
 0x591   :  { %9572 = vmatpush1.bf16.msra.mxu1 %v13356_v11  ;;  %9409 = vmatprep.subr.bf16.mxu0 %v13361_v20  ;;  %v13416_v11 = vld [vmem:[#allocation10 + $0x208] ss:$16 sps:$4 sm:$0xff]  }
 0x592   :  { %9573 = vmatprep.subr.bf16.mxu1 %v13364_v48  ;;  %v13421_v48 = vld [vmem:[#allocation10 + $0x224] ss:$16 sps:$4 sm:$0xff]  }
 0x594   :  { %9410 = vmatpush1.bf16.msra.mxu0 %v13359_v14  ;;  %v13424_v14 = vld [vmem:[#allocation10 + $0x22c] ss:$16 sps:$4 sm:$0xff]  }
 0x595   :  { %9574 = vmatpush1.bf16.msra.mxu1 %v13362_v22  ;;  %9411 = vmatprep.subr.bf16.mxu0 %v13367_v23  ;;  %v13419_v23 = vld [vmem:[#allocation10 + $0x220] ss:$16 sps:$4 sm:$0xff]  }
 0x596   :  { %9575 = vmatprep.subr.bf16.mxu1 %v13370_v24  ;;  %v13422_v24 = vld [vmem:[#allocation10 + $0x228] ss:$16 sps:$4 sm:$0xff]  }
 0x598   :  { %9412 = vmatpush1.bf16.msra.mxu0 %v13365_v17  ;;  %v13427_v17 = vld [vmem:[#allocation10 + $0x244] ss:$16 sps:$4 sm:$0xff]  }
 0x599   :  { %9576 = vmatpush1.bf16.msra.mxu1 %v13368_v26  ;;  %9413 = vmatprep.subr.bf16.mxu0 %v13373_v27  ;;  %v13430_v26 = vld [vmem:[#allocation10 + $0x24c] ss:$16 sps:$4 sm:$0xff]   ;;  %v13425_v27 = vld [vmem:[#allocation10 + $0x240] ss:$16 sps:$4 sm:$0xff]  }
 0x59a   :  { %9577 = vmatprep.subr.bf16.mxu1 %v13376_v19  ;;  %v13428_v19 = vld [vmem:[#allocation10 + $0x248] ss:$16 sps:$4 sm:$0xff]  }
 0x59c   :  { %9414 = vmatpush1.bf16.msra.mxu0 %v13371_v29  ;;  %v13433_v29 = vld [vmem:[#allocation10 + $0x264] ss:$16 sps:$4 sm:$0xff]  }
 0x59d   :  { %9578 = vmatpush1.bf16.msra.mxu1 %v13374_v55  ;;  %9415 = vmatprep.subr.bf16.mxu0 %v13379_v30  ;;  %v13436_v55 = vld [vmem:[#allocation10 + $0x26c] ss:$16 sps:$4 sm:$0xff]   ;;  %v13431_v30 = vld [vmem:[#allocation10 + $0x260] ss:$16 sps:$4 sm:$0xff]  }
 0x59e   :  { %9579 = vmatprep.subr.bf16.mxu1 %v13382_v21  ;;  %v13434_v21 = vld [vmem:[#allocation10 + $0x268] ss:$16 sps:$4 sm:$0xff]  }
 0x5a0   :  { %9416 = vmatpush1.bf16.msra.mxu0 %v13377_v33  ;;  %v13439_v33 = vld [vmem:[#allocation10 + $0x284] ss:$16 sps:$4 sm:$0xff]  }
 0x5a1   :  { %9580 = vmatpush1.bf16.msra.mxu1 %v13380_v34  ;;  %9417 = vmatprep.subr.bf16.mxu0 %v13385_v35  ;;  %v13442_v34 = vld [vmem:[#allocation10 + $0x28c] ss:$16 sps:$4 sm:$0xff]   ;;  %v13437_v35 = vld [vmem:[#allocation10 + $0x280] ss:$16 sps:$4 sm:$0xff]  }
 0x5a2   :  { %9581 = vmatprep.subr.bf16.mxu1 %v13388_v36  ;;  %v13440_v36 = vld [vmem:[#allocation10 + $0x288] ss:$16 sps:$4 sm:$0xff]  }
 0x5a4   :  { %9418 = vmatpush1.bf16.msra.mxu0 %v13383_v37  ;;  %v13445_v37 = vld [vmem:[#allocation10 + $0x2a4] ss:$16 sps:$4 sm:$0xff]  }
 0x5a5   :  { %9582 = vmatpush1.bf16.msra.mxu1 %v13386_v38  ;;  %9419 = vmatprep.subr.bf16.mxu0 %v13391_v31  ;;  %v13448_v38 = vld [vmem:[#allocation10 + $0x2ac] ss:$16 sps:$4 sm:$0xff]   ;;  %v13443_v31 = vld [vmem:[#allocation10 + $0x2a0] ss:$16 sps:$4 sm:$0xff]  }
 0x5a6   :  { %9583 = vmatprep.subr.bf16.mxu1 %v13394_v39  ;;  %v13446_v39 = vld [vmem:[#allocation10 + $0x2a8] ss:$16 sps:$4 sm:$0xff]  }
 0x5a8   :  { %9420 = vmatpush1.bf16.msra.mxu0 %v13389_v40  ;;  %v13451_v40 = vld [vmem:[#allocation10 + $0x2c4] ss:$16 sps:$4 sm:$0xff]  }
 0x5a9   :  { %9584 = vmatpush1.bf16.msra.mxu1 %v13392_v41  ;;  %9421 = vmatprep.subr.bf16.mxu0 %v13397_v25  ;;  %v13454_v41 = vld [vmem:[#allocation10 + $0x2cc] ss:$16 sps:$4 sm:$0xff]   ;;  %v13449_v25 = vld [vmem:[#allocation10 + $0x2c0] ss:$16 sps:$4 sm:$0xff]  }
 0x5aa   :  { %9585 = vmatprep.subr.bf16.mxu1 %v13400_v42  ;;  %v13452_v42 = vld [vmem:[#allocation10 + $0x2c8] ss:$16 sps:$4 sm:$0xff]  }
 0x5ac   :  { %9422 = vmatpush1.bf16.msra.mxu0 %v13395_v43  ;;  %v13457_v43 = vld [vmem:[#allocation10 + $0x2e4] ss:$16 sps:$4 sm:$0xff]  }
 0x5ad   :  { %9586 = vmatpush1.bf16.msra.mxu1 %v13398_v44  ;;  %9423 = vmatprep.subr.bf16.mxu0 %v13403_v45  ;;  %v13460_v44 = vld [vmem:[#allocation10 + $0x2ec] ss:$16 sps:$4 sm:$0xff]   ;;  %v13455_v45 = vld [vmem:[#allocation10 + $0x2e0] ss:$16 sps:$4 sm:$0xff]  }
 0x5ae   :  { %9587 = vmatprep.subr.bf16.mxu1 %v13406_v51  ;;  %v13458_v51 = vld [vmem:[#allocation10 + $0x2e8] ss:$16 sps:$4 sm:$0xff]  }
 0x5b0   :  { %9424 = vmatpush1.bf16.msra.mxu0 %v13401_v52  ;;  %v13463_v52 = vld [vmem:[#allocation10 + $0x304] ss:$16 sps:$4 sm:$0xff]  }
 0x5b1   :  { %9588 = vmatpush1.bf16.msra.mxu1 %v13404_v53  ;;  %9425 = vmatprep.subr.bf16.mxu0 %v13409_v54  ;;  %v13466_v53 = vld [vmem:[#allocation10 + $0x30c] ss:$16 sps:$4 sm:$0xff]   ;;  %v13461_v54 = vld [vmem:[#allocation10 + $0x300] ss:$16 sps:$4 sm:$0xff]  }
 0x5b2   :  { %9589 = vmatprep.subr.bf16.mxu1 %v13412_v56  ;;  %v13464_v56 = vld [vmem:[#allocation10 + $0x308] ss:$16 sps:$4 sm:$0xff]  }
 0x5b4   :  { %9426 = vmatpush1.bf16.msra.mxu0 %v13407_v28  ;;  %v13469_v28 = vld [vmem:[#allocation10 + $0x324] ss:$16 sps:$4 sm:$0xff]  }
 0x5b5   :  { %9590 = vmatpush1.bf16.msra.mxu1 %v13410_v7  ;;  %9436 = vmatprep.subr.bf16.mxu0 %v13415_v58  ;;  %v13472_v7 = vld [vmem:[#allocation10 + $0x32c] ss:$16 sps:$4 sm:$0xff]   ;;  %v13467_v58 = vld [vmem:[#allocation10 + $0x320] ss:$16 sps:$4 sm:$0xff]  }
 0x5b6   :  { %9600 = vmatprep.subr.bf16.mxu1 %v13418_v59  ;;  %v13470_v59 = vld [vmem:[#allocation10 + $0x328] ss:$16 sps:$4 sm:$0xff]  }
 0x5ca   :  { %v7568_v0 = vpop.f32.mrb[4].mxu0  ;;  %v14534_v1 = vpop.f32.mrb[4].mxu1 }
 0x5cb   :  { %v11972_v2 = vadd.f32 %v7568_v0, %v6176_v61  ;;  %v7570_v3 = vpop.f32.mrb[5].mxu0  ;;  %v7652_v32 = vpop.f32.mrb[5].mxu1  ;;  %v13475_v61 = vld [vmem:[#allocation10 + $0x344] ss:$16 sps:$4 sm:$0xff]   ;;  %v13476_v0 = vld [vmem:[#allocation10 + $0x348] ss:$16 sps:$4 sm:$0xff]  }
 0x5cc   :  { %v11973_v8 = vadd.f32 %v7570_v3, %v6180_v62  ;;  %v11975_v4 = vadd.f32 %v7652_v32, %v6188_v63  ;;  %v7572_v5 = vpop.f32.mrb[6].mxu0  ;;  %v7654_v6 = vpop.f32.mrb[6].mxu1  ;;  %v13478_v62 = vld [vmem:[#allocation10 + $0x34c] ss:$16 sps:$4 sm:$0xff]   ;;  %v13473_v63 = vld [vmem:[#allocation10 + $0x340] ss:$16 sps:$4 sm:$0xff]  }
 0x5cd   :  { %v7821_v9 = vmax.f32 %v11972_v2, 0.0  ;;  %v7573_v10 = vpop.f32.mrb[7].mxu0  ;;  %v7655_v12 = vpop.f32.mrb[7].mxu1  ;;  %v13481_v2 = vld [vmem:[#allocation10 + $0x364] ss:$16 sps:$4 sm:$0xff]  }
 0x5ce   :  { %v7822_v18 = vmax.f32 %v11973_v8, 0.0  ;;  %v7824_v13 = vmax.f32 %v11975_v4, 0.0  ;;  %v13484_v3 = vld [vmem:[#allocation10 + $0x36c] ss:$16 sps:$4 sm:$0xff]   ;;  %v13479_v32 = vld [vmem:[#allocation10 + $0x360] ss:$16 sps:$4 sm:$0xff]  }
 0x5cf   :  { %v7829_v20 = vpack.c.bf16 %v7821_v9, %v7821_v9  ;;  %v13482_v8 = vld [vmem:[#allocation10 + $0x368] ss:$16 sps:$4 sm:$0xff]   ;;  %v13487_v4 = vld [vmem:[#allocation10 + $0x384] ss:$16 sps:$4 sm:$0xff]   ;;  %v13490_v5 = vld [vmem:[#allocation10 + $0x38c] ss:$16 sps:$4 sm:$0xff]  }
 0x5d0   :  { %v7830_v15 = vpack.c.bf16 %v7822_v18, %v7822_v18  ;;  %v7832_v22 = vpack.c.bf16 %v7824_v13, %v7824_v13  ;;  %v13485_v6 = vld [vmem:[#allocation10 + $0x380] ss:$16 sps:$4 sm:$0xff]   ;;  %v13488_v9 = vld [vmem:[#allocation10 + $0x388] ss:$16 sps:$4 sm:$0xff]   ;;  %v13493_v10 = vld [vmem:[#allocation10 + $0x3a4] ss:$16 sps:$4 sm:$0xff]  }
 0x5d1   :  { %v13496_v12 = vld [vmem:[#allocation10 + $0x3ac] ss:$16 sps:$4 sm:$0xff]   ;;  %v13491_v18 = vld [vmem:[#allocation10 + $0x3a0] ss:$16 sps:$4 sm:$0xff]   ;;  %v13494_v13 = vld [vmem:[#allocation10 + $0x3a8] ss:$16 sps:$4 sm:$0xff]  }
 0x5d2   :  { %9427 = vmatprep.mubr.bf16.mxu0 %v7830_v15  ;;  %9591 = vmatprep.mubr.bf16.mxu1 %v7830_v15  ;;  %v6184_v15 = vrot.slane %v14526_v60, %v14509_v57 }
 0x5d3   :  { %9428 = vmatmul.mubr.bf16.vlgmr.msra.gmra.mrb[12].mxu0 %v7829_v20  ;;  %9592 = vmatmul.mubr.bf16.vlgmr.msra.gmra.mrb[12].mxu1 %v7829_v20  ;;  %v13497_v20 = vld [vmem:[#allocation10 + $0x3c0] ss:$16 sps:$4 sm:$0xff]  }
 0x5d4   :  { %9437 = vmatpush1.bf16.msra.mxu0 %v13413_v16  ;;  %9601 = vmatpush1.bf16.msra.mxu1 %v13416_v11  ;;  %v13499_v16 = vld [vmem:[#allocation10 + $0x3c4] ss:$16 sps:$4 sm:$0xff]   ;;  %v13502_v11 = vld [vmem:[#allocation10 + $0x3cc] ss:$16 sps:$4 sm:$0xff]  }
 0x5d5   :  { %9468 = vmatprep.mubr.bf16.mxu0 %v7832_v22  ;;  %9632 = vmatprep.mubr.bf16.mxu1 %v7832_v22  ;;  %v13505_v22 = vld [vmem:[#allocation10 + $0x3e4] ss:$16 sps:$4 sm:$0xff]  }
 0x5d6   :  { %9438 = vmatprep.subr.bf16.mxu0 %v13421_v48  ;;  %9602 = vmatprep.subr.bf16.mxu1 %v13424_v14  ;;  %v13500_v48 = vld [vmem:[#allocation10 + $0x3c8] ss:$16 sps:$4 sm:$0xff]   ;;  %v11974_v14 = vadd.f32 %v14534_v1, %v6184_v15  ;;  %v13517_v1 = vld [vmem:[#allocation10 + $0x424] ss:$16 sps:$4 sm:$0xff]   ;;  %v13575_v15 = vld [vmem:[#allocation10 + $0x560] ss:$16 sps:$4 sm:$0xff]  }
 0x5d8   :  { %9439 = vmatpush1.bf16.msra.mxu0 %v13419_v23  ;;  %9603 = vmatpush1.bf16.msra.mxu1 %v13422_v24  ;;  %v13508_v23 = vld [vmem:[#allocation10 + $0x3ec] ss:$16 sps:$4 sm:$0xff]   ;;  %v13503_v24 = vld [vmem:[#allocation10 + $0x3e0] ss:$16 sps:$4 sm:$0xff]  }
 0x5d9   :  { %9440 = vmatprep.subr.bf16.mxu0 %v13427_v17  ;;  %9604 = vmatprep.subr.bf16.mxu1 %v13430_v26  ;;  %v13506_v17 = vld [vmem:[#allocation10 + $0x3e8] ss:$16 sps:$4 sm:$0xff]   ;;  %v7823_v26 = vmax.f32 %v11974_v14, 0.0 }
 0x5da   :  { %v13584_v14 = vld [vmem:[#allocation10 + $0x588] ss:$16 sps:$4 sm:$0xff]  }
 0x5dc   :  { %9441 = vmatpush1.bf16.msra.mxu0 %v13425_v27  ;;  %9605 = vmatpush1.bf16.msra.mxu1 %v13428_v19  ;;  %v13511_v27 = vld [vmem:[#allocation10 + $0x404] ss:$16 sps:$4 sm:$0xff]   ;;  %v13514_v19 = vld [vmem:[#allocation10 + $0x40c] ss:$16 sps:$4 sm:$0xff]  }
 0x5dd   :  { %9442 = vmatprep.subr.bf16.mxu0 %v13433_v29  ;;  %9606 = vmatprep.subr.bf16.mxu1 %v13436_v55  ;;  %v13509_v29 = vld [vmem:[#allocation10 + $0x400] ss:$16 sps:$4 sm:$0xff]   ;;  %v13512_v55 = vld [vmem:[#allocation10 + $0x408] ss:$16 sps:$4 sm:$0xff]  }
 0x5e0   :  { %9443 = vmatpush1.bf16.msra.mxu0 %v13431_v30  ;;  %9607 = vmatpush1.bf16.msra.mxu1 %v13434_v21  ;;  %v7831_v30 = vpack.c.bf16 %v7823_v26, %v7823_v26  ;;  %v13520_v21 = vld [vmem:[#allocation10 + $0x42c] ss:$16 sps:$4 sm:$0xff]   ;;  %v13590_v26 = vld [vmem:[#allocation10 + $0x5a8] ss:$16 sps:$4 sm:$0xff]  }
 0x5e1   :  { %9444 = vmatprep.subr.bf16.mxu0 %v13439_v33  ;;  %9608 = vmatprep.subr.bf16.mxu1 %v13442_v34  ;;  %v13515_v33 = vld [vmem:[#allocation10 + $0x420] ss:$16 sps:$4 sm:$0xff]   ;;  %v13518_v34 = vld [vmem:[#allocation10 + $0x428] ss:$16 sps:$4 sm:$0xff]  }
 0x5e4   :  { %9445 = vmatpush1.bf16.msra.mxu0 %v13437_v35  ;;  %9609 = vmatpush1.bf16.msra.mxu1 %v13440_v36  ;;  %v13523_v35 = vld [vmem:[#allocation10 + $0x444] ss:$16 sps:$4 sm:$0xff]   ;;  %v13526_v36 = vld [vmem:[#allocation10 + $0x44c] ss:$16 sps:$4 sm:$0xff]  }
 0x5e5   :  { %9446 = vmatprep.subr.bf16.mxu0 %v13445_v37  ;;  %9610 = vmatprep.subr.bf16.mxu1 %v13448_v38  ;;  %v13521_v37 = vld [vmem:[#allocation10 + $0x440] ss:$16 sps:$4 sm:$0xff]   ;;  %v13524_v38 = vld [vmem:[#allocation10 + $0x448] ss:$16 sps:$4 sm:$0xff]  }
 0x5e8   :  { %9447 = vmatpush1.bf16.msra.mxu0 %v13443_v31  ;;  %9611 = vmatpush1.bf16.msra.mxu1 %v13446_v39  ;;  %v13529_v31 = vld [vmem:[#allocation10 + $0x464] ss:$16 sps:$4 sm:$0xff]   ;;  %v13532_v39 = vld [vmem:[#allocation10 + $0x46c] ss:$16 sps:$4 sm:$0xff]  }
 0x5e9   :  { %9448 = vmatprep.subr.bf16.mxu0 %v13451_v40  ;;  %9612 = vmatprep.subr.bf16.mxu1 %v13454_v41  ;;  %v13527_v40 = vld [vmem:[#allocation10 + $0x460] ss:$16 sps:$4 sm:$0xff]   ;;  %v13530_v41 = vld [vmem:[#allocation10 + $0x468] ss:$16 sps:$4 sm:$0xff]  }
 0x5ec   :  { %9449 = vmatpush1.bf16.msra.mxu0 %v13449_v25  ;;  %9613 = vmatpush1.bf16.msra.mxu1 %v13452_v42  ;;  %v13535_v25 = vld [vmem:[#allocation10 + $0x484] ss:$16 sps:$4 sm:$0xff]   ;;  %v13538_v42 = vld [vmem:[#allocation10 + $0x48c] ss:$16 sps:$4 sm:$0xff]  }
 0x5ed   :  { %9450 = vmatprep.subr.bf16.mxu0 %v13457_v43  ;;  %9614 = vmatprep.subr.bf16.mxu1 %v13460_v44  ;;  %v13533_v43 = vld [vmem:[#allocation10 + $0x480] ss:$16 sps:$4 sm:$0xff]   ;;  %v13536_v44 = vld [vmem:[#allocation10 + $0x488] ss:$16 sps:$4 sm:$0xff]  }
 0x5f0   :  { %9451 = vmatpush1.bf16.msra.mxu0 %v13455_v45  ;;  %9615 = vmatpush1.bf16.msra.mxu1 %v13458_v51  ;;  %v13541_v45 = vld [vmem:[#allocation10 + $0x4a4] ss:$16 sps:$4 sm:$0xff]   ;;  %v13544_v51 = vld [vmem:[#allocation10 + $0x4ac] ss:$16 sps:$4 sm:$0xff]  }
 0x5f1   :  { %9452 = vmatprep.subr.bf16.mxu0 %v13463_v52  ;;  %9616 = vmatprep.subr.bf16.mxu1 %v13466_v53  ;;  %v13539_v52 = vld [vmem:[#allocation10 + $0x4a0] ss:$16 sps:$4 sm:$0xff]   ;;  %v13542_v53 = vld [vmem:[#allocation10 + $0x4a8] ss:$16 sps:$4 sm:$0xff]  }
 0x5f4   :  { %9453 = vmatpush1.bf16.msra.mxu0 %v13461_v54  ;;  %9617 = vmatpush1.bf16.msra.mxu1 %v13464_v56  ;;  %v13547_v54 = vld [vmem:[#allocation10 + $0x4c4] ss:$16 sps:$4 sm:$0xff]   ;;  %v13550_v56 = vld [vmem:[#allocation10 + $0x4cc] ss:$16 sps:$4 sm:$0xff]  }
 0x5f5   :  { %9454 = vmatprep.subr.bf16.mxu0 %v13469_v28  ;;  %9618 = vmatprep.subr.bf16.mxu1 %v13472_v7  ;;  %v13545_v28 = vld [vmem:[#allocation10 + $0x4c0] ss:$16 sps:$4 sm:$0xff]   ;;  %v13548_v7 = vld [vmem:[#allocation10 + $0x4c8] ss:$16 sps:$4 sm:$0xff]  }
 0x5f8   :  { %9455 = vmatpush1.bf16.msra.mxu0 %v13467_v58  ;;  %9619 = vmatpush1.bf16.msra.mxu1 %v13470_v59  ;;  %v13553_v58 = vld [vmem:[#allocation10 + $0x4e4] ss:$16 sps:$4 sm:$0xff]   ;;  %v13556_v59 = vld [vmem:[#allocation10 + $0x4ec] ss:$16 sps:$4 sm:$0xff]  }
 0x5f9   :  { %9456 = vmatprep.subr.bf16.mxu0 %v13475_v61  ;;  %9620 = vmatprep.subr.bf16.mxu1 %v13478_v62  ;;  %v13551_v61 = vld [vmem:[#allocation10 + $0x4e0] ss:$16 sps:$4 sm:$0xff]   ;;  %v13554_v62 = vld [vmem:[#allocation10 + $0x4e8] ss:$16 sps:$4 sm:$0xff]  }
 0x5fc   :  { %9457 = vmatpush1.bf16.msra.mxu0 %v13473_v63  ;;  %9621 = vmatpush1.bf16.msra.mxu1 %v13476_v0  ;;  %v13559_v63 = vld [vmem:[#allocation10 + $0x504] ss:$16 sps:$4 sm:$0xff]   ;;  %v13562_v0 = vld [vmem:[#allocation10 + $0x50c] ss:$16 sps:$4 sm:$0xff]  }
 0x5fd   :  { %9458 = vmatprep.subr.bf16.mxu0 %v13481_v2  ;;  %9622 = vmatprep.subr.bf16.mxu1 %v13484_v3  ;;  %v13557_v2 = vld [vmem:[#allocation10 + $0x500] ss:$16 sps:$4 sm:$0xff]   ;;  %v13560_v3 = vld [vmem:[#allocation10 + $0x508] ss:$16 sps:$4 sm:$0xff]  }
 0x600   :  { %9459 = vmatpush1.bf16.msra.mxu0 %v13479_v32  ;;  %9623 = vmatpush1.bf16.msra.mxu1 %v13482_v8  ;;  %v13565_v32 = vld [vmem:[#allocation10 + $0x524] ss:$16 sps:$4 sm:$0xff]   ;;  %v13568_v8 = vld [vmem:[#allocation10 + $0x52c] ss:$16 sps:$4 sm:$0xff]  }
 0x601   :  { %9460 = vmatprep.subr.bf16.mxu0 %v13487_v4  ;;  %9624 = vmatprep.subr.bf16.mxu1 %v13490_v5  ;;  %v13563_v4 = vld [vmem:[#allocation10 + $0x520] ss:$16 sps:$4 sm:$0xff]   ;;  %v13566_v5 = vld [vmem:[#allocation10 + $0x528] ss:$16 sps:$4 sm:$0xff]  }
 0x604   :  { %9461 = vmatpush1.bf16.msra.mxu0 %v13485_v6  ;;  %9625 = vmatpush1.bf16.msra.mxu1 %v13488_v9  ;;  %v13571_v6 = vld [vmem:[#allocation10 + $0x544] ss:$16 sps:$4 sm:$0xff]   ;;  %v13574_v9 = vld [vmem:[#allocation10 + $0x54c] ss:$16 sps:$4 sm:$0xff]  }
 0x605   :  { %9462 = vmatprep.subr.bf16.mxu0 %v13493_v10  ;;  %9626 = vmatprep.subr.bf16.mxu1 %v13496_v12  ;;  %v13569_v10 = vld [vmem:[#allocation10 + $0x540] ss:$16 sps:$4 sm:$0xff]   ;;  %v13572_v12 = vld [vmem:[#allocation10 + $0x548] ss:$16 sps:$4 sm:$0xff]  }
 0x608   :  { %9463 = vmatpush1.bf16.msra.mxu0 %v13491_v18  ;;  %9627 = vmatpush1.bf16.msra.mxu1 %v13494_v13  ;;  %v13577_v18 = vld [vmem:[#allocation10 + $0x564] ss:$16 sps:$4 sm:$0xff]   ;;  %v13580_v13 = vld [vmem:[#allocation10 + $0x56c] ss:$16 sps:$4 sm:$0xff]  }
 0x609   :  { %9464 = vmatprep.subr.bf16.mxu0 %v13499_v16  ;;  %9628 = vmatprep.subr.bf16.mxu1 %v13502_v11  ;;  %v13578_v16 = vld [vmem:[#allocation10 + $0x568] ss:$16 sps:$4 sm:$0xff]   ;;  %v13583_v11 = vld [vmem:[#allocation10 + $0x584] ss:$16 sps:$4 sm:$0xff]  }
 0x60c   :  { %9465 = vmatpush1.bf16.msra.mxu0 %v13497_v20  ;;  %9629 = vmatpush1.bf16.msra.mxu1 %v13500_v48  ;;  %v13586_v20 = vld [vmem:[#allocation10 + $0x58c] ss:$16 sps:$4 sm:$0xff]   ;;  %v13581_v48 = vld [vmem:[#allocation10 + $0x580] ss:$16 sps:$4 sm:$0xff]  }
 0x60d   :  { %9466 = vmatprep.subr.bf16.mxu0 %v13505_v22  ;;  %9630 = vmatprep.subr.bf16.mxu1 %v13508_v23  ;;  %v13589_v22 = vld [vmem:[#allocation10 + $0x5a4] ss:$16 sps:$4 sm:$0xff]   ;;  %v13592_v23 = vld [vmem:[#allocation10 + $0x5ac] ss:$16 sps:$4 sm:$0xff]  }
 0x610   :  { %9467 = vmatpush1.bf16.msra.mxu0 %v13503_v24  ;;  %9631 = vmatpush1.bf16.msra.mxu1 %v13506_v17  ;;  %v6191_v24 = vsub.s32 4, %v14475_v46  ;;  %v13587_v17 = vld [vmem:[#allocation10 + $0x5a0] ss:$16 sps:$4 sm:$0xff]  }
 0x611   :  { %9477 = vmatprep.subr.bf16.mxu0 %v13511_v27  ;;  %9641 = vmatprep.subr.bf16.mxu1 %v13514_v19  ;;  %v6195_v27 = vsub.s32 5, %v14475_v46  ;;  %v13595_v19 = vld [vmem:[#allocation10 + $0x5c4] ss:$16 sps:$4 sm:$0xff]  }
 0x613   :  { %9469 = vmatmul.mubr.bf16.vlgmr.msra.gmra.mrb[12].mxu0 %v7831_v30  ;;  %9633 = vmatmul.mubr.bf16.vlgmr.msra.gmra.mrb[12].mxu1 %v7831_v30  ;;  %v6192_v30 = vrot.slane %v14526_v60, %v6191_v24  ;;  %v13646_v24 = vld [vmem:[#allocation10 + $0x6cc] ss:$16 sps:$4 sm:$0xff]  }
 0x614   :  { %9478 = vmatpush1.bf16.msra.mxu0 %v13509_v29  ;;  %9642 = vmatpush1.bf16.msra.mxu1 %v13512_v55  ;;  %v13598_v29 = vld [vmem:[#allocation10 + $0x5cc] ss:$16 sps:$4 sm:$0xff]   ;;  %v6203_v55 = vsub.s32 7, %v14475_v46 }
 0x615   :  { %9479 = vmatprep.subr.bf16.mxu0 %v13517_v1  ;;  %9643 = vmatprep.subr.bf16.mxu1 %v13520_v21  ;;  %v13593_v1 = vld [vmem:[#allocation10 + $0x5c0] ss:$16 sps:$4 sm:$0xff]   ;;  %v13596_v21 = vld [vmem:[#allocation10 + $0x5c8] ss:$16 sps:$4 sm:$0xff]  }
 0x618   :  { %9480 = vmatpush1.bf16.msra.mxu0 %v13515_v33  ;;  %9644 = vmatpush1.bf16.msra.mxu1 %v13518_v34  ;;  %v6196_v33 = vrot.slane %v14526_v60, %v6195_v27  ;;  %v6204_v34 = vrot.slane %v14526_v60, %v6203_v55  ;;  %v13649_v27 = vld [vmem:[#allocation10 + $0x6e4] ss:$16 sps:$4 sm:$0xff]   ;;  %v13650_v55 = vld [vmem:[#allocation10 + $0x6e8] ss:$16 sps:$4 sm:$0xff]  }
 0x619   :  { %9481 = vmatprep.subr.bf16.mxu0 %v13523_v35  ;;  %9645 = vmatprep.subr.bf16.mxu1 %v13526_v36  ;;  %v13601_v35 = vld [vmem:[#allocation10 + $0x5e4] ss:$16 sps:$4 sm:$0xff]   ;;  %v13604_v36 = vld [vmem:[#allocation10 + $0x5ec] ss:$16 sps:$4 sm:$0xff]  }
 0x61c   :  { %9482 = vmatpush1.bf16.msra.mxu0 %v13521_v37  ;;  %9646 = vmatpush1.bf16.msra.mxu1 %v13524_v38 }
 0x61d   :  { %9483 = vmatprep.subr.bf16.mxu0 %v13529_v31  ;;  %9647 = vmatprep.subr.bf16.mxu1 %v13532_v39 }
 0x620   :  { %9484 = vmatpush1.bf16.msra.mxu0 %v13527_v40  ;;  %9648 = vmatpush1.bf16.msra.mxu1 %v13530_v41  ;;  %v13599_v40 = vld [vmem:[#allocation10 + $0x5e0] ss:$16 sps:$4 sm:$0xff]  }
 0x621   :  { %9485 = vmatprep.subr.bf16.mxu0 %v13535_v25  ;;  %9649 = vmatprep.subr.bf16.mxu1 %v13538_v42 }
 0x624   :  { %9486 = vmatpush1.bf16.msra.mxu0 %v13533_v43  ;;  %9650 = vmatpush1.bf16.msra.mxu1 %v13536_v44  ;;  %v13602_v43 = vld [vmem:[#allocation10 + $0x5e8] ss:$16 sps:$4 sm:$0xff]   ;;  %v13607_v44 = vld [vmem:[#allocation10 + $0x604] ss:$16 sps:$4 sm:$0xff]  }
 0x625   :  { %9487 = vmatprep.subr.bf16.mxu0 %v13541_v45  ;;  %9651 = vmatprep.subr.bf16.mxu1 %v13544_v51 }
 0x628   :  { %9488 = vmatpush1.bf16.msra.mxu0 %v13539_v52  ;;  %9652 = vmatpush1.bf16.msra.mxu1 %v13542_v53 }
 0x629   :  { %9489 = vmatprep.subr.bf16.mxu0 %v13547_v54  ;;  %9653 = vmatprep.subr.bf16.mxu1 %v13550_v56  ;;  %v13610_v54 = vld [vmem:[#allocation10 + $0x60c] ss:$16 sps:$4 sm:$0xff]  }
 0x62c   :  { %9490 = vmatpush1.bf16.msra.mxu0 %v13545_v28  ;;  %9654 = vmatpush1.bf16.msra.mxu1 %v13548_v7 }
 0x62d   :  { %9491 = vmatprep.subr.bf16.mxu0 %v13553_v58  ;;  %9655 = vmatprep.subr.bf16.mxu1 %v13556_v59  ;;  %v13605_v59 = vld [vmem:[#allocation10 + $0x600] ss:$16 sps:$4 sm:$0xff]  }
 0x630   :  { %9492 = vmatpush1.bf16.msra.mxu0 %v13551_v61  ;;  %9656 = vmatpush1.bf16.msra.mxu1 %v13554_v62  ;;  %v13608_v61 = vld [vmem:[#allocation10 + $0x608] ss:$16 sps:$4 sm:$0xff]  }
 0x631   :  { %9493 = vmatprep.subr.bf16.mxu0 %v13559_v63  ;;  %9657 = vmatprep.subr.bf16.mxu1 %v13562_v0  ;;  %v13613_v63 = vld [vmem:[#allocation10 + $0x624] ss:$16 sps:$4 sm:$0xff]   ;;  %v13616_v0 = vld [vmem:[#allocation10 + $0x62c] ss:$16 sps:$4 sm:$0xff]  }
 0x634   :  { %9494 = vmatpush1.bf16.msra.mxu0 %v13557_v2  ;;  %9658 = vmatpush1.bf16.msra.mxu1 %v13560_v3  ;;  %v13611_v3 = vld [vmem:[#allocation10 + $0x620] ss:$16 sps:$4 sm:$0xff]  }
 0x635   :  { %9495 = vmatprep.subr.bf16.mxu0 %v13565_v32  ;;  %9659 = vmatprep.subr.bf16.mxu1 %v13568_v8  ;;  %v13614_v32 = vld [vmem:[#allocation10 + $0x628] ss:$16 sps:$4 sm:$0xff]   ;;  %v13619_v8 = vld [vmem:[#allocation10 + $0x644] ss:$16 sps:$4 sm:$0xff]  }
 0x638   :  { %9496 = vmatpush1.bf16.msra.mxu0 %v13563_v4  ;;  %9660 = vmatpush1.bf16.msra.mxu1 %v13566_v5  ;;  %v13622_v4 = vld [vmem:[#allocation10 + $0x64c] ss:$16 sps:$4 sm:$0xff]   ;;  %v13617_v5 = vld [vmem:[#allocation10 + $0x640] ss:$16 sps:$4 sm:$0xff]  }
 0x639   :  { %9497 = vmatprep.subr.bf16.mxu0 %v13571_v6  ;;  %9661 = vmatprep.subr.bf16.mxu1 %v13574_v9  ;;  %v13620_v6 = vld [vmem:[#allocation10 + $0x648] ss:$16 sps:$4 sm:$0xff]   ;;  %v13625_v9 = vld [vmem:[#allocation10 + $0x664] ss:$16 sps:$4 sm:$0xff]  }
 0x63c   :  { %9498 = vmatpush1.bf16.msra.mxu0 %v13569_v10  ;;  %9662 = vmatpush1.bf16.msra.mxu1 %v13572_v12  ;;  %v13628_v10 = vld [vmem:[#allocation10 + $0x66c] ss:$16 sps:$4 sm:$0xff]   ;;  %v13623_v12 = vld [vmem:[#allocation10 + $0x660] ss:$16 sps:$4 sm:$0xff]  }
 0x63d   :  { %9499 = vmatprep.subr.bf16.mxu0 %v13577_v18  ;;  %9663 = vmatprep.subr.bf16.mxu1 %v13580_v13  ;;  %v13626_v18 = vld [vmem:[#allocation10 + $0x668] ss:$16 sps:$4 sm:$0xff]   ;;  %v13631_v13 = vld [vmem:[#allocation10 + $0x684] ss:$16 sps:$4 sm:$0xff]  }
 0x640   :  { %9500 = vmatpush1.bf16.msra.mxu0 %v13575_v15  ;;  %9664 = vmatpush1.bf16.msra.mxu1 %v13578_v16  ;;  %v13634_v15 = vld [vmem:[#allocation10 + $0x68c] ss:$16 sps:$4 sm:$0xff]   ;;  %v13629_v16 = vld [vmem:[#allocation10 + $0x680] ss:$16 sps:$4 sm:$0xff]  }
 0x641   :  { %9501 = vmatprep.subr.bf16.mxu0 %v13583_v11  ;;  %9665 = vmatprep.subr.bf16.mxu1 %v13586_v20  ;;  %v13632_v11 = vld [vmem:[#allocation10 + $0x688] ss:$16 sps:$4 sm:$0xff]   ;;  %v13637_v20 = vld [vmem:[#allocation10 + $0x6a4] ss:$16 sps:$4 sm:$0xff]  }
 0x644   :  { %9502 = vmatpush1.bf16.msra.mxu0 %v13581_v48  ;;  %9666 = vmatpush1.bf16.msra.mxu1 %v13584_v14  ;;  %v13640_v48 = vld [vmem:[#allocation10 + $0x6ac] ss:$16 sps:$4 sm:$0xff]   ;;  %v13635_v14 = vld [vmem:[#allocation10 + $0x6a0] ss:$16 sps:$4 sm:$0xff]  }
 0x645   :  { %9503 = vmatprep.subr.bf16.mxu0 %v13589_v22  ;;  %9667 = vmatprep.subr.bf16.mxu1 %v13592_v23  ;;  %v13638_v22 = vld [vmem:[#allocation10 + $0x6a8] ss:$16 sps:$4 sm:$0xff]   ;;  %v13643_v23 = vld [vmem:[#allocation10 + $0x6c4] ss:$16 sps:$4 sm:$0xff]  }
 0x648   :  { %9504 = vmatpush1.bf16.msra.mxu0 %v13587_v17  ;;  %9668 = vmatpush1.bf16.msra.mxu1 %v13590_v26  ;;  %v13641_v17 = vld [vmem:[#allocation10 + $0x6c0] ss:$16 sps:$4 sm:$0xff]   ;;  %v13644_v26 = vld [vmem:[#allocation10 + $0x6c8] ss:$16 sps:$4 sm:$0xff]  }
 0x649   :  { %9505 = vmatprep.subr.bf16.mxu0 %v13595_v19  ;;  %9669 = vmatprep.subr.bf16.mxu1 %v13598_v29  ;;  %v13652_v19 = vld [vmem:[#allocation10 + $0x6ec] ss:$16 sps:$4 sm:$0xff]   ;;  %v13647_v29 = vld [vmem:[#allocation10 + $0x6e0] ss:$16 sps:$4 sm:$0xff]  }
 0x64a   :  { %v7732_v37 = vpop.f32.mrb[8].mxu0 }
 0x64b   :  { %v11976_v38 = vadd.f32 %v7732_v37, %v6192_v30  ;;  %v14545_v31 = vpop.f32.mrb[8].mxu1  ;;  %v7734_v39 = vpop.f32.mrb[9].mxu0  ;;  %v13655_v30 = vld [vmem:[#allocation10 + $0x704] ss:$16 sps:$4 sm:$0xff]   ;;  %v13662_v37 = vld [vmem:[#allocation10 + $0x728] ss:$16 sps:$4 sm:$0xff]  }
 0x64c   :  { %v11977_v41 = vadd.f32 %v7734_v39, %v6196_v33  ;;  %v7816_v25 = vpop.f32.mrb[9].mxu1  ;;  %9506 = vmatpush1.bf16.msra.mxu0 %v13593_v1  ;;  %9670 = vmatpush1.bf16.msra.mxu1 %v13596_v21  ;;  %v7736_v42 = vpop.f32.mrb[10].mxu0  ;;  %v13658_v1 = vld [vmem:[#allocation10 + $0x70c] ss:$16 sps:$4 sm:$0xff]   ;;  %v13653_v21 = vld [vmem:[#allocation10 + $0x700] ss:$16 sps:$4 sm:$0xff]  }
 0x64d   :  { %v7825_v45 = vmax.f32 %v11976_v38, 0.0  ;;  %v11979_v51 = vadd.f32 %v7816_v25, %v6204_v34  ;;  %v7818_v52 = vpop.f32.mrb[10].mxu1  ;;  %v7737_v53 = vpop.f32.mrb[11].mxu0  ;;  %9507 = vmatprep.subr.bf16.mxu0 %v13601_v35  ;;  %9671 = vmatprep.subr.bf16.mxu1 %v13604_v36  ;;  %v13656_v33 = vld [vmem:[#allocation10 + $0x708] ss:$16 sps:$4 sm:$0xff]  }
 0x64e   :  { %v7826_v56 = vmax.f32 %v11977_v41, 0.0  ;;  %v7819_v28 = vpop.f32.mrb[11].mxu1  ;;  %v13661_v34 = vld [vmem:[#allocation10 + $0x724] ss:$16 sps:$4 sm:$0xff]   ;;  %v13664_v35 = vld [vmem:[#allocation10 + $0x72c] ss:$16 sps:$4 sm:$0xff]  }
 0x64f   :  { %v7828_v7 = vmax.f32 %v11979_v51, 0.0  ;;  %v7833_v62 = vpack.c.bf16 %v7825_v45, %v7825_v45  ;;  %v13659_v36 = vld [vmem:[#allocation10 + $0x720] ss:$16 sps:$4 sm:$0xff]   ;;  %v13667_v38 = vld [vmem:[#allocation10 + $0x744] ss:$16 sps:$4 sm:$0xff]  }
 0x650   :  { %v7834_v58 = vpack.c.bf16 %v7826_v56, %v7826_v56  ;;  %9508 = vmatpush1.bf16.msra.mxu0 %v13599_v40  ;;  %9672 = vmatpush1.bf16.msra.mxu1 %v13602_v43  ;;  %v13670_v39 = vld [vmem:[#allocation10 + $0x74c] ss:$16 sps:$4 sm:$0xff]   ;;  %v13665_v40 = vld [vmem:[#allocation10 + $0x740] ss:$16 sps:$4 sm:$0xff]   ;;  %v13668_v41 = vld [vmem:[#allocation10 + $0x748] ss:$16 sps:$4 sm:$0xff]  }
 0x651   :  { %9518 = vmatprep.subr.bf16.mxu0 %v13607_v44  ;;  %9682 = vmatprep.subr.bf16.mxu1 %v13610_v54  ;;  %v7836_v2 = vpack.c.bf16 %v7828_v7, %v7828_v7  ;;  %v13673_v25 = vld [vmem:[#allocation10 + $0x764] ss:$16 sps:$4 sm:$0xff]   ;;  %v13676_v42 = vld [vmem:[#allocation10 + $0x76c] ss:$16 sps:$4 sm:$0xff]   ;;  %v13671_v43 = vld [vmem:[#allocation10 + $0x760] ss:$16 sps:$4 sm:$0xff]  }
 0x652   :  { %9509 = vmatprep.mubr.bf16.mxu0 %v7834_v58  ;;  %9673 = vmatprep.mubr.bf16.mxu1 %v7834_v58  ;;  %v13674_v44 = vld [vmem:[#allocation10 + $0x768] ss:$16 sps:$4 sm:$0xff]   ;;  %v13679_v45 = vld [vmem:[#allocation10 + $0x784] ss:$16 sps:$4 sm:$0xff]   ;;  %v13682_v51 = vld [vmem:[#allocation10 + $0x78c] ss:$16 sps:$4 sm:$0xff]  }
 0x653   :  { %9510 = vmatmul.mubr.bf16.vlgmr.msra.gmra.mrb[12].mxu0 %v7833_v62  ;;  %9674 = vmatmul.mubr.bf16.vlgmr.msra.gmra.mrb[12].mxu1 %v7833_v62  ;;  %v13677_v52 = vld [vmem:[#allocation10 + $0x780] ss:$16 sps:$4 sm:$0xff]   ;;  %v13680_v53 = vld [vmem:[#allocation10 + $0x788] ss:$16 sps:$4 sm:$0xff]   ;;  %v6199_v54 = vsub.s32 6, %v14475_v46 }
 0x654   :  { %9519 = vmatpush1.bf16.msra.mxu0 %v13605_v59  ;;  %9683 = vmatpush1.bf16.msra.mxu1 %v13608_v61  ;;  %v13685_v56 = vld [vmem:[#allocation10 + $0x7a4] ss:$16 sps:$4 sm:$0xff]   ;;  %v13688_v28 = vld [vmem:[#allocation10 + $0x7ac] ss:$16 sps:$4 sm:$0xff]   ;;  %v13683_v7 = vld [vmem:[#allocation10 + $0x7a0] ss:$16 sps:$4 sm:$0xff]  }
 0x655   :  { %9550 = vmatprep.mubr.bf16.mxu0 %v7836_v2  ;;  %9714 = vmatprep.mubr.bf16.mxu1 %v7836_v2  ;;  %v13686_v58 = vld [vmem:[#allocation10 + $0x7a8] ss:$16 sps:$4 sm:$0xff]   ;;  %v6200_v59 = vrot.slane %v14526_v60, %v6199_v54  ;;  %v13691_v61 = vld [vmem:[#allocation10 + $0x7c4] ss:$16 sps:$4 sm:$0xff]   ;;  %v13694_v62 = vld [vmem:[#allocation10 + $0x7cc] ss:$16 sps:$4 sm:$0xff]  }
 0x656   :  { %9520 = vmatprep.subr.bf16.mxu0 %v13613_v63  ;;  %9684 = vmatprep.subr.bf16.mxu1 %v13616_v0  ;;  %v13689_v63 = vld [vmem:[#allocation10 + $0x7c0] ss:$16 sps:$4 sm:$0xff]   ;;  %v13692_v0 = vld [vmem:[#allocation10 + $0x7c8] ss:$16 sps:$4 sm:$0xff]   ;;  %v13697_v2 = vld [vmem:[#allocation10 + $0x7e4] ss:$16 sps:$4 sm:$0xff]  }
 0x657   :  { %v11978_v46 = vadd.f32 %v14545_v31, %v6200_v59  ;;  %v13703_v60 = vld [vmem:[#allocation13 + $0x4] ss:$8 sps:$4 sm:$0xff]   ;;  %v13704_v31 = vld [vmem:[#allocation13 + $0x10] ss:$8 sps:$4 sm:$0xff]  }
 0x658   :  { %9521 = vmatpush1.bf16.msra.mxu0 %v13611_v3  ;;  %9685 = vmatpush1.bf16.msra.mxu1 %v13614_v32  ;;  %v13700_v3 = vld [vmem:[#allocation10 + $0x7ec] ss:$16 sps:$4 sm:$0xff]   ;;  %v13695_v32 = vld [vmem:[#allocation10 + $0x7e0] ss:$16 sps:$4 sm:$0xff]  }
 0x659   :  { %9522 = vmatprep.subr.bf16.mxu0 %v13619_v8  ;;  %9686 = vmatprep.subr.bf16.mxu1 %v13622_v4  ;;  %v13698_v8 = vld [vmem:[#allocation10 + $0x7e8] ss:$16 sps:$4 sm:$0xff]   ;;  %v7827_v4 = vmax.f32 %v11978_v46, 0.0  ;;  %v13807_v54 = vld [vmem:[#allocation16 + $0x68] sm:$0xff]  }
 0x65c   :  { %9523 = vmatpush1.bf16.msra.mxu0 %v13617_v5  ;;  %9687 = vmatpush1.bf16.msra.mxu1 %v13620_v6  ;;  %v13701_v5 = vld [vmem:[#allocation13] ss:$8 sps:$4 sm:$0xff]   ;;  %v7835_v6 = vpack.c.bf16 %v7827_v4, %v7827_v4 }
 0x65d   :  { %9524 = vmatprep.subr.bf16.mxu0 %v13625_v9  ;;  %9688 = vmatprep.subr.bf16.mxu1 %v13628_v10  ;;  %v13706_v9 = vld [vmem:[#allocation13 + $0x14] ss:$8 sps:$4 sm:$0xff]   ;;  %v13709_v10 = vld [vmem:[#allocation13 + $0x24] ss:$8 sps:$4 sm:$0xff]  }
 0x660   :  { %9525 = vmatpush1.bf16.msra.mxu0 %v13623_v12  ;;  %9689 = vmatpush1.bf16.msra.mxu1 %v13626_v18  ;;  %v13707_v12 = vld [vmem:[#allocation13 + $0x20] ss:$8 sps:$4 sm:$0xff]   ;;  %v13712_v18 = vld [vmem:[#allocation13 + $0x34] ss:$8 sps:$4 sm:$0xff]  }
 0x661   :  { %9526 = vmatprep.subr.bf16.mxu0 %v13631_v13  ;;  %9690 = vmatprep.subr.bf16.mxu1 %v13634_v15  ;;  %v13710_v13 = vld [vmem:[#allocation13 + $0x30] ss:$8 sps:$4 sm:$0xff]   ;;  %v13715_v15 = vld [vmem:[#allocation13 + $0x44] ss:$8 sps:$4 sm:$0xff]  }
 0x664   :  { %9527 = vmatpush1.bf16.msra.mxu0 %v13629_v16  ;;  %9691 = vmatpush1.bf16.msra.mxu1 %v13632_v11  ;;  %v13713_v16 = vld [vmem:[#allocation13 + $0x40] ss:$8 sps:$4 sm:$0xff]   ;;  %v13718_v11 = vld [vmem:[#allocation13 + $0x54] ss:$8 sps:$4 sm:$0xff]  }
 0x665   :  { %9528 = vmatprep.subr.bf16.mxu0 %v13637_v20  ;;  %9692 = vmatprep.subr.bf16.mxu1 %v13640_v48  ;;  %v13716_v20 = vld [vmem:[#allocation13 + $0x50] ss:$8 sps:$4 sm:$0xff]   ;;  %v13721_v48 = vld [vmem:[#allocation13 + $0x64] ss:$8 sps:$4 sm:$0xff]  }
 0x668   :  { %9529 = vmatpush1.bf16.msra.mxu0 %v13635_v14  ;;  %9693 = vmatpush1.bf16.msra.mxu1 %v13638_v22  ;;  %v13719_v14 = vld [vmem:[#allocation13 + $0x60] ss:$8 sps:$4 sm:$0xff]   ;;  %v13724_v22 = vld [vmem:[#allocation13 + $0x74] ss:$8 sps:$4 sm:$0xff]  }
 0x669   :  { %9530 = vmatprep.subr.bf16.mxu0 %v13643_v23  ;;  %9694 = vmatprep.subr.bf16.mxu1 %v13646_v24  ;;  %v13722_v23 = vld [vmem:[#allocation13 + $0x70] ss:$8 sps:$4 sm:$0xff]   ;;  %v13727_v24 = vld [vmem:[#allocation13 + $0x84] ss:$8 sps:$4 sm:$0xff]  }
 0x66c   :  { %9531 = vmatpush1.bf16.msra.mxu0 %v13641_v17  ;;  %9695 = vmatpush1.bf16.msra.mxu1 %v13644_v26  ;;  %v13725_v17 = vld [vmem:[#allocation13 + $0x80] ss:$8 sps:$4 sm:$0xff]   ;;  %v13730_v26 = vld [vmem:[#allocation13 + $0x94] ss:$8 sps:$4 sm:$0xff]  }
 0x66d   :  { %9532 = vmatprep.subr.bf16.mxu0 %v13649_v27  ;;  %9696 = vmatprep.subr.bf16.mxu1 %v13652_v19  ;;  %v13728_v27 = vld [vmem:[#allocation13 + $0x90] ss:$8 sps:$4 sm:$0xff]   ;;  %v13733_v19 = vld [vmem:[#allocation13 + $0xa4] ss:$8 sps:$4 sm:$0xff]  }
 0x670   :  { %9533 = vmatpush1.bf16.msra.mxu0 %v13647_v29  ;;  %9697 = vmatpush1.bf16.msra.mxu1 %v13650_v55  ;;  %v13731_v29 = vld [vmem:[#allocation13 + $0xa0] ss:$8 sps:$4 sm:$0xff]   ;;  %v13736_v55 = vld [vmem:[#allocation13 + $0xb4] ss:$8 sps:$4 sm:$0xff]  }
 0x671   :  { %9534 = vmatprep.subr.bf16.mxu0 %v13655_v30  ;;  %9698 = vmatprep.subr.bf16.mxu1 %v13658_v1  ;;  %v13734_v30 = vld [vmem:[#allocation13 + $0xb0] ss:$8 sps:$4 sm:$0xff]   ;;  %v13739_v1 = vld [vmem:[#allocation13 + $0xc4] ss:$8 sps:$4 sm:$0xff]  }
 0x674   :  { %9535 = vmatpush1.bf16.msra.mxu0 %v13653_v21  ;;  %9699 = vmatpush1.bf16.msra.mxu1 %v13656_v33  ;;  %v13737_v21 = vld [vmem:[#allocation13 + $0xc0] ss:$8 sps:$4 sm:$0xff]   ;;  %v13742_v33 = vld [vmem:[#allocation13 + $0xd4] ss:$8 sps:$4 sm:$0xff]  }
 0x675   :  { %9536 = vmatprep.subr.bf16.mxu0 %v13661_v34  ;;  %9700 = vmatprep.subr.bf16.mxu1 %v13664_v35  ;;  %v13740_v34 = vld [vmem:[#allocation13 + $0xd0] ss:$8 sps:$4 sm:$0xff]   ;;  %v13745_v35 = vld [vmem:[#allocation13 + $0xe4] ss:$8 sps:$4 sm:$0xff]  }
 0x678   :  { %9537 = vmatpush1.bf16.msra.mxu0 %v13659_v36  ;;  %9701 = vmatpush1.bf16.msra.mxu1 %v13662_v37  ;;  %v13743_v36 = vld [vmem:[#allocation13 + $0xe0] ss:$8 sps:$4 sm:$0xff]   ;;  %v13748_v37 = vld [vmem:[#allocation13 + $0xf4] ss:$8 sps:$4 sm:$0xff]  }
 0x679   :  { %9538 = vmatprep.subr.bf16.mxu0 %v13667_v38  ;;  %9702 = vmatprep.subr.bf16.mxu1 %v13670_v39  ;;  %v13746_v38 = vld [vmem:[#allocation13 + $0xf0] ss:$8 sps:$4 sm:$0xff]   ;;  %v13751_v39 = vld [vmem:[#allocation13 + $0x104] ss:$8 sps:$4 sm:$0xff]  }
 0x67c   :  { %9539 = vmatpush1.bf16.msra.mxu0 %v13665_v40  ;;  %9703 = vmatpush1.bf16.msra.mxu1 %v13668_v41  ;;  %v13797_v40 = vld [vmem:[#allocation16 + $0x40] sm:$0xff]  }
 0x67d   :  { %9540 = vmatprep.subr.bf16.mxu0 %v13673_v25  ;;  %9704 = vmatprep.subr.bf16.mxu1 %v13676_v42  ;;  %v13798_v41 = vld [vmem:[#allocation16] sm:$0xff]   ;;  %v13799_v25 = vld [vmem:[#allocation16 + $0x48] sm:$0xff]  }
 0x67e   :  { %v13800_v42 = vld [vmem:[#allocation16 + $0x8] sm:$0xff]  }
 0x680   :  { %9541 = vmatpush1.bf16.msra.mxu0 %v13671_v43  ;;  %9705 = vmatpush1.bf16.msra.mxu1 %v13674_v44  ;;  %v13801_v43 = vld [vmem:[#allocation16 + $0x50] sm:$0xff]  }
 0x681   :  { %9542 = vmatprep.subr.bf16.mxu0 %v13679_v45  ;;  %9706 = vmatprep.subr.bf16.mxu1 %v13682_v51  ;;  %v13802_v44 = vld [vmem:[#allocation16 + $0x10] sm:$0xff]   ;;  %v13803_v45 = vld [vmem:[#allocation16 + $0x58] sm:$0xff]  }
 0x682   :  { %v13804_v51 = vld [vmem:[#allocation16 + $0x18] sm:$0xff]  }
 0x684   :  { %9543 = vmatpush1.bf16.msra.mxu0 %v13677_v52  ;;  %9707 = vmatpush1.bf16.msra.mxu1 %v13680_v53  ;;  %v13805_v52 = vld [vmem:[#allocation16 + $0x60] sm:$0xff]  }
 0x685   :  { %9544 = vmatprep.subr.bf16.mxu0 %v13685_v56  ;;  %9708 = vmatprep.subr.bf16.mxu1 %v13688_v28  ;;  %v13806_v53 = vld [vmem:[#allocation16 + $0x20] sm:$0xff]   ;;  %v13808_v56 = vld [vmem:[#allocation16 + $0x28] sm:$0xff]   ;;  %v14550_v28 = vld [vmem:[#allocation11] sm:$0xf] }
 0x686   :  { %v8110_v59 = vrot.slane %v14550_v28, %v14486_v50 }
 0x688   :  { %9545 = vmatpush1.bf16.msra.mxu0 %v13683_v7  ;;  %9709 = vmatpush1.bf16.msra.mxu1 %v13686_v58  ;;  %v8098_v7 = vrot.slane %v14550_v28, %v14478_v47  ;;  %v8102_v58 = vrot.slane %v14550_v28, %v14483_v49 }
 0x689   :  { %9546 = vmatprep.subr.bf16.mxu0 %v13691_v61  ;;  %9710 = vmatprep.subr.bf16.mxu1 %v13694_v62 }
 0x68c   :  { %9547 = vmatpush1.bf16.msra.mxu0 %v13689_v63  ;;  %9711 = vmatpush1.bf16.msra.mxu1 %v13692_v0 }
 0x68d   :  { %9548 = vmatprep.subr.bf16.mxu0 %v13697_v2  ;;  %9712 = vmatprep.subr.bf16.mxu1 %v13700_v3 }
 0x690   :  { %9549 = vmatpush1.bf16.msra.mxu0 %v13695_v32  ;;  %9713 = vmatpush1.bf16.msra.mxu1 %v13698_v8 }
 0x691   :  { %10127 = vmatprep.subr.bf16.mxu0 %v13703_v60  ;;  %11917 = vmatprep.subr.bf16.mxu1 %v13797_v40  ;;  %v13793_v40 = vld [vmem:[#allocation13 + $0x1e4] ss:$8 sps:$4 sm:$0xff]  }
 0x693   :  { %9551 = vmatmul.mubr.bf16.vlgmr.msra.gmra.mrb[12].mxu0 %v7835_v6  ;;  %9715 = vmatmul.mubr.bf16.vlgmr.msra.gmra.mrb[12].mxu1 %v7835_v6 }
 0x694   :  { %10128 = vmatpush1.bf16.msra.mxu0 %v13701_v5  ;;  %11918 = vmatpush3.bf16.msra.mxu1 %v13798_v41  ;;  %v13791_v41 = vld [vmem:[#allocation13 + $0x1e0] ss:$8 sps:$4 sm:$0xff]  }
 0x695   :  { %10129 = vmatprep.subr.bf16.mxu0 %v13706_v9  ;;  %11919 = vmatprep.subr.bf16.mxu1 %v13799_v25 }
 0x698   :  { %10130 = vmatpush1.bf16.msra.mxu0 %v13704_v31  ;;  %11920 = vmatpush3.bf16.msra.mxu1 %v13800_v42  ;;  %v13796_v42 = vld [vmem:[#allocation13 + $0x1f4] ss:$8 sps:$4 sm:$0xff]  }
 0x699   :  { %10131 = vmatprep.subr.bf16.mxu0 %v13709_v10  ;;  %11921 = vmatprep.subr.bf16.mxu1 %v13801_v43  ;;  %v13749_v10 = vld [vmem:[#allocation13 + $0x100] ss:$8 sps:$4 sm:$0xff]   ;;  %v13794_v43 = vld [vmem:[#allocation13 + $0x1f0] ss:$8 sps:$4 sm:$0xff]  }
 0x69c   :  { %10132 = vmatpush1.bf16.msra.mxu0 %v13707_v12  ;;  %11922 = vmatpush3.bf16.msra.mxu1 %v13802_v44 }
 0x69d   :  { %10133 = vmatprep.subr.bf16.mxu0 %v13712_v18  ;;  %11923 = vmatprep.subr.bf16.mxu1 %v13803_v45  ;;  %v13754_v18 = vld [vmem:[#allocation13 + $0x114] ss:$8 sps:$4 sm:$0xff]  }
 0x6a0   :  { %10134 = vmatpush1.bf16.msra.mxu0 %v13710_v13  ;;  %11924 = vmatpush3.bf16.msra.mxu1 %v13804_v51  ;;  %v13752_v13 = vld [vmem:[#allocation13 + $0x110] ss:$8 sps:$4 sm:$0xff]  }
 0x6a1   :  { %10135 = vmatprep.subr.bf16.mxu0 %v13715_v15  ;;  %11925 = vmatprep.subr.bf16.mxu1 %v13805_v52  ;;  %v13757_v15 = vld [vmem:[#allocation13 + $0x124] ss:$8 sps:$4 sm:$0xff]   ;;  %v13809_v51 = vld [vmem:[#allocation16 + $0x70] sm:$0xff]  }
 0x6a2   :  { %v13810_v52 = vld [vmem:[#allocation16 + $0x30] sm:$0xff]  }
 0x6a4   :  { %10136 = vmatpush1.bf16.msra.mxu0 %v13713_v16  ;;  %11926 = vmatpush3.bf16.msra.mxu1 %v13806_v53  ;;  %v13755_v16 = vld [vmem:[#allocation13 + $0x120] ss:$8 sps:$4 sm:$0xff]  }
 0x6a5   :  { %10137 = vmatprep.subr.bf16.mxu0 %v13718_v11  ;;  %11927 = vmatprep.subr.bf16.mxu1 %v13807_v54  ;;  %v13760_v11 = vld [vmem:[#allocation13 + $0x134] ss:$8 sps:$4 sm:$0xff]   ;;  %v14143_v54 = vmov 0.0  }
 0x6a6   :  { %v13812_v53 = vld [vmem:[#allocation16 + $0x38] sm:$0xff]  }
 0x6a8   :  { %10138 = vmatpush1.bf16.msra.mxu0 %v13716_v20  ;;  %11928 = vmatpush3.bf16.msra.mxu1 %v13808_v56  ;;  %v13758_v20 = vld [vmem:[#allocation13 + $0x130] ss:$8 sps:$4 sm:$0xff]   ;;  %v9795_v56 = vld [vmem:[#allocation14] sm:$0x3] }
 0x6a9   :  { %10139 = vmatprep.subr.bf16.mxu0 %v13721_v48  ;;  %v13763_v48 = vld [vmem:[#allocation13 + $0x144] ss:$8 sps:$4 sm:$0xff]   ;;  %11929 = vmatprep.subr.bf16.mxu1 %v13809_v51 }
 0x6ac   :  { %10140 = vmatpush1.bf16.msra.mxu0 %v13719_v14  ;;  %v13761_v14 = vld [vmem:[#allocation13 + $0x140] ss:$8 sps:$4 sm:$0xff]   ;;  %11930 = vmatpush3.bf16.msra.mxu1 %v13810_v52 }
 0x6ad   :  { %10141 = vmatprep.subr.bf16.mxu0 %v13724_v22  ;;  %v13766_v22 = vld [vmem:[#allocation13 + $0x154] ss:$8 sps:$4 sm:$0xff]  }
 0x6b0   :  { %10142 = vmatpush1.bf16.msra.mxu0 %v13722_v23  ;;  %v13764_v23 = vld [vmem:[#allocation13 + $0x150] ss:$8 sps:$4 sm:$0xff]  }
 0x6b1   :  { %10143 = vmatprep.subr.bf16.mxu0 %v13727_v24  ;;  %v13769_v24 = vld [vmem:[#allocation13 + $0x164] ss:$8 sps:$4 sm:$0xff]  }
 0x6b4   :  { %10144 = vmatpush1.bf16.msra.mxu0 %v13725_v17  ;;  %v13767_v17 = vld [vmem:[#allocation13 + $0x160] ss:$8 sps:$4 sm:$0xff]  }
 0x6b5   :  { %10145 = vmatprep.subr.bf16.mxu0 %v13730_v26  ;;  %v13772_v26 = vld [vmem:[#allocation13 + $0x174] ss:$8 sps:$4 sm:$0xff]  }
 0x6b8   :  { %10146 = vmatpush1.bf16.msra.mxu0 %v13728_v27  ;;  %v13770_v27 = vld [vmem:[#allocation13 + $0x170] ss:$8 sps:$4 sm:$0xff]  }
 0x6b9   :  { %10147 = vmatprep.subr.bf16.mxu0 %v13733_v19  ;;  %v13775_v19 = vld [vmem:[#allocation13 + $0x184] ss:$8 sps:$4 sm:$0xff]  }
 0x6bc   :  { %10148 = vmatpush1.bf16.msra.mxu0 %v13731_v29  ;;  %v13773_v29 = vld [vmem:[#allocation13 + $0x180] ss:$8 sps:$4 sm:$0xff]  }
 0x6bd   :  { %10149 = vmatprep.subr.bf16.mxu0 %v13736_v55  ;;  %v13778_v55 = vld [vmem:[#allocation13 + $0x194] ss:$8 sps:$4 sm:$0xff]  }
 0x6c0   :  { %10150 = vmatpush1.bf16.msra.mxu0 %v13734_v30  ;;  %v13776_v30 = vld [vmem:[#allocation13 + $0x190] ss:$8 sps:$4 sm:$0xff]  }
 0x6c1   :  { %10151 = vmatprep.subr.bf16.mxu0 %v13739_v1  ;;  %v13781_v1 = vld [vmem:[#allocation13 + $0x1a4] ss:$8 sps:$4 sm:$0xff]  }
 0x6c4   :  { %10152 = vmatpush1.bf16.msra.mxu0 %v13737_v21  ;;  %v13779_v21 = vld [vmem:[#allocation13 + $0x1a0] ss:$8 sps:$4 sm:$0xff]  }
 0x6c5   :  { %10153 = vmatprep.subr.bf16.mxu0 %v13742_v33  ;;  %v13784_v33 = vld [vmem:[#allocation13 + $0x1b4] ss:$8 sps:$4 sm:$0xff]  }
 0x6c8   :  { %10154 = vmatpush1.bf16.msra.mxu0 %v13740_v34  ;;  %v13782_v34 = vld [vmem:[#allocation13 + $0x1b0] ss:$8 sps:$4 sm:$0xff]  }
 0x6c9   :  { %10155 = vmatprep.subr.bf16.mxu0 %v13745_v35  ;;  %v13787_v35 = vld [vmem:[#allocation13 + $0x1c4] ss:$8 sps:$4 sm:$0xff]  }
 0x6cc   :  { %10156 = vmatpush1.bf16.msra.mxu0 %v13743_v36  ;;  %v13785_v36 = vld [vmem:[#allocation13 + $0x1c0] ss:$8 sps:$4 sm:$0xff]  }
 0x6cd   :  { %10157 = vmatprep.subr.bf16.mxu0 %v13748_v37  ;;  %v13790_v37 = vld [vmem:[#allocation13 + $0x1d4] ss:$8 sps:$4 sm:$0xff]  }
 0x6d0   :  { %10158 = vmatpush1.bf16.msra.mxu0 %v13746_v38  ;;  %v13788_v38 = vld [vmem:[#allocation13 + $0x1d0] ss:$8 sps:$4 sm:$0xff]  }
 0x6d1   :  { %10168 = vmatprep.subr.bf16.mxu0 %v13751_v39  ;;  %v8106_v39 = vrot.slane %v14550_v28, %v14509_v57  ;;  %v13811_v57 = vld [vmem:[#allocation16 + $0x78] sm:$0xff]   ;;  %v9800_v28 = vrot.slane %v9795_v56, %v14478_v47 }
 0x6d2   :  { %11931 = vmatprep.subr.bf16.mxu1 %v13811_v57  ;;  %v13815_v47 = vld [vmem:[#allocation19 + $0x10] sm:$0xff]  }
 0x6d3   :  { %11932 = vmatpush3.bf16.msra.mxu1 %v13812_v53 }
 0x6d4   :  { %11948 = vmatprep.subr.bf16.mxu1 %v14143_v54 }
 0x766   :  { %v9552_v61 = vpop.f32.mrb[12].mxu0  ;;  %v14558_v62 = vpop.f32.mrb[12].mxu1 }
 0x767   :  { %v11980_v63 = vadd.f32 %v9552_v61, %v8098_v7  ;;  %v9554_v0 = vpop.f32.mrb[13].mxu0  ;;  %v9718_v46 = vpop.f32.mrb[13].mxu1  ;;  %v11982_v25 = vadd.f32 %v14558_v62, %v8106_v39  ;;  %v9804_v7 = vrot.slane %v9795_v56, %v14483_v49  ;;  %v13816_v49 = vld [vmem:[#allocation19 + $0x18] sm:$0xff]  }
 0x768   :  { %v11981_v2 = vadd.f32 %v9554_v0, %v8102_v58  ;;  %v11983_v3 = vadd.f32 %v9718_v46, %v8110_v59  ;;  %v9556_v32 = vpop.f32.mrb[14].mxu0  ;;  %v9720_v8 = vpop.f32.mrb[14].mxu1 }
 0x769   :  { %v9723_v4 = vmax.f32 %v11980_v63, 0.0  ;;  %v9557_v60 = vpop.f32.mrb[15].mxu0  ;;  %v9721_v5 = vpop.f32.mrb[15].mxu1  ;;  %v9725_v44 = vmax.f32 %v11982_v25, 0.0  ;;  %v13813_v32 = vld [vmem:[#allocation19] sm:$0xff]  }
 0x76a   :  { %v9724_v6 = vmax.f32 %v11981_v2, 0.0  ;;  %v9726_v9 = vmax.f32 %v11983_v3, 0.0  ;;  %v13817_v60 = vld [vmem:[#allocation19 + $0x20] sm:$0xff]   ;;  %v13818_v5 = vld [vmem:[#allocation19 + $0x28] sm:$0xff]  }
 0x76b   :  { %v9727_v12 = vpack.c.bf16 %v9723_v4, %v9723_v4  ;;  %v9729_v45 = vpack.c.bf16 %v9725_v44, %v9725_v44  ;;  %v13814_v4 = vld [vmem:[#allocation19 + $0x8] sm:$0xff]  }
 0x76c   :  { %v9728_v31 = vpack.c.bf16 %v9724_v6, %v9724_v6  ;;  %v9730_v50 = vpack.c.bf16 %v9726_v9, %v9726_v9  ;;  %v13819_v6 = vld [vmem:[#allocation19 + $0x30] sm:$0xff]   ;;  %v13820_v9 = vld [vmem:[#allocation19 + $0x38] sm:$0xff]  }
 0x76e   :  { %10159 = vmatprep.mubr.bf16.mxu0 %v9728_v31 }
 0x76f   :  { %10160 = vmatmul.mubr.bf16.vlgmr.msra.gmra.mrb[16].mxu0 %v9727_v12 }
 0x770   :  { %10169 = vmatpush1.bf16.msra.mxu0 %v13749_v10  ;;  %10200 = vmatprep.mubr.bf16.mxu0 %v9730_v50  ;;  %v11891_v10 = vld [vmem:[#allocation17] ss:$0 sm:$0xff] }
 0x771   :  { %10170 = vmatprep.subr.bf16.mxu0 %v13754_v18 }
 0x774   :  { %10171 = vmatpush1.bf16.msra.mxu0 %v13752_v13 }
 0x775   :  { %10172 = vmatprep.subr.bf16.mxu0 %v13757_v15 }
 0x778   :  { %10173 = vmatpush1.bf16.msra.mxu0 %v13755_v16 }
 0x779   :  { %10174 = vmatprep.subr.bf16.mxu0 %v13760_v11 }
 0x77c   :  { %10175 = vmatpush1.bf16.msra.mxu0 %v13758_v20  ;;  %v11908_v20 = vld [vmem:[#allocation20] ss:$0 sm:$0xff] }
 0x77d   :  { %10176 = vmatprep.subr.bf16.mxu0 %v13763_v48 }
 0x780   :  { %10177 = vmatpush1.bf16.msra.mxu0 %v13761_v14 }
 0x781   :  { %10178 = vmatprep.subr.bf16.mxu0 %v13766_v22 }
 0x784   :  { %10179 = vmatpush1.bf16.msra.mxu0 %v13764_v23 }
 0x785   :  { %10180 = vmatprep.subr.bf16.mxu0 %v13769_v24 }
 0x788   :  { %10181 = vmatpush1.bf16.msra.mxu0 %v13767_v17 }
 0x789   :  { %10182 = vmatprep.subr.bf16.mxu0 %v13772_v26 }
 0x78c   :  { %10183 = vmatpush1.bf16.msra.mxu0 %v13770_v27 }
 0x78d   :  { %10184 = vmatprep.subr.bf16.mxu0 %v13775_v19 }
 0x790   :  { %10185 = vmatpush1.bf16.msra.mxu0 %v13773_v29 }
 0x791   :  { %10186 = vmatprep.subr.bf16.mxu0 %v13778_v55 }
 0x794   :  { %10187 = vmatpush1.bf16.msra.mxu0 %v13776_v30 }
 0x795   :  { %10188 = vmatprep.subr.bf16.mxu0 %v13781_v1 }
 0x798   :  { %10189 = vmatpush1.bf16.msra.mxu0 %v13779_v21 }
 0x799   :  { %10190 = vmatprep.subr.bf16.mxu0 %v13784_v33 }
 0x79c   :  { %10191 = vmatpush1.bf16.msra.mxu0 %v13782_v34 }
 0x79d   :  { %10192 = vmatprep.subr.bf16.mxu0 %v13787_v35 }
 0x7a0   :  { %10193 = vmatpush1.bf16.msra.mxu0 %v13785_v36 }
 0x7a1   :  { %10194 = vmatprep.subr.bf16.mxu0 %v13790_v37 }
 0x7a4   :  { %10195 = vmatpush1.bf16.msra.mxu0 %v13788_v38 }
 0x7a5   :  { %10196 = vmatprep.subr.bf16.mxu0 %v13793_v40 }
 0x7a8   :  { %10197 = vmatpush1.bf16.msra.mxu0 %v13791_v41 }
 0x7a9   :  { %10198 = vmatprep.subr.bf16.mxu0 %v13796_v42 }
 0x7ac   :  { %10199 = vmatpush1.bf16.msra.mxu0 %v13794_v43 }
 0x7af   :  { %10201 = vmatmul.mubr.bf16.vlgmr.msra.gmra.mrb[16].mxu0 %v9729_v45 }
 0x882   :  { %v10202_v58 = vpop.f32.mrb[16].mxu0 }
 0x883   :  { %v11984_v59 = vadd.f32 %v10202_v58, %v9800_v28  ;;  %v10204_v61 = vpop.f32.mrb[17].mxu0 }
 0x884   :  { %v11985_v62 = vadd.f32 %v10204_v61, %v9804_v7  ;;  %v10206_v63 = vpop.f32.mrb[18].mxu0 }
 0x885   :  { %v10209_v0 = vmax.f32 %v11984_v59, 0.0  ;;  %v10207_v46 = vpop.f32.mrb[19].mxu0 }
 0x886   :  { %v10210_v2 = vmax.f32 %v11985_v62, 0.0 }
 0x887   :  { %v10211_v8 = vpack.c.bf16 %v10209_v0, %v10209_v0 }
 0x888   :  { %v10212_v3 = vpack.c.bf16 %v10210_v2, %v10210_v2 }
 0x88a   :  { %10380 = vmatprep.mubr.bf16.mxu1 %v10212_v3 }
 0x88b   :  { %10381 = vmatmul.mubr.bf16.vlgmr.msra.gmra.mrb[16].mxu1 %v10211_v8 }
 0x88c   :  { %11949 = vmatpush3.bf16.msra.mxu1 %v13813_v32  ;;  %11964 = vmatprep.mubr.msk.bf16.mxu1 %vm14144_vm0, %v14143_v54 }
 0x88d   :  { %11950 = vmatprep.subr.bf16.mxu1 %v14143_v54 }
 0x890   :  { %11951 = vmatpush3.bf16.msra.mxu1 %v13814_v4 }
 0x891   :  { %11952 = vmatprep.subr.bf16.mxu1 %v14143_v54 }
 0x894   :  { %11953 = vmatpush3.bf16.msra.mxu1 %v13815_v47 }
 0x895   :  { %11954 = vmatprep.subr.bf16.mxu1 %v14143_v54 }
 0x898   :  { %11955 = vmatpush3.bf16.msra.mxu1 %v13816_v49 }
 0x899   :  { %11956 = vmatprep.subr.bf16.mxu1 %v14143_v54 }
 0x89c   :  { %11957 = vmatpush3.bf16.msra.mxu1 %v13817_v60 }
 0x89d   :  { %11958 = vmatprep.subr.bf16.mxu1 %v14143_v54 }
 0x8a0   :  { %11959 = vmatpush3.bf16.msra.mxu1 %v13818_v5 }
 0x8a1   :  { %11960 = vmatprep.subr.bf16.mxu1 %v14143_v54 }
 0x8a4   :  { %11961 = vmatpush3.bf16.msra.mxu1 %v13819_v6 }
 0x8a5   :  { %11962 = vmatprep.subr.bf16.mxu1 %v14143_v54 }
 0x8a8   :  { %11963 = vmatpush3.bf16.msra.mxu1 %v13820_v9 }
 0x95e   :  { %v11933_v31 = vpop.f32.mrb[16].mxu1 }
 0x95f   :  { %v11934_v12 = vpop.f32.mrb[17].mxu1 }
 0x960   :  { %v11935_v18 = vadd.f32 %v11934_v12, %v11933_v31  ;;  %v11936_v50 = vpop.f32.mrb[18].mxu1 }
 0x961   :  { %v11937_v13 = vpop.f32.mrb[19].mxu1 }
 0x962   :  { %v10383_v15 = vadd.f32 %v11935_v18, %v11891_v10 }
 0x964   :  { %v10388_v16 = vmax.f32 %v10383_v15, 0.0 }
 0x966   :  { %v10389_v11 = vpack.c.bf16 %v10388_v16, %v10388_v16 }
 0x968   :  { %11965 = vmatmul.mubr.bf16.vlgmr.msra.gmra.mrb[20].mxu1 %v10389_v11 }
 0xa3b   :  { %v10495_v48 = vpop.f32.mrb[20].mxu1 }
 0xa3c   :  { %v10496_v14 = vadd.f32 %v11908_v20, %v10495_v48  ;;  %v11966_v22 = vpop.f32.mrb[21].mxu1 }
 0xa3d   :  { %v10498_v23 = vpop.f32.mrb[22].mxu1 }
 0xa3e   :  { %10501 = vst [vmem:[#allocation22] sm:$0xff] %v10496_v14  ;;  %v11967_v24 = vpop.f32.mrb[23].mxu1 }
 0xa3f   :  { %14096 = shalt.err (!%p14093_p2)
}
 0xa40   :  { %s14097_s7 = scalar_lea.hbm %s14590_s13, 128 }
 0xa41   :  { %p14098_p3 = scmp.ne.s32.totalorder %s14590_s13, %s14097_s7  ;;  %p14101_p4 = scmp.lt.u32.totalorder %s14097_s7, %s14590_s13 }
 0xa43   :  { %p14103_p5 = pnand %p14101_p4, %p14098_p3 }
 0xa45   :  { %14106 = shalt.err (!%p14103_p5)
}
 0xa46   :  { %10511 = dma.vmem_to_hbm [thread:$0]  %s10509_s29, 128, %s14590_s13, [#allocation4]  }
 0xa47   :  { %14121 = dma.done.wait [#allocation4], 128  }
 0xa48   :  { %14122 = vsyncadd [#allocation4], 4294967168 }
 0xa49   :  { %10515 = vsyncpa [#allocation3], 1 }
 0xa4a   :  { %10516 = vsyncpa [#allocation6], 1 }
 0xa4b   :  { %10517 = vsyncpa [#allocation9], 1 }
 0xa4c   :  { %10518 = vsyncpa [#allocation12], 1 }
 0xa4d   :  { %10519 = vsyncpa [#allocation15], 1 }
 0xa4e   :  { %10520 = vsyncpa [#allocation18], 1 }
 0xa4f   :  { %10521 = vsyncpa [#allocation21], 1 }
 0xa50   :  { %10522 = vsyncpa [#allocation4], 1 }

</bundles_post_ra>
